<compile_context>
chip_gen: v6e
topology: v6e:2x2x1
jax: 0.10.0
libtpu: 0.0.40
codegen_flags: <defaults>
</compile_context>

<pallas_src>
import numpy as np
import jax
import jax.numpy as jnp
from jax import lax
from jax.experimental import pallas as pl
from jax.experimental.pallas import tpu as pltpu

D = 768      # CLIP feature dim (Adapter hardcodes 768 -> 384 -> 768)
H = 384      # Adapter hidden dim
RATIO = 0.4  # residual blend ratio from the PyTorch forward


def _round_up(x, m):
    return (x + m - 1) // m * m


def clip_adapter_kernel(scale_ref, img_ref, wimg_ref, txt_t_ref, w1_ref,
                        w2_ref, out_ref, acc_ref):
    """Grid = (batch tiles, K tiles over flattened pixels).

    scale_ref : [1]         exp(logit_scale) (SMEM)
    img_ref   : [TB, TK]    flattened image pixel tile (bf16, VMEM)
    wimg_ref  : [TK, D]     stub visual-encoder projection tile (bf16, VMEM)
    txt_t_ref : [D, Cp]     pre-normalized, pre-transposed text feats (bf16)
    w1_ref    : [D, H]      adapter fc1 weight, pre-transposed (bf16)
    w2_ref    : [H, D]      adapter fc2 weight, pre-transposed (bf16)
    out_ref   : [TB, Cp]    logits (f32, VMEM)
    acc_ref   : [TB, D]     f32 img_feat accumulator (scratch)
    """
    k = pl.program_id(1)

    @pl.when(k == 0)
    def _():
        acc_ref[...] = jnp.zeros_like(acc_ref)

    # "image encoder" (stub): accumulate the pixel->feature projection over K
    # tiles (bf16 MXU operands, f32 accumulation).
    acc_ref[...] += jnp.dot(img_ref[...], wimg_ref[...],
                            preferred_element_type=jnp.float32)

    @pl.when(k == pl.num_programs(1) - 1)
    def _():
        img_feat = acc_ref[...]

        # Adapter: ReLU(ReLU(x @ W1) @ W2)  (Linear(bias=False) => x @ W.T;
        # weights are stored pre-transposed so the kernel uses plain matmuls).
        h = jnp.maximum(
            jnp.dot(img_feat.astype(jnp.bfloat16), w1_ref[...],
                    preferred_element_type=jnp.float32), 0.0)
        x = jnp.maximum(
            jnp.dot(h.astype(jnp.bfloat16), w2_ref[...],
                    preferred_element_type=jnp.float32), 0.0)

        # residual blend: ratio * adapter(x) + (1 - ratio) * image_features
        feat = RATIO * x + (1.0 - RATIO) * img_feat

        # L2 normalize along the feature dim (rsqrt -> EUP slot; tiny floor
        # only protects the all-zero padded batch rows).
        ss = jnp.sum(feat * feat, axis=-1, keepdims=True)
        feat = feat * lax.rsqrt(jnp.maximum(ss, 1e-30))

        # logits = exp(logit_scale) * image_features @ text_features.T
        # (text already transposed to [D, Cp] -> native MXU [K, N] layout)
        logits = jnp.dot(feat.astype(jnp.bfloat16), txt_t_ref[...],
                         preferred_element_type=jnp.float32)
        out_ref[...] = scale_ref[0] * logits


def custom_clip_forward(image, w_img, text_features, w1, w2, logit_scale):
    """image: [B, 3, Hc, Wc] NCHW float32. Returns logits [B, num_classes]."""
    B = image.shape[0]
    P = int(np.prod(image.shape[1:]))
    C = text_features.shape[0]

    # --- one-time per-class-set precompute (text features are fixed) ---------
    txt = text_features.astype(jnp.float32)
    txt = txt * lax.rsqrt(jnp.sum(txt * txt, axis=-1, keepdims=True))
    C_pad = _round_up(max(C, 128), 128)                 # lane-dense output dim
    txt_t = jnp.pad(txt, ((0, C_pad - C), (0, 0))).T    # [D, C_pad]
    txt_t = txt_t.astype(jnp.bfloat16)
    scale = jnp.exp(jnp.asarray([logit_scale], dtype=jnp.float32))

    # --- batch tiling: pick TB from candidates to minimize padded rows -------
    B16 = _round_up(B, 16)                              # full bf16 sublane pack
    candidates = (16, 32, 64, 128, 256)
    TB = min(candidates, key=lambda t: (_round_up(B16, t), -t))
    B_pad = _round_up(B16, TB)
    n_b = B_pad // TB

    # --- K tiling over the flattened pixel dim --------------------------------
    TK_TARGET = 2048
    P128 = _round_up(P, 128)
    if P128 <= TK_TARGET:
        TK = P128
        P_pad = P128
    else:
        TK = TK_TARGET
        P_pad = _round_up(P, TK)
    n_k = P_pad // TK

    img_flat = image.reshape(B, P).astype(jnp.float32)
    img_flat = jnp.pad(img_flat, ((0, B_pad - B), (0, P_pad - P)))
    img_flat = img_flat.astype(jnp.bfloat16)

    w_img_b = jnp.pad(w_img.astype(jnp.float32),
                      ((0, P_pad - P), (0, 0))).astype(jnp.bfloat16)
    w1_b = w1.astype(jnp.bfloat16)
    w2_b = w2.astype(jnp.bfloat16)

    # --- cost estimate / VMEM budget ------------------------------------------
    flops = 2 * B_pad * (P_pad * D + D * H + H * D + D * C_pad)
    bytes_accessed = (2 * img_flat.size
                      + 2 * n_b * (P_pad * D)                       # W_img per batch tile
                      + 2 * (D * C_pad + D * H + H * D)             # resident operands
                      + 4 * (B_pad * C_pad + 1))
    vmem_bytes = (2 * TB * TK * 2          # image tile, 2 buffers, bf16
                  + 2 * TK * D * 2         # W_img tile, 2 buffers, bf16
                  + D * C_pad * 2          # text features, single buffer
                  + D * H * 2 + H * D * 2  # adapter weights, single buffer
                  + 2 * TB * C_pad * 4     # output tile, 2 buffers, f32
                  + TB * D * 4             # img_feat accumulator
                  + 4 * TB * max(D, max(H, C_pad)) * 4  # f32 intermediates
                  + (2 << 20))             # slack
    vmem_limit = int(min(64 << 20, max(32 << 20, int(vmem_bytes * 1.5))))

    # v7x: sharding few batch tiles across 2 TCs duplicates weight DMA; only
    # go "parallel" on the batch axis when there is enough work to amortize it.
    batch_sem = "parallel" if n_b >= 4 else "arbitrary"

    logits = pl.pallas_call(
        clip_adapter_kernel,
        out_shape=jax.ShapeDtypeStruct((B_pad, C_pad), jnp.float32),
        grid=(n_b, n_k),
        in_specs=[
            pl.BlockSpec(memory_space=pltpu.MemorySpace.SMEM),     # exp(logit_scale)
            pl.BlockSpec((TB, TK), lambda i, k: (i, k)),           # image tile
            pl.BlockSpec((TK, D), lambda i, k: (k, 0)),            # W_img tile
            pl.BlockSpec((D, C_pad), lambda i, k: (0, 0),
                         pipeline_mode=pl.Buffered(1)),            # text feats (resident)
            pl.BlockSpec((D, H), lambda i, k: (0, 0),
                         pipeline_mode=pl.Buffered(1)),            # adapter W1 (resident)
            pl.BlockSpec((H, D), lambda i, k: (0, 0),
                         pipeline_mode=pl.Buffered(1)),            # adapter W2 (resident)
        ],
        out_specs=pl.BlockSpec((TB, C_pad), lambda i, k: (i, 0)),
        scratch_shapes=[pltpu.VMEM((TB, D), jnp.float32)],
        compiler_params=pltpu.CompilerParams(
            dimension_semantics=(batch_sem, "arbitrary"),
            vmem_limit_bytes=vmem_limit),
        cost_estimate=pl.CostEstimate(flops=flops, transcendentals=B_pad,
                                      bytes_accessed=bytes_accessed),
    )(scale, img_flat, w_img_b, txt_t, w1_b, w2_b)

    return logits[:B, :C]


def reference_forward(image, w_img, text_features, w1, w2, logit_scale):
    """Pure-JAX f32 reference mirroring the PyTorch forward."""
    B = image.shape[0]
    img_feat = image.reshape(B, -1).astype(jnp.float32) @ w_img
    x = jnp.maximum(jnp.maximum(img_feat @ w1, 0.0) @ w2, 0.0)
    feat = RATIO * x + (1.0 - RATIO) * img_feat
    feat = feat / jnp.linalg.norm(feat, axis=-1, keepdims=True)
    txt = text_features / jnp.linalg.norm(text_features, axis=-1, keepdims=True)
    return jnp.exp(logit_scale) * feat @ txt.T


if __name__ == "__main__":
    key = jax.random.PRNGKey(0)
    k_img, k_wimg, k_txt, k_w1, k_w2 = jax.random.split(key, 5)

    B, Cch, S = 2, 3, 16          # batch, channels, spatial
    NUM_CLASSES = 8
    P = Cch * S * S               # 768 flattened pixels

    # deterministic example inputs / parameters
    image = jax.random.normal(k_img, (B, Cch, S, S), dtype=jnp.float32)
    w_img = jax.random.normal(k_wimg, (P, D), dtype=jnp.float32) * 0.02
    text_features = jax.random.normal(k_txt, (NUM_CLASSES, D), dtype=jnp.float32)
    w1 = jax.random.normal(k_w1, (D, H), dtype=jnp.float32) * 0.02
    w2 = jax.random.normal(k_w2, (H, D), dtype=jnp.float32) * 0.02
    logit_scale = float(np.log(1.0 / 0.07))  # CLIP's logit_scale init

    logits = custom_clip_forward(image, w_img, text_features, w1, w2, logit_scale)
    logits = jax.block_until_ready(logits)

    ref = reference_forward(image, w_img, text_features, w1, w2, logit_scale)
    # bf16 matmul operands with f32 accumulation vs pure-f32 reference.
    np.testing.assert_allclose(np.asarray(logits), np.asarray(ref),
                               rtol=2e-2, atol=2e-2)

    print("KERNEL_OK")
</pallas_src>

<mosaic_0001>
module attributes {stable_mosaic.version = 11 : i64} {
  func.func @clip_adapter_kernel(%arg0: i32, %arg1: i32, %arg2: memref<1xf32, #tpu.memory_space<smem>>, %arg3: memref<16x768xbf16, #tpu.memory_space<vmem>>, %arg4: memref<768x768xbf16, #tpu.memory_space<vmem>>, %arg5: memref<768x128xbf16, #tpu.memory_space<vmem>>, %arg6: memref<768x384xbf16, #tpu.memory_space<vmem>>, %arg7: memref<384x768xbf16, #tpu.memory_space<vmem>>, %arg8: memref<16x128xf32, #tpu.memory_space<vmem>>, %arg9: memref<16x768xf32, #tpu.memory_space<vmem>>) attributes {dimension_semantics = [#tpu.dimension_semantics<arbitrary>, #tpu.dimension_semantics<arbitrary>], iteration_bounds = array<i64: 1, 1>, scalar_prefetch = 0 : i64, scratch_operands = 1 : i64, tpu.core_type = #tpu.core_type<tc>, window_params = [{transform_indices = @transform_0, window_bounds = array<i64: 1>}, {transform_indices = @transform_1, window_bounds = array<i64: 16, 768>}, {transform_indices = @transform_2, window_bounds = array<i64: 768, 768>}, {pipeline_mode = #tpu.pipeline_mode<synchronous>, transform_indices = @transform_3, window_bounds = array<i64: 768, 128>}, {pipeline_mode = #tpu.pipeline_mode<synchronous>, transform_indices = @transform_4, window_bounds = array<i64: 768, 384>}, {pipeline_mode = #tpu.pipeline_mode<synchronous>, transform_indices = @transform_5, window_bounds = array<i64: 384, 768>}, {transform_indices = @transform_6, window_bounds = array<i64: 16, 128>}]} {
    %c0_i32 = arith.constant 0 : i32
    %0 = arith.cmpi eq, %arg1, %c0_i32 : i32
    %1 = arith.extui %0 : i1 to i32
    %c0_i32_0 = arith.constant 0 : i32
    %2 = arith.cmpi ne, %1, %c0_i32_0 : i32
    scf.if %2 {
      %cst_10 = arith.constant 0.000000e+00 : f32
      %12 = vector.broadcast %cst_10 : f32 to vector<16x768xf32>
      %c0_11 = arith.constant 0 : index
      %c0_12 = arith.constant 0 : index
      %13 = vector.load %arg9[%c0_11, %c0_12] : memref<16x768xf32, #tpu.memory_space<vmem>>, vector<16x768xf32>
      tpu.vector_store %arg9[%c0_11, %c0_12], %12 {strides = array<i32>} : memref<16x768xf32, #tpu.memory_space<vmem>>, vector<16x768xf32>,
    } else {
    }
    %c0 = arith.constant 0 : index
    %c0_1 = arith.constant 0 : index
    %3 = vector.load %arg9[%c0, %c0_1] : memref<16x768xf32, #tpu.memory_space<vmem>>, vector<16x768xf32>
    %c0_2 = arith.constant 0 : index
    %c0_3 = arith.constant 0 : index
    %4 = vector.load %arg3[%c0_2, %c0_3] : memref<16x768xbf16, #tpu.memory_space<vmem>>, vector<16x768xbf16>
    %c0_4 = arith.constant 0 : index
    %c0_5 = arith.constant 0 : index
    %5 = vector.load %arg4[%c0_4, %c0_5] : memref<768x768xbf16, #tpu.memory_space<vmem>>, vector<768x768xbf16>
    %cst = arith.constant dense<0.000000e+00> : vector<16x768xf32>
    %6 = tpu.matmul %4, %5, %cst {dimension_numbers = #tpu.dot_dimension_numbers<[1], [0], [0], [1], [0, 0, 1, 1], [], []>} : vector<16x768xbf16>, vector<768x768xbf16>, vector<16x768xf32> -> vector<16x768xf32>
    %7 = arith.addf %3, %6 : vector<16x768xf32>
    %c0_6 = arith.constant 0 : index
    %c0_7 = arith.constant 0 : index
    %8 = vector.load %arg9[%c0_6, %c0_7] : memref<16x768xf32, #tpu.memory_space<vmem>>, vector<16x768xf32>
    tpu.vector_store %arg9[%c0_6, %c0_7], %7 {strides = array<i32>} : memref<16x768xf32, #tpu.memory_space<vmem>>, vector<16x768xf32>,
    %c0_i32_8 = arith.constant 0 : i32
    %9 = arith.cmpi eq, %arg1, %c0_i32_8 : i32
    %10 = arith.extui %9 : i1 to i32
    %c0_i32_9 = arith.constant 0 : i32
    %11 = arith.cmpi ne, %10, %c0_i32_9 : i32
    scf.if %11 {
      %c0_10 = arith.constant 0 : index
      %c0_11 = arith.constant 0 : index
      %12 = vector.load %arg9[%c0_10, %c0_11] : memref<16x768xf32, #tpu.memory_space<vmem>>, vector<16x768xf32>
      %13 = arith.truncf %12 : vector<16x768xf32> to vector<16x768xbf16>
      %c0_12 = arith.constant 0 : index
      %c0_13 = arith.constant 0 : index
      %14 = vector.load %arg6[%c0_12, %c0_13] : memref<768x384xbf16, #tpu.memory_space<vmem>>, vector<768x384xbf16>
      %cst_14 = arith.constant dense<0.000000e+00> : vector<16x384xf32>
      %15 = tpu.matmul %13, %14, %cst_14 {dimension_numbers = #tpu.dot_dimension_numbers<[1], [0], [0], [1], [0, 0, 1, 1], [], []>} : vector<16x768xbf16>, vector<768x384xbf16>, vector<16x384xf32> -> vector<16x384xf32>
      %cst_15 = arith.constant 0.000000e+00 : f32
      %16 = vector.broadcast %cst_15 : f32 to vector<16x384xf32>
      %17 = arith.maximumf %15, %16 : vector<16x384xf32>
      %18 = arith.truncf %17 : vector<16x384xf32> to vector<16x384xbf16>
      %c0_16 = arith.constant 0 : index
      %c0_17 = arith.constant 0 : index
      %19 = vector.load %arg7[%c0_16, %c0_17] : memref<384x768xbf16, #tpu.memory_space<vmem>>, vector<384x768xbf16>
      %cst_18 = arith.constant dense<0.000000e+00> : vector<16x768xf32>
      %20 = tpu.matmul %18, %19, %cst_18 {dimension_numbers = #tpu.dot_dimension_numbers<[1], [0], [0], [1], [0, 0, 1, 1], [], []>} : vector<16x384xbf16>, vector<384x768xbf16>, vector<16x768xf32> -> vector<16x768xf32>
      %cst_19 = arith.constant 0.000000e+00 : f32
      %21 = vector.broadcast %cst_19 : f32 to vector<16x768xf32>
      %22 = arith.maximumf %20, %21 : vector<16x768xf32>
      %cst_20 = arith.constant 4.000000e-01 : f32
      %23 = vector.broadcast %cst_20 : f32 to vector<16x768xf32>
      %24 = arith.mulf %23, %22 : vector<16x768xf32>
      %cst_21 = arith.constant 6.000000e-01 : f32
      %25 = vector.broadcast %cst_21 : f32 to vector<16x768xf32>
      %26 = arith.mulf %25, %12 : vector<16x768xf32>
      %27 = arith.addf %24, %26 : vector<16x768xf32>
      %28 = arith.mulf %27, %27 : vector<16x768xf32>
      %cst_22 = arith.constant dense<0.000000e+00> : vector<16xf32>
      %29 = vector.multi_reduction <add>, %28, %cst_22 [1] : vector<16x768xf32> to vector<16xf32>
      %30 = vector.shape_cast %29 : vector<16xf32> to vector<16x1xf32>
      %cst_23 = arith.constant 1.000000e-30 : f32
      %31 = vector.broadcast %cst_23 : f32 to vector<16x1xf32>
      %32 = arith.maximumf %30, %31 : vector<16x1xf32>
      %33 = math.rsqrt %32 : vector<16x1xf32>
      %34 = vector.broadcast %33 : vector<16x1xf32> to vector<16x768xf32>
      %35 = arith.mulf %27, %34 : vector<16x768xf32>
      %36 = arith.truncf %35 : vector<16x768xf32> to vector<16x768xbf16>
      %c0_24 = arith.constant 0 : index
      %c0_25 = arith.constant 0 : index
      %37 = vector.load %arg5[%c0_24, %c0_25] : memref<768x128xbf16, #tpu.memory_space<vmem>>, vector<768x128xbf16>
      %cst_26 = arith.constant dense<0.000000e+00> : vector<16x128xf32>
      %38 = tpu.matmul %36, %37, %cst_26 {dimension_numbers = #tpu.dot_dimension_numbers<[1], [0], [0], [1], [0, 0, 1, 1], [], []>} : vector<16x768xbf16>, vector<768x128xbf16>, vector<16x128xf32> -> vector<16x128xf32>
      %c0_27 = arith.constant 0 : index
      %39 = memref.load %arg2[%c0_27] : memref<1xf32, #tpu.memory_space<smem>>
      %40 = vector.broadcast %39 : f32 to vector<16x128xf32>
      %41 = arith.mulf %40, %38 : vector<16x128xf32>
      %c0_28 = arith.constant 0 : index
      %c0_29 = arith.constant 0 : index
      %42 = vector.load %arg8[%c0_28, %c0_29] : memref<16x128xf32, #tpu.memory_space<vmem>>, vector<16x128xf32>
      tpu.vector_store %arg8[%c0_28, %c0_29], %41 {strides = array<i32>} : memref<16x128xf32, #tpu.memory_space<vmem>>, vector<16x128xf32>,
    } else {
    }
    return
  }
  func.func @transform_0(%arg0: i32, %arg1: i32) -> i32 {
    %c0_i32 = arith.constant 0 : i32
    %c0_i32_0 = arith.constant 0 : i32
    return %c0_i32 : i32
  }
  func.func @transform_1(%arg0: i32, %arg1: i32) -> (i32, i32) {
    %c0_i32 = arith.constant 0 : i32
    return %arg0, %arg1 : i32, i32
  }
  func.func @transform_2(%arg0: i32, %arg1: i32) -> (i32, i32) {
    %c0_i32 = arith.constant 0 : i32
    %c0_i32_0 = arith.constant 0 : i32
    return %arg1, %c0_i32 : i32, i32
  }
  func.func @transform_3(%arg0: i32, %arg1: i32) -> (i32, i32) {
    %c0_i32 = arith.constant 0 : i32
    %c0_i32_0 = arith.constant 0 : i32
    %c0_i32_1 = arith.constant 0 : i32
    return %c0_i32, %c0_i32_0 : i32, i32
  }
  func.func @transform_4(%arg0: i32, %arg1: i32) -> (i32, i32) {
    %c0_i32 = arith.constant 0 : i32
    %c0_i32_0 = arith.constant 0 : i32
    %c0_i32_1 = arith.constant 0 : i32
    return %c0_i32, %c0_i32_0 : i32, i32
  }
  func.func @transform_5(%arg0: i32, %arg1: i32) -> (i32, i32) {
    %c0_i32 = arith.constant 0 : i32
    %c0_i32_0 = arith.constant 0 : i32
    %c0_i32_1 = arith.constant 0 : i32
    return %c0_i32, %c0_i32_0 : i32, i32
  }
  func.func @transform_6(%arg0: i32, %arg1: i32) -> (i32, i32) {
    %c0_i32 = arith.constant 0 : i32
    %c0_i32_0 = arith.constant 0 : i32
    return %arg0, %c0_i32 : i32, i32
  }
}

</mosaic_0001>

<bundles_post_ra>
// kernel: tpu_custom_call.1
= control target key start
LH: loop header
LB: loop body
LE: loop exit
PB: predicated region body
PF: predicated region fallthrough
CT: control target
= control target key end

     0   :  { %12 = vsyncpa [#allocation5], 0  ;;  %s7343_s0 = inlined_call_operand.<no memory space> [shape: f32[1], index: 0, kind: input, shape index: {}]   ;;  %s7344_s1 = inlined_call_operand.hbm [shape: bf16[16,768], index: 1, kind: input, shape index: {}]   ;;  %s7345_s2 = inlined_call_operand.hbm [shape: bf16[768,768], index: 2, kind: input, shape index: {}]   ;;  %s7346_s3 = inlined_call_operand.hbm [shape: bf16[768,128], index: 3, kind: input, shape index: {}]   ;;  %s7347_s4 = inlined_call_operand.hbm [shape: bf16[768,384], index: 4, kind: input, shape index: {}]   ;;  %s7348_s5 = inlined_call_operand.hbm [shape: bf16[384,768], index: 5, kind: input, shape index: {}]   ;;  %s7349_s6 = inlined_call_operand.hbm [shape: f32[16,128], index: 6, kind: output, shape index: {}]  }
   0x1   :  { %13 = vsyncpa [#allocation8], 0 }
   0x2   :  { %14 = vsyncpa [#allocation11], 0 }
   0x3   :  { %15 = vsyncpa [#allocation6], 0  ;;  %s7101_s21 = smov [#allocation7]   ;;  %s7102_s23 = smov [#allocation10]  }
   0x4   :  { %s35_s22 = sshll.u32 %s7101_s21, 4  ;;  %s59_s24 = sshll.u32 %s7102_s23, 4  ;;  %s36_s22 = int_to_ptr.vmem [resolvable:$true] %s35_s22  ;;  %s60_s24 = int_to_ptr.vmem [resolvable:$true] %s59_s24 }
   0x5   :  { %s6981_s25 = scalar_lea.vmem %s36_s22, 36864  ;;  %p6986_p1 = scmp.lt.s32.totalorder %s36_s22, %s36_s22 }
   0x6   :  { %p6982_p0 = scmp.ne.s32.totalorder %s36_s22, %s6981_s25  ;;  %p6987_p2 = scmp.lt.s32.totalorder %s6981_s25, %s6981_s25 }
   0x8   :  { %p6988_p3 = por %p6987_p2, %p6986_p1 }
   0xa   :  { %p6989_p4 = pnand %p6988_p3, %p6982_p0 }
   0xc   :  { %6992 = shalt.err (!%p6989_p4)
}
   0xd   :  { %s7103_s26 = smov 384   ;;  %s7104_s27 = smov 24  }
   0xe   :  { %41 = dma.hbm_to_vmem [thread:$0]  %s7345_s2, 36864, %s36_s22, [#allocation8], %s7103_s26, %s7103_s26, %s7104_s27  }
   0xf   :  { %s7001_s30 = scalar_lea.vmem %s60_s24, 18432  ;;  %p7006_p6 = scmp.lt.s32.totalorder %s60_s24, %s60_s24 }
  0x10   :  { %p7002_p5 = scmp.ne.s32.totalorder %s60_s24, %s7001_s30  ;;  %p7007_p7 = scmp.lt.s32.totalorder %s7001_s30, %s7001_s30 }
  0x12   :  { %p7008_p8 = por %p7007_p7, %p7006_p6 }
  0x14   :  { %p7009_p9 = pnand %p7008_p8, %p7002_p5 }
  0x16   :  { %7012 = shalt.err (!%p7009_p9)
}
  0x17   :  { %s7105_s7 = smov 192   ;;  %s7106_s8 = smov 12  }
  0x18   :  { %65 = dma.hbm_to_vmem [thread:$0]  %s7347_s4, 18432, %s60_s24, [#allocation11], %s7105_s7, %s7105_s7, %s7106_s8  }
  0x19   :  { %s7107_s11 = smov [#allocation4]   ;;  %s7108_s13 = smov [#allocation9]  }
  0x1a   :  { %s23_s12 = sshll.u32 %s7107_s11, 4  ;;  %s47_s14 = sshll.u32 %s7108_s13, 4  ;;  %s24_s12 = int_to_ptr.vmem [resolvable:$true] %s23_s12  ;;  %s48_s14 = int_to_ptr.vmem [resolvable:$true] %s47_s14 }
  0x1b   :  { %s7021_s2 = scalar_lea.vmem %s24_s12, 768  ;;  %p7026_p11 = scmp.lt.s32.totalorder %s24_s12, %s24_s12 }
  0x1c   :  { %p7022_p10 = scmp.ne.s32.totalorder %s24_s12, %s7021_s2  ;;  %p7027_p12 = scmp.lt.s32.totalorder %s7021_s2, %s7021_s2 }
  0x1e   :  { %p7028_p13 = por %p7027_p12, %p7026_p11 }
  0x20   :  { %p7029_p0 = pnand %p7028_p13, %p7022_p10 }
  0x22   :  { %7032 = shalt.err (!%p7029_p0)
}
  0x23   :  { %29 = dma.hbm_to_vmem [thread:$0]  %s7344_s1, 768, %s24_s12, [#allocation5], %s7103_s26, %s7103_s26, %s7104_s27  }
  0x24   :  { %s7041_s4 = scalar_lea.vmem %s48_s14, 6144  ;;  %p7046_p2 = scmp.lt.s32.totalorder %s48_s14, %s48_s14 }
  0x25   :  { %p7042_p1 = scmp.ne.s32.totalorder %s48_s14, %s7041_s4  ;;  %p7047_p3 = scmp.lt.s32.totalorder %s7041_s4, %s7041_s4 }
  0x27   :  { %p7048_p4 = por %p7047_p3, %p7046_p2 }
  0x29   :  { %p7049_p5 = pnand %p7048_p4, %p7042_p1 }
  0x2b   :  { %7052 = shalt.err (!%p7049_p5)
}
  0x2c   :  { %s7109_s17 = smov 64   ;;  %s7110_s18 = smov 4  }
  0x2d   :  { %53 = dma.hbm_to_vmem [thread:$0]  %s7346_s3, 6144, %s48_s14, [#allocation8], %s7109_s17, %s7109_s17, %s7110_s18  }
  0x2e   :  { %s7111_s21 = smov [#allocation12]  }
  0x2f   :  { %s71_s22 = sshll.u32 %s7111_s21, 4  ;;  %s72_s22 = int_to_ptr.vmem [resolvable:$true] %s71_s22 }
  0x30   :  { %s7061_s23 = scalar_lea.vmem %s72_s22, 18432  ;;  %p7066_p7 = scmp.lt.s32.totalorder %s72_s22, %s72_s22 }
  0x31   :  { %p7062_p6 = scmp.ne.s32.totalorder %s72_s22, %s7061_s23  ;;  %p7067_p8 = scmp.lt.s32.totalorder %s7061_s23, %s7061_s23 }
  0x33   :  { %p7068_p9 = por %p7067_p8, %p7066_p7 }
  0x35   :  { %p7069_p10 = pnand %p7068_p9, %p7062_p6 }
  0x37   :  { %7072 = shalt.err (!%p7069_p10)
}
  0x38   :  { %77 = dma.hbm_to_vmem [thread:$0]  %s7348_s5, 18432, %s72_s22, [#allocation11], %s7103_s26, %s7103_s26, %s7104_s27  }
  0x39   :  { %7093 = dma.done.wait [#allocation5], 768  }
  0x3a   :  { %7094 = vsyncadd [#allocation5], 4294966528 }
  0x3b   :  { %7095 = dma.done.wait [#allocation8], 43008  }
  0x3c   :  { %7096 = vsyncadd [#allocation8], 4294924288 }
  0x3d   :  { %7097 = dma.done.wait [#allocation11], 36864  }
  0x3e   :  { %7098 = vsyncadd [#allocation11], 4294930432  ;;  %v6066_v0 = vld [vmem:[#allocation7 + $0x154] ss:$24 sps:$4 sm:$0xff]   ;;  %v6070_v2 = vld [vmem:[#allocation7 + $0x150] ss:$24 sps:$4 sm:$0xff]  }
  0x3f   :  { %v6068_v1 = vld [vmem:[#allocation7 + $0x454] ss:$24 sps:$4 sm:$0xff]   ;;  %1886 = vmatprep.subr.bf16.mxu0 %v6066_v0  ;;  %v6071_v3 = vld [vmem:[#allocation7 + $0x450] ss:$24 sps:$4 sm:$0xff]   ;;  %v6072_v4 = vld [vmem:[#allocation7 + $0x124] ss:$24 sps:$4 sm:$0xff]  }
  0x40   :  { %1929 = vmatprep.subr.bf16.mxu1 %v6068_v1  ;;  %1887 = vmatpush1.bf16.msra.mxu0 %v6070_v2  ;;  %v6074_v5 = vld [vmem:[#allocation7 + $0x424] ss:$24 sps:$4 sm:$0xff]   ;;  %v6076_v6 = vld [vmem:[#allocation7 + $0x120] ss:$24 sps:$4 sm:$0xff]   ;;  %v6078_v8 = vld [vmem:[#allocation7 + $0xf4] ss:$24 sps:$4 sm:$0xff]  }
  0x41   :  { %1930 = vmatpush1.bf16.msra.mxu1 %v6071_v3  ;;  %1888 = vmatprep.subr.bf16.mxu0 %v6072_v4  ;;  %v6077_v7 = vld [vmem:[#allocation7 + $0x420] ss:$24 sps:$4 sm:$0xff]   ;;  %v6080_v9 = vld [vmem:[#allocation7 + $0x3f4] ss:$24 sps:$4 sm:$0xff]   ;;  %v6082_v10 = vld [vmem:[#allocation7 + $0xf0] ss:$24 sps:$4 sm:$0xff]  }
  0x42   :  { %1931 = vmatprep.subr.bf16.mxu1 %v6074_v5  ;;  %v6083_v11 = vld [vmem:[#allocation7 + $0x3f0] ss:$24 sps:$4 sm:$0xff]   ;;  %v6084_v12 = vld [vmem:[#allocation7 + $0xc4] ss:$24 sps:$4 sm:$0xff]   ;;  %v6088_v14 = vld [vmem:[#allocation7 + $0xc0] ss:$24 sps:$4 sm:$0xff]  }
  0x43   :  { %v6086_v13 = vld [vmem:[#allocation7 + $0x3c4] ss:$24 sps:$4 sm:$0xff]   ;;  %v6089_v15 = vld [vmem:[#allocation7 + $0x3c0] ss:$24 sps:$4 sm:$0xff]   ;;  %v6090_v16 = vld [vmem:[#allocation7 + $0x94] ss:$24 sps:$4 sm:$0xff]  }
  0x44   :  { %1889 = vmatpush1.bf16.msra.mxu0 %v6076_v6  ;;  %v6092_v17 = vld [vmem:[#allocation7 + $0x394] ss:$24 sps:$4 sm:$0xff]   ;;  %v6094_v18 = vld [vmem:[#allocation7 + $0x90] ss:$24 sps:$4 sm:$0xff]   ;;  %v6096_v20 = vld [vmem:[#allocation7 + $0x64] ss:$24 sps:$4 sm:$0xff]  }
  0x45   :  { %1932 = vmatpush1.bf16.msra.mxu1 %v6077_v7  ;;  %1890 = vmatprep.subr.bf16.mxu0 %v6078_v8  ;;  %v6095_v19 = vld [vmem:[#allocation7 + $0x390] ss:$24 sps:$4 sm:$0xff]   ;;  %v6098_v21 = vld [vmem:[#allocation7 + $0x364] ss:$24 sps:$4 sm:$0xff]   ;;  %v6100_v22 = vld [vmem:[#allocation7 + $0x60] ss:$24 sps:$4 sm:$0xff]  }
  0x46   :  { %1933 = vmatprep.subr.bf16.mxu1 %v6080_v9  ;;  %v6101_v23 = vld [vmem:[#allocation7 + $0x360] ss:$24 sps:$4 sm:$0xff]   ;;  %v6102_v24 = vld [vmem:[#allocation7 + $0x34] ss:$24 sps:$4 sm:$0xff]   ;;  %v6106_v26 = vld [vmem:[#allocation7 + $0x30] ss:$24 sps:$4 sm:$0xff]  }
  0x47   :  { %v6104_v25 = vld [vmem:[#allocation7 + $0x334] ss:$24 sps:$4 sm:$0xff]   ;;  %v6107_v27 = vld [vmem:[#allocation7 + $0x330] ss:$24 sps:$4 sm:$0xff]   ;;  %v6108_v28 = vld [vmem:[#allocation7 + $0x4] ss:$24 sps:$4 sm:$0xff]  }
  0x48   :  { %1891 = vmatpush1.bf16.msra.mxu0 %v6082_v10  ;;  %v6110_v29 = vld [vmem:[#allocation7 + $0x304] ss:$24 sps:$4 sm:$0xff]   ;;  %v6112_v30 = vld [vmem:[#allocation7] ss:$24 sps:$4 sm:$0xff]   ;;  %v6114_v32 = vld [vmem:[#allocation7 + $0x2d4] ss:$24 sps:$4 sm:$0xff]  }
  0x49   :  { %1934 = vmatpush1.bf16.msra.mxu1 %v6083_v11  ;;  %1892 = vmatprep.subr.bf16.mxu0 %v6084_v12  ;;  %v6113_v31 = vld [vmem:[#allocation7 + $0x300] ss:$24 sps:$4 sm:$0xff]   ;;  %v6116_v33 = vld [vmem:[#allocation7 + $0x5d4] ss:$24 sps:$4 sm:$0xff]   ;;  %v6118_v34 = vld [vmem:[#allocation7 + $0x2d0] ss:$24 sps:$4 sm:$0xff]  }
  0x4a   :  { %1935 = vmatprep.subr.bf16.mxu1 %v6086_v13  ;;  %v6119_v35 = vld [vmem:[#allocation7 + $0x5d0] ss:$24 sps:$4 sm:$0xff]   ;;  %v6120_v36 = vld [vmem:[#allocation7 + $0x2a4] ss:$24 sps:$4 sm:$0xff]   ;;  %v6124_v38 = vld [vmem:[#allocation7 + $0x2a0] ss:$24 sps:$4 sm:$0xff]  }
  0x4b   :  { %v6122_v37 = vld [vmem:[#allocation7 + $0x5a4] ss:$24 sps:$4 sm:$0xff]   ;;  %v6125_v39 = vld [vmem:[#allocation7 + $0x5a0] ss:$24 sps:$4 sm:$0xff]   ;;  %v6126_v40 = vld [vmem:[#allocation7 + $0x274] ss:$24 sps:$4 sm:$0xff]  }
  0x4c   :  { %1893 = vmatpush1.bf16.msra.mxu0 %v6088_v14  ;;  %v6128_v41 = vld [vmem:[#allocation7 + $0x574] ss:$24 sps:$4 sm:$0xff]   ;;  %v6130_v42 = vld [vmem:[#allocation7 + $0x270] ss:$24 sps:$4 sm:$0xff]   ;;  %v6132_v44 = vld [vmem:[#allocation7 + $0x244] ss:$24 sps:$4 sm:$0xff]  }
  0x4d   :  { %1936 = vmatpush1.bf16.msra.mxu1 %v6089_v15  ;;  %1894 = vmatprep.subr.bf16.mxu0 %v6090_v16  ;;  %v6131_v43 = vld [vmem:[#allocation7 + $0x570] ss:$24 sps:$4 sm:$0xff]   ;;  %v6134_v45 = vld [vmem:[#allocation7 + $0x544] ss:$24 sps:$4 sm:$0xff]   ;;  %v6136_v46 = vld [vmem:[#allocation7 + $0x240] ss:$24 sps:$4 sm:$0xff]  }
  0x4e   :  { %1937 = vmatprep.subr.bf16.mxu1 %v6092_v17  ;;  %v6137_v47 = vld [vmem:[#allocation7 + $0x540] ss:$24 sps:$4 sm:$0xff]   ;;  %v6162_v48 = vld [vmem:[#allocation4 + $0x4] ss:$24 sps:$4 sm:$0xff]   ;;  %v6142_v52 = vld [vmem:[#allocation7 + $0x210] ss:$24 sps:$4 sm:$0xff]  }
  0x4f   :  { %v6138_v49 = vld [vmem:[#allocation7 + $0x214] ss:$24 sps:$4 sm:$0xff]   ;;  %1918 = vmatprep.mubr.bf16.mxu0 %v6162_v48  ;;  %v6143_v53 = vld [vmem:[#allocation7 + $0x510] ss:$24 sps:$4 sm:$0xff]   ;;  %v6144_v54 = vld [vmem:[#allocation7 + $0x1e4] ss:$24 sps:$4 sm:$0xff]  }
  0x50   :  { %1895 = vmatpush1.bf16.msra.mxu0 %v6094_v18  ;;  %v7175_v50 = vld [vmem:[#allocation4 + $0xc] ss:$24 sps:$4 sm:$0xff]   ;;  %v6148_v56 = vld [vmem:[#allocation7 + $0x1e0] ss:$24 sps:$4 sm:$0xff]   ;;  %v6154_v60 = vld [vmem:[#allocation7 + $0x1b0] ss:$24 sps:$4 sm:$0xff]  }
  0x51   :  { %1938 = vmatpush1.bf16.msra.mxu1 %v6095_v19  ;;  %1896 = vmatprep.subr.bf16.mxu0 %v6096_v20  ;;  %v6140_v51 = vld [vmem:[#allocation7 + $0x514] ss:$24 sps:$4 sm:$0xff]   ;;  %v6146_v55 = vld [vmem:[#allocation7 + $0x4e4] ss:$24 sps:$4 sm:$0xff]   ;;  %v6149_v57 = vld [vmem:[#allocation7 + $0x4e0] ss:$24 sps:$4 sm:$0xff]  }
  0x52   :  { %1939 = vmatprep.subr.bf16.mxu1 %v6098_v21  ;;  %1961 = vmatprep.mubr.bf16.mxu1 %v7175_v50  ;;  %v6150_v58 = vld [vmem:[#allocation7 + $0x1b4] ss:$24 sps:$4 sm:$0xff]   ;;  %v6155_v61 = vld [vmem:[#allocation7 + $0x4b0] ss:$24 sps:$4 sm:$0xff]   ;;  %v6156_v62 = vld [vmem:[#allocation7 + $0x184] ss:$24 sps:$4 sm:$0xff]  }
  0x53   :  { %v6152_v59 = vld [vmem:[#allocation7 + $0x4b4] ss:$24 sps:$4 sm:$0xff]   ;;  %v6158_v63 = vld [vmem:[#allocation7 + $0x484] ss:$24 sps:$4 sm:$0xff]   ;;  %v6160_v0 = vld [vmem:[#allocation7 + $0x180] ss:$24 sps:$4 sm:$0xff]  }
  0x54   :  { %1897 = vmatpush1.bf16.msra.mxu0 %v6100_v22  ;;  %v6161_v1 = vld [vmem:[#allocation7 + $0x480] ss:$24 sps:$4 sm:$0xff]   ;;  %v6170_v2 = vld [vmem:[#allocation7 + $0x754] ss:$24 sps:$4 sm:$0xff]   ;;  %v7178_v4 = vld [vmem:[#allocation4] ss:$24 sps:$4 sm:$0xff]  }
  0x55   :  { %1940 = vmatpush1.bf16.msra.mxu1 %v6101_v23  ;;  %1898 = vmatprep.subr.bf16.mxu0 %v6102_v24  ;;  %v6173_v3 = vld [vmem:[#allocation7 + $0x15c] ss:$24 sps:$4 sm:$0xff]   ;;  %v7180_v5 = vld [vmem:[#allocation4 + $0x8] ss:$24 sps:$4 sm:$0xff]   ;;  %v6179_v9 = vld [vmem:[#allocation7 + $0x12c] ss:$24 sps:$4 sm:$0xff]  }
  0x56   :  { %1941 = vmatprep.subr.bf16.mxu1 %v6104_v25  ;;  %v6168_v6 = vld [vmem:[#allocation7 + $0x750] ss:$24 sps:$4 sm:$0xff]   ;;  %v6176_v8 = vld [vmem:[#allocation7 + $0x724] ss:$24 sps:$4 sm:$0xff]   ;;  %v6174_v10 = vld [vmem:[#allocation7 + $0x720] ss:$24 sps:$4 sm:$0xff]  }
  0x57   :  { %v6171_v7 = vld [vmem:[#allocation7 + $0x158] ss:$24 sps:$4 sm:$0xff]   ;;  %v6177_v11 = vld [vmem:[#allocation7 + $0x128] ss:$24 sps:$4 sm:$0xff]   ;;  %v6182_v12 = vld [vmem:[#allocation7 + $0x6f4] ss:$24 sps:$4 sm:$0xff]  }
  0x58   :  { %1899 = vmatpush1.bf16.msra.mxu0 %v6106_v26  ;;  %v6185_v13 = vld [vmem:[#allocation7 + $0xfc] ss:$24 sps:$4 sm:$0xff]   ;;  %v6180_v14 = vld [vmem:[#allocation7 + $0x6f0] ss:$24 sps:$4 sm:$0xff]   ;;  %v6191_v17 = vld [vmem:[#allocation7 + $0xcc] ss:$24 sps:$4 sm:$0xff]  }
  0x59   :  { %1942 = vmatpush1.bf16.msra.mxu1 %v6107_v27  ;;  %1900 = vmatprep.subr.bf16.mxu0 %v6108_v28  ;;  %v6183_v15 = vld [vmem:[#allocation7 + $0xf8] ss:$24 sps:$4 sm:$0xff]   ;;  %v6188_v16 = vld [vmem:[#allocation7 + $0x6c4] ss:$24 sps:$4 sm:$0xff]   ;;  %v6189_v19 = vld [vmem:[#allocation7 + $0xc8] ss:$24 sps:$4 sm:$0xff]  }
  0x5a   :  { %1943 = vmatprep.subr.bf16.mxu1 %v6110_v29  ;;  %v6186_v18 = vld [vmem:[#allocation7 + $0x6c0] ss:$24 sps:$4 sm:$0xff]   ;;  %v6194_v20 = vld [vmem:[#allocation7 + $0x694] ss:$24 sps:$4 sm:$0xff]   ;;  %v6192_v22 = vld [vmem:[#allocation7 + $0x690] ss:$24 sps:$4 sm:$0xff]  }
  0x5b   :  { %v6197_v21 = vld [vmem:[#allocation7 + $0x9c] ss:$24 sps:$4 sm:$0xff]   ;;  %v6195_v23 = vld [vmem:[#allocation7 + $0x98] ss:$24 sps:$4 sm:$0xff]   ;;  %v6203_v25 = vld [vmem:[#allocation7 + $0x6c] ss:$24 sps:$4 sm:$0xff]  }
  0x5c   :  { %1901 = vmatpush1.bf16.msra.mxu0 %v6112_v30  ;;  %v6200_v24 = vld [vmem:[#allocation7 + $0x664] ss:$24 sps:$4 sm:$0xff]   ;;  %v6198_v26 = vld [vmem:[#allocation7 + $0x660] ss:$24 sps:$4 sm:$0xff]   ;;  %v6206_v28 = vld [vmem:[#allocation7 + $0x634] ss:$24 sps:$4 sm:$0xff]  }
  0x5d   :  { %1944 = vmatpush1.bf16.msra.mxu1 %v6113_v31  ;;  %1902 = vmatprep.subr.bf16.mxu0 %v6114_v32  ;;  %v6201_v27 = vld [vmem:[#allocation7 + $0x68] ss:$24 sps:$4 sm:$0xff]   ;;  %v6209_v29 = vld [vmem:[#allocation7 + $0x3c] ss:$24 sps:$4 sm:$0xff]   ;;  %v6207_v31 = vld [vmem:[#allocation7 + $0x38] ss:$24 sps:$4 sm:$0xff]  }
  0x5e   :  { %1945 = vmatprep.subr.bf16.mxu1 %v6116_v33  ;;  %v6204_v30 = vld [vmem:[#allocation7 + $0x630] ss:$24 sps:$4 sm:$0xff]   ;;  %v6212_v32 = vld [vmem:[#allocation7 + $0x604] ss:$24 sps:$4 sm:$0xff]   ;;  %s7113_s25 = smov [#allocation13]  }
  0x5f   :  { %v6215_v33 = vld [vmem:[#allocation7 + $0xc] ss:$24 sps:$4 sm:$0xff]   ;;  %s5275_s26 = sshll.u32 %s7113_s25, 4  ;;  %s5276_s26 = int_to_ptr.vmem [resolvable:$true] %s5275_s26 }
  0x60   :  { %1903 = vmatpush2.bf16.msra.mxu0 %v6118_v34  ;;  %v7184_v34 = vld [vmem:[#allocation4 + $0x14] ss:$24 sps:$4 sm:$0xff]   ;;  %s7073_s27 = scalar_lea.vmem %s5276_s26, 256  ;;  %p7078_p12 = scmp.lt.s32.totalorder %s5276_s26, %s5276_s26 }
  0x61   :  { %1946 = vmatpush2.bf16.msra.mxu1 %v6119_v35  ;;  %1904 = vmatprep.subr.bf16.mxu0 %v6120_v36  ;;  %v6210_v35 = vld [vmem:[#allocation7 + $0x600] ss:$24 sps:$4 sm:$0xff]   ;;  %p7074_p11 = scmp.ne.s32.totalorder %s5276_s26, %s7073_s27  ;;  %p7079_p13 = scmp.lt.s32.totalorder %s7073_s27, %s7073_s27 }
  0x62   :  { %1947 = vmatprep.subr.bf16.mxu1 %v6122_v37  ;;  %v6213_v36 = vld [vmem:[#allocation7 + $0x8] ss:$24 sps:$4 sm:$0xff]   ;;  %v6218_v37 = vld [vmem:[#allocation7 + $0x8d4] ss:$24 sps:$4 sm:$0xff]  }
  0x63   :  { %p7080_p0 = por %p7079_p13, %p7078_p12 }
  0x64   :  { %1905 = vmatpush2.bf16.msra.mxu0 %v6124_v38  ;;  %v6221_v38 = vld [vmem:[#allocation7 + $0x2dc] ss:$24 sps:$4 sm:$0xff]  }
  0x65   :  { %1948 = vmatpush2.bf16.msra.mxu1 %v6125_v39  ;;  %1906 = vmatprep.subr.bf16.mxu0 %v6126_v40  ;;  %v6216_v39 = vld [vmem:[#allocation7 + $0x8d0] ss:$24 sps:$4 sm:$0xff]   ;;  %p7081_p1 = pnand %p7080_p0, %p7074_p11 }
  0x66   :  { %1949 = vmatprep.subr.bf16.mxu1 %v6128_v41  ;;  %v6219_v40 = vld [vmem:[#allocation7 + $0x2d8] ss:$24 sps:$4 sm:$0xff]   ;;  %v6224_v41 = vld [vmem:[#allocation7 + $0x8a4] ss:$24 sps:$4 sm:$0xff]  }
  0x68   :  { %1907 = vmatpush2.bf16.msra.mxu0 %v6130_v42  ;;  %v6227_v42 = vld [vmem:[#allocation7 + $0x2ac] ss:$24 sps:$4 sm:$0xff]  }
  0x69   :  { %1950 = vmatpush2.bf16.msra.mxu1 %v6131_v43  ;;  %1908 = vmatprep.subr.bf16.mxu0 %v6132_v44  ;;  %v6222_v43 = vld [vmem:[#allocation7 + $0x8a0] ss:$24 sps:$4 sm:$0xff]  }
  0x6a   :  { %1951 = vmatprep.subr.bf16.mxu1 %v6134_v45  ;;  %v6225_v44 = vld [vmem:[#allocation7 + $0x2a8] ss:$24 sps:$4 sm:$0xff]   ;;  %v6230_v45 = vld [vmem:[#allocation7 + $0x874] ss:$24 sps:$4 sm:$0xff]  }
  0x6c   :  { %1909 = vmatpush2.bf16.msra.mxu0 %v6136_v46  ;;  %v6233_v46 = vld [vmem:[#allocation7 + $0x27c] ss:$24 sps:$4 sm:$0xff]  }
  0x6d   :  { %1952 = vmatpush2.bf16.msra.mxu1 %v6137_v47  ;;  %1910 = vmatprep.subr.bf16.mxu0 %v6138_v49  ;;  %v6228_v47 = vld [vmem:[#allocation7 + $0x870] ss:$24 sps:$4 sm:$0xff]   ;;  %v6236_v49 = vld [vmem:[#allocation7 + $0x844] ss:$24 sps:$4 sm:$0xff]  }
  0x6e   :  { %1953 = vmatprep.subr.bf16.mxu1 %v6140_v51  ;;  %v6239_v51 = vld [vmem:[#allocation7 + $0x24c] ss:$24 sps:$4 sm:$0xff]  }
  0x70   :  { %1911 = vmatpush2.bf16.msra.mxu0 %v6142_v52  ;;  %v6234_v52 = vld [vmem:[#allocation7 + $0x840] ss:$24 sps:$4 sm:$0xff]  }
  0x71   :  { %1954 = vmatpush2.bf16.msra.mxu1 %v6143_v53  ;;  %1912 = vmatprep.subr.bf16.mxu0 %v6144_v54  ;;  %v6237_v53 = vld [vmem:[#allocation7 + $0x248] ss:$24 sps:$4 sm:$0xff]   ;;  %v6242_v54 = vld [vmem:[#allocation7 + $0x814] ss:$24 sps:$4 sm:$0xff]  }
  0x72   :  { %1955 = vmatprep.subr.bf16.mxu1 %v6146_v55  ;;  %v6245_v55 = vld [vmem:[#allocation7 + $0x21c] ss:$24 sps:$4 sm:$0xff]  }
  0x74   :  { %1913 = vmatpush2.bf16.msra.mxu0 %v6148_v56  ;;  %v6240_v56 = vld [vmem:[#allocation7 + $0x810] ss:$24 sps:$4 sm:$0xff]  }
  0x75   :  { %1956 = vmatpush2.bf16.msra.mxu1 %v6149_v57  ;;  %1914 = vmatprep.subr.bf16.mxu0 %v6150_v58  ;;  %v6243_v57 = vld [vmem:[#allocation7 + $0x218] ss:$24 sps:$4 sm:$0xff]   ;;  %v6248_v58 = vld [vmem:[#allocation7 + $0x7e4] ss:$24 sps:$4 sm:$0xff]  }
  0x76   :  { %1957 = vmatprep.subr.bf16.mxu1 %v6152_v59  ;;  %v6251_v59 = vld [vmem:[#allocation7 + $0x1ec] ss:$24 sps:$4 sm:$0xff]  }
  0x78   :  { %1915 = vmatpush2.bf16.msra.mxu0 %v6154_v60  ;;  %v6246_v60 = vld [vmem:[#allocation7 + $0x7e0] ss:$24 sps:$4 sm:$0xff]  }
  0x79   :  { %1958 = vmatpush2.bf16.msra.mxu1 %v6155_v61  ;;  %1916 = vmatprep.subr.bf16.mxu0 %v6156_v62  ;;  %v6249_v61 = vld [vmem:[#allocation7 + $0x1e8] ss:$24 sps:$4 sm:$0xff]   ;;  %v6254_v62 = vld [vmem:[#allocation7 + $0x7b4] ss:$24 sps:$4 sm:$0xff]  }
  0x7a   :  { %1959 = vmatprep.subr.bf16.mxu1 %v6158_v63  ;;  %v6257_v63 = vld [vmem:[#allocation7 + $0x1bc] ss:$24 sps:$4 sm:$0xff]  }
  0x7c   :  { %1917 = vmatpush2.bf16.msra.mxu0 %v6160_v0  ;;  %v6252_v0 = vld [vmem:[#allocation7 + $0x7b0] ss:$24 sps:$4 sm:$0xff]  }
  0x7d   :  { %1960 = vmatpush2.bf16.msra.mxu1 %v6161_v1  ;;  %1972 = vmatprep.subr.bf16.mxu0 %v6170_v2  ;;  %v6255_v1 = vld [vmem:[#allocation7 + $0x1b8] ss:$24 sps:$4 sm:$0xff]   ;;  %v6260_v2 = vld [vmem:[#allocation7 + $0x784] ss:$24 sps:$4 sm:$0xff]  }
  0x7e   :  { %2015 = vmatprep.subr.bf16.mxu1 %v6173_v3  ;;  %v6263_v3 = vld [vmem:[#allocation7 + $0x18c] ss:$24 sps:$4 sm:$0xff]  }
  0x7f   :  { %1919 = vmatmul.mubr.bf16.vlgmr.msra.gmra.mxu0 %v7178_v4 }
  0x80   :  { %1962 = vmatmul.mubr.bf16.vlgmr.msra.gmra.mxu1 %v7180_v5  ;;  %1973 = vmatpush1.bf16.msra.mxu0 %v6168_v6  ;;  %v6258_v6 = vld [vmem:[#allocation7 + $0x780] ss:$24 sps:$4 sm:$0xff]  }
  0x81   :  { %2016 = vmatpush1.bf16.msra.mxu1 %v6171_v7  ;;  %1974 = vmatprep.subr.bf16.mxu0 %v6176_v8  ;;  %v6261_v7 = vld [vmem:[#allocation7 + $0x188] ss:$24 sps:$4 sm:$0xff]   ;;  %v6269_v8 = vld [vmem:[#allocation7 + $0x45c] ss:$24 sps:$4 sm:$0xff]  }
  0x82   :  { %2017 = vmatprep.subr.bf16.mxu1 %v6179_v9  ;;  %2047 = vmatprep.mubr.bf16.mxu1 %v6162_v48  ;;  %v6231_v48 = vld [vmem:[#allocation7 + $0x278] ss:$24 sps:$4 sm:$0xff]   ;;  %v6272_v9 = vld [vmem:[#allocation7 + $0x75c] ss:$24 sps:$4 sm:$0xff]  }
  0x83   :  { %2004 = vmatprep.mubr.bf16.mxu0 %v7184_v34 }
  0x84   :  { %1975 = vmatpush1.bf16.msra.mxu0 %v6174_v10  ;;  %v7187_v10 = vld [vmem:[#allocation4 + $0x10] ss:$24 sps:$4 sm:$0xff]  }
  0x85   :  { %2018 = vmatpush1.bf16.msra.mxu1 %v6177_v11  ;;  %1976 = vmatprep.subr.bf16.mxu0 %v6182_v12  ;;  %v6267_v11 = vld [vmem:[#allocation7 + $0x458] ss:$24 sps:$4 sm:$0xff]  }
  0x86   :  { %2019 = vmatprep.subr.bf16.mxu1 %v6185_v13  ;;  %v6270_v12 = vld [vmem:[#allocation7 + $0x758] ss:$24 sps:$4 sm:$0xff]   ;;  %v6275_v13 = vld [vmem:[#allocation7 + $0x42c] ss:$24 sps:$4 sm:$0xff]  }
  0x88   :  { %1977 = vmatpush1.bf16.msra.mxu0 %v6180_v14  ;;  %v6278_v14 = vld [vmem:[#allocation7 + $0x72c] ss:$24 sps:$4 sm:$0xff]  }
  0x89   :  { %2020 = vmatpush1.bf16.msra.mxu1 %v6183_v15  ;;  %1978 = vmatprep.subr.bf16.mxu0 %v6188_v16  ;;  %v6273_v15 = vld [vmem:[#allocation7 + $0x428] ss:$24 sps:$4 sm:$0xff]  }
  0x8a   :  { %2021 = vmatprep.subr.bf16.mxu1 %v6191_v17  ;;  %v6276_v16 = vld [vmem:[#allocation7 + $0x728] ss:$24 sps:$4 sm:$0xff]   ;;  %v6281_v17 = vld [vmem:[#allocation7 + $0x3fc] ss:$24 sps:$4 sm:$0xff]  }
  0x8c   :  { %1979 = vmatpush1.bf16.msra.mxu0 %v6186_v18  ;;  %v6284_v18 = vld [vmem:[#allocation7 + $0x6fc] ss:$24 sps:$4 sm:$0xff]  }
  0x8d   :  { %2022 = vmatpush1.bf16.msra.mxu1 %v6189_v19  ;;  %1980 = vmatprep.subr.bf16.mxu0 %v6194_v20  ;;  %v6279_v19 = vld [vmem:[#allocation7 + $0x3f8] ss:$24 sps:$4 sm:$0xff]  }
  0x8e   :  { %2023 = vmatprep.subr.bf16.mxu1 %v6197_v21  ;;  %v6282_v20 = vld [vmem:[#allocation7 + $0x6f8] ss:$24 sps:$4 sm:$0xff]   ;;  %v6287_v21 = vld [vmem:[#allocation7 + $0x3cc] ss:$24 sps:$4 sm:$0xff]  }
  0x90   :  { %1981 = vmatpush1.bf16.msra.mxu0 %v6192_v22  ;;  %v6285_v22 = vld [vmem:[#allocation7 + $0x3c8] ss:$24 sps:$4 sm:$0xff]  }
  0x91   :  { %2024 = vmatpush1.bf16.msra.mxu1 %v6195_v23  ;;  %1982 = vmatprep.subr.bf16.mxu0 %v6200_v24  ;;  %v6288_v23 = vld [vmem:[#allocation7 + $0x6c8] ss:$24 sps:$4 sm:$0xff]   ;;  %v6293_v24 = vld [vmem:[#allocation7 + $0x39c] ss:$24 sps:$4 sm:$0xff]  }
  0x92   :  { %2025 = vmatprep.subr.bf16.mxu1 %v6203_v25  ;;  %v6296_v25 = vld [vmem:[#allocation7 + $0x69c] ss:$24 sps:$4 sm:$0xff]  }
  0x94   :  { %1983 = vmatpush1.bf16.msra.mxu0 %v6198_v26  ;;  %v6291_v26 = vld [vmem:[#allocation7 + $0x398] ss:$24 sps:$4 sm:$0xff]  }
  0x95   :  { %2026 = vmatpush1.bf16.msra.mxu1 %v6201_v27  ;;  %1984 = vmatprep.subr.bf16.mxu0 %v6206_v28  ;;  %v6299_v27 = vld [vmem:[#allocation7 + $0x36c] ss:$24 sps:$4 sm:$0xff]  }
  0x96   :  { %2027 = vmatprep.subr.bf16.mxu1 %v6209_v29  ;;  %v6302_v28 = vld [vmem:[#allocation7 + $0x66c] ss:$24 sps:$4 sm:$0xff]   ;;  %v6297_v29 = vld [vmem:[#allocation7 + $0x368] ss:$24 sps:$4 sm:$0xff]  }
  0x98   :  { %1985 = vmatpush1.bf16.msra.mxu0 %v6204_v30  ;;  %v6300_v30 = vld [vmem:[#allocation7 + $0x668] ss:$24 sps:$4 sm:$0xff]  }
  0x99   :  { %2028 = vmatpush1.bf16.msra.mxu1 %v6207_v31  ;;  %1986 = vmatprep.subr.bf16.mxu0 %v6212_v32  ;;  %v6305_v31 = vld [vmem:[#allocation7 + $0x33c] ss:$24 sps:$4 sm:$0xff]  }
  0x9a   :  { %2029 = vmatprep.subr.bf16.mxu1 %v6215_v33  ;;  %v6308_v32 = vld [vmem:[#allocation7 + $0x63c] ss:$24 sps:$4 sm:$0xff]   ;;  %v6303_v33 = vld [vmem:[#allocation7 + $0x338] ss:$24 sps:$4 sm:$0xff]  }
  0x9c   :  { %1987 = vmatpush1.bf16.msra.mxu0 %v6210_v35  ;;  %v6311_v35 = vld [vmem:[#allocation7 + $0x30c] ss:$24 sps:$4 sm:$0xff]  }
  0x9d   :  { %2030 = vmatpush1.bf16.msra.mxu1 %v6213_v36  ;;  %1988 = vmatprep.subr.bf16.mxu0 %v6218_v37  ;;  %v6314_v36 = vld [vmem:[#allocation7 + $0x60c] ss:$24 sps:$4 sm:$0xff]   ;;  %v6309_v37 = vld [vmem:[#allocation7 + $0x308] ss:$24 sps:$4 sm:$0xff]  }
  0x9e   :  { %2031 = vmatprep.subr.bf16.mxu1 %v6221_v38  ;;  %v6312_v38 = vld [vmem:[#allocation7 + $0x608] ss:$24 sps:$4 sm:$0xff]  }
  0xa0   :  { %1989 = vmatpush2.bf16.msra.mxu0 %v6216_v39  ;;  %v6317_v39 = vld [vmem:[#allocation7 + $0x5dc] ss:$24 sps:$4 sm:$0xff]  }
  0xa1   :  { %2032 = vmatpush2.bf16.msra.mxu1 %v6219_v40  ;;  %1990 = vmatprep.subr.bf16.mxu0 %v6224_v41  ;;  %v6320_v40 = vld [vmem:[#allocation7 + $0x8dc] ss:$24 sps:$4 sm:$0xff]   ;;  %v6315_v41 = vld [vmem:[#allocation7 + $0x5d8] ss:$24 sps:$4 sm:$0xff]  }
  0xa2   :  { %2033 = vmatprep.subr.bf16.mxu1 %v6227_v42  ;;  %v6318_v42 = vld [vmem:[#allocation7 + $0x8d8] ss:$24 sps:$4 sm:$0xff]  }
  0xa4   :  { %1991 = vmatpush2.bf16.msra.mxu0 %v6222_v43  ;;  %v6323_v43 = vld [vmem:[#allocation7 + $0x5ac] ss:$24 sps:$4 sm:$0xff]  }
  0xa5   :  { %2034 = vmatpush2.bf16.msra.mxu1 %v6225_v44  ;;  %1992 = vmatprep.subr.bf16.mxu0 %v6230_v45  ;;  %v6326_v44 = vld [vmem:[#allocation7 + $0x8ac] ss:$24 sps:$4 sm:$0xff]   ;;  %v6321_v45 = vld [vmem:[#allocation7 + $0x5a8] ss:$24 sps:$4 sm:$0xff]  }
  0xa6   :  { %2035 = vmatprep.subr.bf16.mxu1 %v6233_v46  ;;  %v6324_v46 = vld [vmem:[#allocation7 + $0x8a8] ss:$24 sps:$4 sm:$0xff]  }
  0xa8   :  { %1993 = vmatpush2.bf16.msra.mxu0 %v6228_v47  ;;  %v6329_v47 = vld [vmem:[#allocation7 + $0x57c] ss:$24 sps:$4 sm:$0xff]  }
  0xa9   :  { %2036 = vmatpush2.bf16.msra.mxu1 %v6231_v48  ;;  %1994 = vmatprep.subr.bf16.mxu0 %v6236_v49  ;;  %v6332_v48 = vld [vmem:[#allocation7 + $0x87c] ss:$24 sps:$4 sm:$0xff]   ;;  %v6327_v49 = vld [vmem:[#allocation7 + $0x578] ss:$24 sps:$4 sm:$0xff]  }
  0xaa   :  { %2037 = vmatprep.subr.bf16.mxu1 %v6239_v51  ;;  %v6330_v51 = vld [vmem:[#allocation7 + $0x878] ss:$24 sps:$4 sm:$0xff]  }
  0xac   :  { %1995 = vmatpush2.bf16.msra.mxu0 %v6234_v52  ;;  %v6335_v52 = vld [vmem:[#allocation7 + $0x54c] ss:$24 sps:$4 sm:$0xff]  }
  0xad   :  { %2038 = vmatpush2.bf16.msra.mxu1 %v6237_v53  ;;  %1996 = vmatprep.subr.bf16.mxu0 %v6242_v54  ;;  %v6338_v53 = vld [vmem:[#allocation7 + $0x84c] ss:$24 sps:$4 sm:$0xff]   ;;  %v6333_v54 = vld [vmem:[#allocation7 + $0x548] ss:$24 sps:$4 sm:$0xff]  }
  0xae   :  { %2039 = vmatprep.subr.bf16.mxu1 %v6245_v55  ;;  %v6336_v55 = vld [vmem:[#allocation7 + $0x848] ss:$24 sps:$4 sm:$0xff]  }
  0xb0   :  { %1997 = vmatpush2.bf16.msra.mxu0 %v6240_v56  ;;  %v6341_v56 = vld [vmem:[#allocation7 + $0x51c] ss:$24 sps:$4 sm:$0xff]  }
  0xb1   :  { %2040 = vmatpush2.bf16.msra.mxu1 %v6243_v57  ;;  %1998 = vmatprep.subr.bf16.mxu0 %v6248_v58  ;;  %v6344_v57 = vld [vmem:[#allocation7 + $0x81c] ss:$24 sps:$4 sm:$0xff]   ;;  %v6339_v58 = vld [vmem:[#allocation7 + $0x518] ss:$24 sps:$4 sm:$0xff]  }
  0xb2   :  { %2041 = vmatprep.subr.bf16.mxu1 %v6251_v59  ;;  %v6342_v59 = vld [vmem:[#allocation7 + $0x818] ss:$24 sps:$4 sm:$0xff]  }
  0xb4   :  { %1999 = vmatpush2.bf16.msra.mxu0 %v6246_v60  ;;  %v6347_v60 = vld [vmem:[#allocation7 + $0x4ec] ss:$24 sps:$4 sm:$0xff]  }
  0xb5   :  { %2042 = vmatpush2.bf16.msra.mxu1 %v6249_v61  ;;  %2000 = vmatprep.subr.bf16.mxu0 %v6254_v62  ;;  %v6350_v61 = vld [vmem:[#allocation7 + $0x7ec] ss:$24 sps:$4 sm:$0xff]   ;;  %v6345_v62 = vld [vmem:[#allocation7 + $0x4e8] ss:$24 sps:$4 sm:$0xff]  }
  0xb6   :  { %2043 = vmatprep.subr.bf16.mxu1 %v6257_v63  ;;  %v6348_v63 = vld [vmem:[#allocation7 + $0x7e8] ss:$24 sps:$4 sm:$0xff]  }
  0xb8   :  { %2001 = vmatpush2.bf16.msra.mxu0 %v6252_v0  ;;  %v6353_v0 = vld [vmem:[#allocation7 + $0x4bc] ss:$24 sps:$4 sm:$0xff]  }
  0xb9   :  { %2044 = vmatpush2.bf16.msra.mxu1 %v6255_v1  ;;  %2002 = vmatprep.subr.bf16.mxu0 %v6260_v2  ;;  %v6356_v1 = vld [vmem:[#allocation7 + $0x7bc] ss:$24 sps:$4 sm:$0xff]   ;;  %v6351_v2 = vld [vmem:[#allocation7 + $0x4b8] ss:$24 sps:$4 sm:$0xff]  }
  0xba   :  { %2045 = vmatprep.subr.bf16.mxu1 %v6263_v3  ;;  %v6354_v3 = vld [vmem:[#allocation7 + $0x7b8] ss:$24 sps:$4 sm:$0xff]  }
  0xbc   :  { %2003 = vmatpush2.bf16.msra.mxu0 %v6258_v6  ;;  %v6359_v6 = vld [vmem:[#allocation7 + $0x48c] ss:$24 sps:$4 sm:$0xff]  }
  0xbd   :  { %2046 = vmatpush2.bf16.msra.mxu1 %v6261_v7  ;;  %2058 = vmatprep.subr.bf16.mxu0 %v6269_v8  ;;  %v6362_v7 = vld [vmem:[#allocation7 + $0x78c] ss:$24 sps:$4 sm:$0xff]   ;;  %v6357_v8 = vld [vmem:[#allocation7 + $0x488] ss:$24 sps:$4 sm:$0xff]  }
  0xbe   :  { %2101 = vmatprep.subr.bf16.mxu1 %v6272_v9  ;;  %v6360_v9 = vld [vmem:[#allocation7 + $0x788] ss:$24 sps:$4 sm:$0xff]  }
  0xbf   :  { %2005 = vmatmul.mubr.bf16.vlgmr.msra.gmra.mxu0 %v7187_v10 }
  0xc0   :  { %2048 = vmatmul.mubr.bf16.vlgmr.msra.gmra.mxu1 %v7178_v4  ;;  %2059 = vmatpush1.bf16.msra.mxu0 %v6267_v11  ;;  %v6290_v4 = vld [vmem:[#allocation7 + $0x6cc] ss:$24 sps:$4 sm:$0xff]  }
  0xc1   :  { %2102 = vmatpush1.bf16.msra.mxu1 %v6270_v12  ;;  %2060 = vmatprep.subr.bf16.mxu0 %v6275_v13  ;;  %v6365_v11 = vld [vmem:[#allocation7 + $0x164] ss:$24 sps:$4 sm:$0xff]   ;;  %v6363_v13 = vld [vmem:[#allocation7 + $0x160] ss:$24 sps:$4 sm:$0xff]  }
  0xc2   :  { %2103 = vmatprep.subr.bf16.mxu1 %v6278_v14  ;;  %2090 = vmatprep.mubr.bf16.mxu0 %v7175_v50  ;;  %v6294_v50 = vld [vmem:[#allocation7 + $0x698] ss:$24 sps:$4 sm:$0xff]   ;;  %v6368_v12 = vld [vmem:[#allocation7 + $0x464] ss:$24 sps:$4 sm:$0xff]  }
  0xc3   :  { %2133 = vmatprep.mubr.bf16.mxu1 %v7184_v34  ;;  %v6306_v34 = vld [vmem:[#allocation7 + $0x638] ss:$24 sps:$4 sm:$0xff]  }
  0xc4   :  { %2061 = vmatpush1.bf16.msra.mxu0 %v6273_v15  ;;  %v6366_v14 = vld [vmem:[#allocation7 + $0x460] ss:$24 sps:$4 sm:$0xff]   ;;  %v6371_v15 = vld [vmem:[#allocation7 + $0x134] ss:$24 sps:$4 sm:$0xff]  }
  0xc5   :  { %2104 = vmatpush1.bf16.msra.mxu1 %v6276_v16  ;;  %2062 = vmatprep.subr.bf16.mxu0 %v6281_v17  ;;  %v6374_v16 = vld [vmem:[#allocation7 + $0x434] ss:$24 sps:$4 sm:$0xff]   ;;  %v6369_v17 = vld [vmem:[#allocation7 + $0x130] ss:$24 sps:$4 sm:$0xff]  }
  0xc6   :  { %2105 = vmatprep.subr.bf16.mxu1 %v6284_v18  ;;  %v6372_v18 = vld [vmem:[#allocation7 + $0x430] ss:$24 sps:$4 sm:$0xff]  }
  0xc8   :  { %2063 = vmatpush1.bf16.msra.mxu0 %v6279_v19  ;;  %v6377_v19 = vld [vmem:[#allocation7 + $0x104] ss:$24 sps:$4 sm:$0xff]  }
  0xc9   :  { %2106 = vmatpush1.bf16.msra.mxu1 %v6282_v20  ;;  %2064 = vmatprep.subr.bf16.mxu0 %v6287_v21  ;;  %v6380_v20 = vld [vmem:[#allocation7 + $0x404] ss:$24 sps:$4 sm:$0xff]   ;;  %v6967_v21 = vld [vmem:[#allocation4 + $0x4] ss:$24 sps:$4 sm:$0xff]  }
  0xca   :  { %2107 = vmatprep.subr.bf16.mxu1 %v6290_v4  ;;  %v6968_v4 = vld [vmem:[#allocation4 + $0xc] ss:$24 sps:$4 sm:$0xff]  }
  0xcc   :  { %2065 = vmatpush1.bf16.msra.mxu0 %v6285_v22  ;;  %v6375_v22 = vld [vmem:[#allocation7 + $0x100] ss:$24 sps:$4 sm:$0xff]  }
  0xcd   :  { %2108 = vmatpush1.bf16.msra.mxu1 %v6288_v23  ;;  %2066 = vmatprep.subr.bf16.mxu0 %v6293_v24  ;;  %v6378_v23 = vld [vmem:[#allocation7 + $0x400] ss:$24 sps:$4 sm:$0xff]   ;;  %v6383_v24 = vld [vmem:[#allocation7 + $0xd4] ss:$24 sps:$4 sm:$0xff]  }
  0xce   :  { %2109 = vmatprep.subr.bf16.mxu1 %v6296_v25  ;;  %v6384_v25 = vld [vmem:[#allocation7 + $0x3d0] ss:$24 sps:$4 sm:$0xff]  }
  0xd0   :  { %2067 = vmatpush1.bf16.msra.mxu0 %v6291_v26  ;;  %v6389_v26 = vld [vmem:[#allocation7 + $0xa4] ss:$24 sps:$4 sm:$0xff]  }
  0xd1   :  { %2110 = vmatpush1.bf16.msra.mxu1 %v6294_v50  ;;  %2068 = vmatprep.subr.bf16.mxu0 %v6299_v27  ;;  %v6392_v50 = vld [vmem:[#allocation7 + $0x3a4] ss:$24 sps:$4 sm:$0xff]   ;;  %v6387_v27 = vld [vmem:[#allocation7 + $0xa0] ss:$24 sps:$4 sm:$0xff]  }
  0xd2   :  { %2111 = vmatprep.subr.bf16.mxu1 %v6302_v28  ;;  %v6390_v28 = vld [vmem:[#allocation7 + $0x3a0] ss:$24 sps:$4 sm:$0xff]  }
  0xd4   :  { %2069 = vmatpush1.bf16.msra.mxu0 %v6297_v29  ;;  %v6395_v29 = vld [vmem:[#allocation7 + $0x74] ss:$24 sps:$4 sm:$0xff]  }
  0xd5   :  { %2112 = vmatpush1.bf16.msra.mxu1 %v6300_v30  ;;  %2070 = vmatprep.subr.bf16.mxu0 %v6305_v31  ;;  %v6398_v30 = vld [vmem:[#allocation7 + $0x374] ss:$24 sps:$4 sm:$0xff]   ;;  %v6393_v31 = vld [vmem:[#allocation7 + $0x70] ss:$24 sps:$4 sm:$0xff]  }
  0xd6   :  { %2113 = vmatprep.subr.bf16.mxu1 %v6308_v32  ;;  %v6396_v32 = vld [vmem:[#allocation7 + $0x370] ss:$24 sps:$4 sm:$0xff]  }
  0xd8   :  { %2071 = vmatpush1.bf16.msra.mxu0 %v6303_v33  ;;  %v6401_v33 = vld [vmem:[#allocation7 + $0x44] ss:$24 sps:$4 sm:$0xff]  }
  0xd9   :  { %2114 = vmatpush1.bf16.msra.mxu1 %v6306_v34  ;;  %2072 = vmatprep.subr.bf16.mxu0 %v6311_v35  ;;  %v6404_v34 = vld [vmem:[#allocation7 + $0x344] ss:$24 sps:$4 sm:$0xff]   ;;  %v6399_v35 = vld [vmem:[#allocation7 + $0x40] ss:$24 sps:$4 sm:$0xff]  }
  0xda   :  { %2115 = vmatprep.subr.bf16.mxu1 %v6314_v36  ;;  %v6402_v36 = vld [vmem:[#allocation7 + $0x340] ss:$24 sps:$4 sm:$0xff]  }
  0xdc   :  { %2073 = vmatpush1.bf16.msra.mxu0 %v6309_v37  ;;  %v6407_v37 = vld [vmem:[#allocation7 + $0x14] ss:$24 sps:$4 sm:$0xff]  }
  0xdd   :  { %2116 = vmatpush1.bf16.msra.mxu1 %v6312_v38  ;;  %2074 = vmatprep.subr.bf16.mxu0 %v6317_v39  ;;  %v6410_v38 = vld [vmem:[#allocation7 + $0x314] ss:$24 sps:$4 sm:$0xff]   ;;  %v6405_v39 = vld [vmem:[#allocation7 + $0x10] ss:$24 sps:$4 sm:$0xff]  }
  0xde   :  { %2117 = vmatprep.subr.bf16.mxu1 %v6320_v40  ;;  %v6408_v40 = vld [vmem:[#allocation7 + $0x310] ss:$24 sps:$4 sm:$0xff]  }
  0xe0   :  { %2075 = vmatpush2.bf16.msra.mxu0 %v6315_v41  ;;  %v6413_v41 = vld [vmem:[#allocation7 + $0x2e4] ss:$24 sps:$4 sm:$0xff]  }
  0xe1   :  { %2118 = vmatpush2.bf16.msra.mxu1 %v6318_v42  ;;  %2076 = vmatprep.subr.bf16.mxu0 %v6323_v43  ;;  %v6416_v42 = vld [vmem:[#allocation7 + $0x5e4] ss:$24 sps:$4 sm:$0xff]   ;;  %v6411_v43 = vld [vmem:[#allocation7 + $0x2e0] ss:$24 sps:$4 sm:$0xff]  }
  0xe2   :  { %2119 = vmatprep.subr.bf16.mxu1 %v6326_v44  ;;  %v6414_v44 = vld [vmem:[#allocation7 + $0x5e0] ss:$24 sps:$4 sm:$0xff]  }
  0xe4   :  { %2077 = vmatpush2.bf16.msra.mxu0 %v6321_v45  ;;  %v6419_v45 = vld [vmem:[#allocation7 + $0x2b4] ss:$24 sps:$4 sm:$0xff]  }
  0xe5   :  { %2120 = vmatpush2.bf16.msra.mxu1 %v6324_v46  ;;  %2078 = vmatprep.subr.bf16.mxu0 %v6329_v47  ;;  %v6422_v46 = vld [vmem:[#allocation7 + $0x5b4] ss:$24 sps:$4 sm:$0xff]   ;;  %v6417_v47 = vld [vmem:[#allocation7 + $0x2b0] ss:$24 sps:$4 sm:$0xff]  }
  0xe6   :  { %2121 = vmatprep.subr.bf16.mxu1 %v6332_v48  ;;  %v6420_v48 = vld [vmem:[#allocation7 + $0x5b0] ss:$24 sps:$4 sm:$0xff]  }
  0xe8   :  { %2079 = vmatpush2.bf16.msra.mxu0 %v6327_v49  ;;  %v6425_v49 = vld [vmem:[#allocation7 + $0x284] ss:$24 sps:$4 sm:$0xff]  }
  0xe9   :  { %2122 = vmatpush2.bf16.msra.mxu1 %v6330_v51  ;;  %2080 = vmatprep.subr.bf16.mxu0 %v6335_v52  ;;  %v6428_v51 = vld [vmem:[#allocation7 + $0x584] ss:$24 sps:$4 sm:$0xff]   ;;  %v6423_v52 = vld [vmem:[#allocation7 + $0x280] ss:$24 sps:$4 sm:$0xff]  }
  0xea   :  { %2123 = vmatprep.subr.bf16.mxu1 %v6338_v53  ;;  %v6426_v53 = vld [vmem:[#allocation7 + $0x580] ss:$24 sps:$4 sm:$0xff]  }
  0xec   :  { %2081 = vmatpush2.bf16.msra.mxu0 %v6333_v54  ;;  %v6431_v54 = vld [vmem:[#allocation7 + $0x254] ss:$24 sps:$4 sm:$0xff]  }
  0xed   :  { %2124 = vmatpush2.bf16.msra.mxu1 %v6336_v55  ;;  %2082 = vmatprep.subr.bf16.mxu0 %v6341_v56  ;;  %v6434_v55 = vld [vmem:[#allocation7 + $0x554] ss:$24 sps:$4 sm:$0xff]   ;;  %v6429_v56 = vld [vmem:[#allocation7 + $0x250] ss:$24 sps:$4 sm:$0xff]  }
  0xee   :  { %2125 = vmatprep.subr.bf16.mxu1 %v6344_v57  ;;  %v6432_v57 = vld [vmem:[#allocation7 + $0x550] ss:$24 sps:$4 sm:$0xff]  }
  0xf0   :  { %2083 = vmatpush2.bf16.msra.mxu0 %v6339_v58  ;;  %v6437_v58 = vld [vmem:[#allocation7 + $0x224] ss:$24 sps:$4 sm:$0xff]  }
  0xf1   :  { %2126 = vmatpush2.bf16.msra.mxu1 %v6342_v59  ;;  %2084 = vmatprep.subr.bf16.mxu0 %v6347_v60  ;;  %v6440_v59 = vld [vmem:[#allocation7 + $0x524] ss:$24 sps:$4 sm:$0xff]   ;;  %v6435_v60 = vld [vmem:[#allocation7 + $0x220] ss:$24 sps:$4 sm:$0xff]  }
  0xf2   :  { %2127 = vmatprep.subr.bf16.mxu1 %v6350_v61  ;;  %v6438_v61 = vld [vmem:[#allocation7 + $0x520] ss:$24 sps:$4 sm:$0xff]  }
  0xf4   :  { %2085 = vmatpush2.bf16.msra.mxu0 %v6345_v62  ;;  %v6443_v62 = vld [vmem:[#allocation7 + $0x1f4] ss:$24 sps:$4 sm:$0xff]  }
  0xf5   :  { %2128 = vmatpush2.bf16.msra.mxu1 %v6348_v63  ;;  %2086 = vmatprep.subr.bf16.mxu0 %v6353_v0  ;;  %v6446_v63 = vld [vmem:[#allocation7 + $0x4f4] ss:$24 sps:$4 sm:$0xff]   ;;  %v6441_v0 = vld [vmem:[#allocation7 + $0x1f0] ss:$24 sps:$4 sm:$0xff]  }
  0xf6   :  { %2129 = vmatprep.subr.bf16.mxu1 %v6356_v1  ;;  %v6444_v1 = vld [vmem:[#allocation7 + $0x4f0] ss:$24 sps:$4 sm:$0xff]  }
  0xf8   :  { %2087 = vmatpush2.bf16.msra.mxu0 %v6351_v2  ;;  %v6449_v2 = vld [vmem:[#allocation7 + $0x1c4] ss:$24 sps:$4 sm:$0xff]  }
  0xf9   :  { %2130 = vmatpush2.bf16.msra.mxu1 %v6354_v3  ;;  %2088 = vmatprep.subr.bf16.mxu0 %v6359_v6  ;;  %v6452_v3 = vld [vmem:[#allocation7 + $0x4c4] ss:$24 sps:$4 sm:$0xff]   ;;  %v6447_v6 = vld [vmem:[#allocation7 + $0x1c0] ss:$24 sps:$4 sm:$0xff]  }
  0xfa   :  { %2131 = vmatprep.subr.bf16.mxu1 %v6362_v7  ;;  %v6450_v7 = vld [vmem:[#allocation7 + $0x4c0] ss:$24 sps:$4 sm:$0xff]  }
  0xfc   :  { %2089 = vmatpush2.bf16.msra.mxu0 %v6357_v8  ;;  %v6455_v8 = vld [vmem:[#allocation7 + $0x194] ss:$24 sps:$4 sm:$0xff]  }
  0xfd   :  { %2132 = vmatpush2.bf16.msra.mxu1 %v6360_v9  ;;  %2144 = vmatprep.subr.bf16.mxu0 %v6365_v11  ;;  %v6458_v9 = vld [vmem:[#allocation7 + $0x494] ss:$24 sps:$4 sm:$0xff]   ;;  %v6453_v11 = vld [vmem:[#allocation7 + $0x190] ss:$24 sps:$4 sm:$0xff]  }
  0xfe   :  { %2187 = vmatprep.subr.bf16.mxu1 %v6368_v12  ;;  %v6456_v12 = vld [vmem:[#allocation7 + $0x490] ss:$24 sps:$4 sm:$0xff]  }
  0xff   :  { %2091 = vmatmul.mubr.bf16.vlgmr.msra.gmra.mxu0 %v7180_v5  ;;  %v6386_v5 = vld [vmem:[#allocation7 + $0x3d4] ss:$24 sps:$4 sm:$0xff]  }
 0x100   :  { %2134 = vmatmul.mubr.bf16.vlgmr.msra.gmra.mxu1 %v7187_v10  ;;  %2145 = vmatpush1.bf16.msra.mxu0 %v6363_v13  ;;  %v6381_v10 = vld [vmem:[#allocation7 + $0xd0] ss:$24 sps:$4 sm:$0xff]   ;;  %v6461_v13 = vld [vmem:[#allocation7 + $0x764] ss:$24 sps:$4 sm:$0xff]  }
 0x101   :  { %2188 = vmatpush1.bf16.msra.mxu1 %v6366_v14  ;;  %2146 = vmatprep.subr.bf16.mxu0 %v6371_v15  ;;  %v6473_v14 = vld [vmem:[#allocation10 + $0xac] ss:$12 sps:$4 sm:$0xff]  }
 0x102   :  { %2189 = vmatprep.subr.bf16.mxu1 %v6374_v16  ;;  %2176 = vmatprep.mubr.bf16.mxu0 %v6967_v21  ;;  %v6459_v15 = vld [vmem:[#allocation7 + $0x760] ss:$24 sps:$4 sm:$0xff]   ;;  %v6471_v16 = vld [vmem:[#allocation10 + $0xa8] ss:$12 sps:$4 sm:$0xff]  }
 0x103   :  { %2219 = vmatprep.mubr.bf16.mxu1 %v6968_v4  ;;  %v6969_v21 = vld [vmem:[#allocation4] ss:$24 sps:$4 sm:$0xff]  }
 0x104   :  { %2147 = vmatpush1.bf16.msra.mxu0 %v6369_v17  ;;  %v6464_v17 = vld [vmem:[#allocation7 + $0x734] ss:$24 sps:$4 sm:$0xff]   ;;  %v6970_v4 = vld [vmem:[#allocation4 + $0x8] ss:$24 sps:$4 sm:$0xff]  }
 0x105   :  { %2190 = vmatpush1.bf16.msra.mxu1 %v6372_v18  ;;  %2148 = vmatprep.subr.bf16.mxu0 %v6377_v19  ;;  %v6479_v18 = vld [vmem:[#allocation10 + $0x94] ss:$12 sps:$4 sm:$0xff]   ;;  %v6462_v19 = vld [vmem:[#allocation7 + $0x730] ss:$24 sps:$4 sm:$0xff]  }
 0x106   :  { %2191 = vmatprep.subr.bf16.mxu1 %v6380_v20  ;;  %v6477_v20 = vld [vmem:[#allocation10 + $0x90] ss:$12 sps:$4 sm:$0xff]  }
 0x108   :  { %2149 = vmatpush1.bf16.msra.mxu0 %v6375_v22  ;;  %v6467_v22 = vld [vmem:[#allocation7 + $0x704] ss:$24 sps:$4 sm:$0xff]  }
 0x109   :  { %2192 = vmatpush1.bf16.msra.mxu1 %v6378_v23  ;;  %2150 = vmatprep.subr.bf16.mxu0 %v6383_v24  ;;  %v6485_v23 = vld [vmem:[#allocation10 + $0x7c] ss:$12 sps:$4 sm:$0xff]   ;;  %v6465_v24 = vld [vmem:[#allocation7 + $0x700] ss:$24 sps:$4 sm:$0xff]  }
 0x10a   :  { %2193 = vmatprep.subr.bf16.mxu1 %v6386_v5  ;;  %v6483_v5 = vld [vmem:[#allocation10 + $0x78] ss:$12 sps:$4 sm:$0xff]  }
 0x10c   :  { %2151 = vmatpush1.bf16.msra.mxu0 %v6381_v10  ;;  %v6971_v10 = vld [vmem:[#allocation4 + $0x14] ss:$24 sps:$4 sm:$0xff]  }
 0x10d   :  { %2194 = vmatpush1.bf16.msra.mxu1 %v6384_v25  ;;  %2152 = vmatprep.subr.bf16.mxu0 %v6389_v26  ;;  %v6470_v25 = vld [vmem:[#allocation7 + $0x6d4] ss:$24 sps:$4 sm:$0xff]   ;;  %v6491_v26 = vld [vmem:[#allocation10 + $0x64] ss:$12 sps:$4 sm:$0xff]  }
 0x10e   :  { %2195 = vmatprep.subr.bf16.mxu1 %v6392_v50  ;;  %v6468_v50 = vld [vmem:[#allocation7 + $0x6d0] ss:$24 sps:$4 sm:$0xff]  }
 0x110   :  { %2153 = vmatpush1.bf16.msra.mxu0 %v6387_v27  ;;  %v6489_v27 = vld [vmem:[#allocation10 + $0x60] ss:$12 sps:$4 sm:$0xff]  }
 0x111   :  { %2196 = vmatpush1.bf16.msra.mxu1 %v6390_v28  ;;  %2154 = vmatprep.subr.bf16.mxu0 %v6395_v29  ;;  %v6476_v28 = vld [vmem:[#allocation7 + $0x6a4] ss:$24 sps:$4 sm:$0xff]   ;;  %v6497_v29 = vld [vmem:[#allocation10 + $0x4c] ss:$12 sps:$4 sm:$0xff]  }
 0x112   :  { %2197 = vmatprep.subr.bf16.mxu1 %v6398_v30  ;;  %v6474_v30 = vld [vmem:[#allocation7 + $0x6a0] ss:$24 sps:$4 sm:$0xff]  }
 0x114   :  { %2155 = vmatpush1.bf16.msra.mxu0 %v6393_v31  ;;  %v6495_v31 = vld [vmem:[#allocation10 + $0x48] ss:$12 sps:$4 sm:$0xff]  }
 0x115   :  { %2198 = vmatpush1.bf16.msra.mxu1 %v6396_v32  ;;  %2156 = vmatprep.subr.bf16.mxu0 %v6401_v33  ;;  %v6482_v32 = vld [vmem:[#allocation7 + $0x674] ss:$24 sps:$4 sm:$0xff]  }
 0x116   :  { %2199 = vmatprep.subr.bf16.mxu1 %v6404_v34  ;;  %v6503_v33 = vld [vmem:[#allocation10 + $0x34] ss:$12 sps:$4 sm:$0xff]   ;;  %v6480_v34 = vld [vmem:[#allocation7 + $0x670] ss:$24 sps:$4 sm:$0xff]  }
 0x118   :  { %2157 = vmatpush1.bf16.msra.mxu0 %v6399_v35  ;;  %v6501_v35 = vld [vmem:[#allocation10 + $0x30] ss:$12 sps:$4 sm:$0xff]  }
 0x119   :  { %2200 = vmatpush1.bf16.msra.mxu1 %v6402_v36  ;;  %2158 = vmatprep.subr.bf16.mxu0 %v6407_v37  ;;  %v6488_v36 = vld [vmem:[#allocation7 + $0x644] ss:$24 sps:$4 sm:$0xff]  }
 0x11a   :  { %2201 = vmatprep.subr.bf16.mxu1 %v6410_v38  ;;  %v6509_v37 = vld [vmem:[#allocation10 + $0x1c] ss:$12 sps:$4 sm:$0xff]   ;;  %v6486_v38 = vld [vmem:[#allocation7 + $0x640] ss:$24 sps:$4 sm:$0xff]  }
 0x11c   :  { %2159 = vmatpush1.bf16.msra.mxu0 %v6405_v39  ;;  %v6507_v39 = vld [vmem:[#allocation10 + $0x18] ss:$12 sps:$4 sm:$0xff]  }
 0x11d   :  { %2202 = vmatpush1.bf16.msra.mxu1 %v6408_v40  ;;  %2160 = vmatprep.subr.bf16.mxu0 %v6413_v41  ;;  %v6494_v40 = vld [vmem:[#allocation7 + $0x614] ss:$24 sps:$4 sm:$0xff]   ;;  %v6515_v41 = vld [vmem:[#allocation10 + $0x4] ss:$12 sps:$4 sm:$0xff]  }
 0x11e   :  { %2203 = vmatprep.subr.bf16.mxu1 %v6416_v42  ;;  %v6492_v42 = vld [vmem:[#allocation7 + $0x610] ss:$24 sps:$4 sm:$0xff]  }
 0x120   :  { %2161 = vmatpush2.bf16.msra.mxu0 %v6411_v43  ;;  %v6513_v43 = vld [vmem:[#allocation10] ss:$12 sps:$4 sm:$0xff]  }
 0x121   :  { %2204 = vmatpush2.bf16.msra.mxu1 %v6414_v44  ;;  %2162 = vmatprep.subr.bf16.mxu0 %v6419_v45  ;;  %v6500_v44 = vld [vmem:[#allocation7 + $0x8e4] ss:$24 sps:$4 sm:$0xff]   ;;  %v6521_v45 = vld [vmem:[#allocation10 + $0x16c] ss:$12 sps:$4 sm:$0xff]  }
 0x122   :  { %2205 = vmatprep.subr.bf16.mxu1 %v6422_v46  ;;  %v6498_v46 = vld [vmem:[#allocation7 + $0x8e0] ss:$24 sps:$4 sm:$0xff]  }
 0x124   :  { %2163 = vmatpush2.bf16.msra.mxu0 %v6417_v47  ;;  %v6519_v47 = vld [vmem:[#allocation10 + $0x168] ss:$12 sps:$4 sm:$0xff]  }
 0x125   :  { %2206 = vmatpush2.bf16.msra.mxu1 %v6420_v48  ;;  %2164 = vmatprep.subr.bf16.mxu0 %v6425_v49  ;;  %v6506_v48 = vld [vmem:[#allocation7 + $0x8b4] ss:$24 sps:$4 sm:$0xff]  }
 0x126   :  { %2207 = vmatprep.subr.bf16.mxu1 %v6428_v51  ;;  %v6527_v49 = vld [vmem:[#allocation10 + $0x154] ss:$12 sps:$4 sm:$0xff]   ;;  %v6504_v51 = vld [vmem:[#allocation7 + $0x8b0] ss:$24 sps:$4 sm:$0xff]  }
 0x128   :  { %2165 = vmatpush2.bf16.msra.mxu0 %v6423_v52  ;;  %v6525_v52 = vld [vmem:[#allocation10 + $0x150] ss:$12 sps:$4 sm:$0xff]  }
 0x129   :  { %2208 = vmatpush2.bf16.msra.mxu1 %v6426_v53  ;;  %2166 = vmatprep.subr.bf16.mxu0 %v6431_v54  ;;  %v6512_v53 = vld [vmem:[#allocation7 + $0x884] ss:$24 sps:$4 sm:$0xff]  }
 0x12a   :  { %2209 = vmatprep.subr.bf16.mxu1 %v6434_v55  ;;  %v6533_v54 = vld [vmem:[#allocation10 + $0x13c] ss:$12 sps:$4 sm:$0xff]   ;;  %v6510_v55 = vld [vmem:[#allocation7 + $0x880] ss:$24 sps:$4 sm:$0xff]  }
 0x12c   :  { %2167 = vmatpush2.bf16.msra.mxu0 %v6429_v56  ;;  %v6531_v56 = vld [vmem:[#allocation10 + $0x138] ss:$12 sps:$4 sm:$0xff]  }
 0x12d   :  { %2210 = vmatpush2.bf16.msra.mxu1 %v6432_v57  ;;  %2168 = vmatprep.subr.bf16.mxu0 %v6437_v58  ;;  %v6518_v57 = vld [vmem:[#allocation7 + $0x854] ss:$24 sps:$4 sm:$0xff]   ;;  %v6539_v58 = vld [vmem:[#allocation10 + $0x124] ss:$12 sps:$4 sm:$0xff]  }
 0x12e   :  { %2211 = vmatprep.subr.bf16.mxu1 %v6440_v59  ;;  %v6516_v59 = vld [vmem:[#allocation7 + $0x850] ss:$24 sps:$4 sm:$0xff]  }
 0x130   :  { %2169 = vmatpush2.bf16.msra.mxu0 %v6435_v60  ;;  %v6537_v60 = vld [vmem:[#allocation10 + $0x120] ss:$12 sps:$4 sm:$0xff]  }
 0x131   :  { %2212 = vmatpush2.bf16.msra.mxu1 %v6438_v61  ;;  %2170 = vmatprep.subr.bf16.mxu0 %v6443_v62  ;;  %v6524_v61 = vld [vmem:[#allocation7 + $0x824] ss:$24 sps:$4 sm:$0xff]   ;;  %v6545_v62 = vld [vmem:[#allocation10 + $0x10c] ss:$12 sps:$4 sm:$0xff]  }
 0x132   :  { %2213 = vmatprep.subr.bf16.mxu1 %v6446_v63  ;;  %v6522_v63 = vld [vmem:[#allocation7 + $0x820] ss:$24 sps:$4 sm:$0xff]  }
 0x134   :  { %2171 = vmatpush2.bf16.msra.mxu0 %v6441_v0  ;;  %v6543_v0 = vld [vmem:[#allocation10 + $0x108] ss:$12 sps:$4 sm:$0xff]  }
 0x135   :  { %2214 = vmatpush2.bf16.msra.mxu1 %v6444_v1  ;;  %2172 = vmatprep.subr.bf16.mxu0 %v6449_v2  ;;  %v6530_v1 = vld [vmem:[#allocation7 + $0x7f4] ss:$24 sps:$4 sm:$0xff]  }
 0x136   :  { %2215 = vmatprep.subr.bf16.mxu1 %v6452_v3  ;;  %v6548_v2 = vld [vmem:[#allocation10 + $0xf4] ss:$12 sps:$4 sm:$0xff]   ;;  %v6528_v3 = vld [vmem:[#allocation7 + $0x7f0] ss:$24 sps:$4 sm:$0xff]  }
 0x138   :  { %2173 = vmatpush2.bf16.msra.mxu0 %v6447_v6  ;;  %v6546_v6 = vld [vmem:[#allocation10 + $0xf0] ss:$12 sps:$4 sm:$0xff]  }
 0x139   :  { %2216 = vmatpush2.bf16.msra.mxu1 %v6450_v7  ;;  %2174 = vmatprep.subr.bf16.mxu0 %v6455_v8  ;;  %v6536_v7 = vld [vmem:[#allocation7 + $0x7c4] ss:$24 sps:$4 sm:$0xff]  }
 0x13a   :  { %2217 = vmatprep.subr.bf16.mxu1 %v6458_v9  ;;  %v6551_v8 = vld [vmem:[#allocation10 + $0xdc] ss:$12 sps:$4 sm:$0xff]  }
 0x13c   :  { %2175 = vmatpush2.bf16.msra.mxu0 %v6453_v11  ;;  %v6534_v11 = vld [vmem:[#allocation7 + $0x7c0] ss:$24 sps:$4 sm:$0xff]  }
 0x13d   :  { %2218 = vmatpush2.bf16.msra.mxu1 %v6456_v12  ;;  %2230 = vmatprep.subr.bf16.mxu0 %v6461_v13  ;;  %v6549_v12 = vld [vmem:[#allocation10 + $0xd8] ss:$12 sps:$4 sm:$0xff]   ;;  %v6542_v13 = vld [vmem:[#allocation7 + $0x794] ss:$24 sps:$4 sm:$0xff]  }
 0x13e   :  { %3278 = vmatprep.subr.bf16.mxu1 %v6473_v14  ;;  %v6554_v14 = vld [vmem:[#allocation10 + $0xc4] ss:$12 sps:$4 sm:$0xff]  }
 0x13f   :  { %2177 = vmatmul.mubr.bf16.vlgmr.msra.gmra.mxu0 %v6969_v21  ;;  %v1920_v9 = vpop.f32.mrf.mxu0 }
 0x140   :  { %2220 = vmatmul.mubr.bf16.vlgmr.msra.gmra.mxu1 %v6970_v4  ;;  %2231 = vmatpush1.bf16.msra.mxu0 %v6459_v15  ;;  %v1963_v15 = vpop.f32.mrf.mxu1  ;;  %v6555_v4 = vld [vmem:[#allocation10 + $0x228] ss:$12 sps:$4 sm:$0xff]  }
 0x141   :  { %3279 = vmatpush1.bf16.msra.mxu1 %v6471_v16  ;;  %2232 = vmatprep.subr.bf16.mxu0 %v6464_v17  ;;  %v1922_v16 = vpop.f32.mrf.mxu0  ;;  %v6540_v17 = vld [vmem:[#allocation7 + $0x790] ss:$24 sps:$4 sm:$0xff]  }
 0x142   :  { %3280 = vmatprep.subr.bf16.mxu1 %v6479_v18  ;;  %2262 = vmatprep.mubr.bf16.mxu0 %v6971_v10  ;;  %v6552_v18 = vld [vmem:[#allocation10 + $0xc0] ss:$12 sps:$4 sm:$0xff]  }
 0x143   :  { %v1924_v21 = vpop.f32.mrf.mxu0 }
 0x144   :  { %2233 = vmatpush1.bf16.msra.mxu0 %v6462_v19  ;;  %v6557_v19 = vld [vmem:[#allocation10 + $0x22c] ss:$12 sps:$4 sm:$0xff]  }
 0x145   :  { %3281 = vmatpush1.bf16.msra.mxu1 %v6477_v20  ;;  %2234 = vmatprep.subr.bf16.mxu0 %v6467_v22  ;;  %v1965_v20 = vpop.f32.mrf.mxu1  ;;  %v6560_v22 = vld [vmem:[#allocation10 + $0x214] ss:$12 sps:$4 sm:$0xff]  }
 0x146   :  { %3282 = vmatprep.subr.bf16.mxu1 %v6485_v23 }
 0x147   :  { %v1967_v23 = vpop.f32.mrf.mxu1 }
 0x148   :  { %2235 = vmatpush1.bf16.msra.mxu0 %v6465_v24  ;;  %v1926_v24 = vpop.f32.mrf.mxu0 }
 0x149   :  { %3283 = vmatpush1.bf16.msra.mxu1 %v6483_v5  ;;  %2236 = vmatprep.subr.bf16.mxu0 %v6470_v25  ;;  %v6558_v5 = vld [vmem:[#allocation10 + $0x210] ss:$12 sps:$4 sm:$0xff]   ;;  %v6972_v25 = vld [vmem:[#allocation4 + $0x10] ss:$24 sps:$4 sm:$0xff]  }
 0x14a   :  { %3284 = vmatprep.subr.bf16.mxu1 %v6491_v26  ;;  %v6563_v26 = vld [vmem:[#allocation10 + $0x1fc] ss:$12 sps:$4 sm:$0xff]  }
 0x14c   :  { %2237 = vmatpush1.bf16.msra.mxu0 %v6468_v50  ;;  %v1969_v50 = vpop.f32.mrf.mxu1 }
 0x14d   :  { %3285 = vmatpush1.bf16.msra.mxu1 %v6489_v27  ;;  %2238 = vmatprep.subr.bf16.mxu0 %v6476_v28  ;;  %v6561_v28 = vld [vmem:[#allocation10 + $0x1f8] ss:$12 sps:$4 sm:$0xff]  }
 0x14e   :  { %3286 = vmatprep.subr.bf16.mxu1 %v6497_v29  ;;  %v1968_v29 = vadd.f32 %v1967_v23, %v1924_v21  ;;  %v6596_v21 = vld [vmem:[#allocation10 + $0x274] ss:$12 sps:$4 sm:$0xff]   ;;  %v6653_v23 = vld [vmem:[#allocation10 + $0x438] ss:$12 sps:$4 sm:$0xff]  }
 0x150   :  { %2239 = vmatpush1.bf16.msra.mxu0 %v6474_v30 }
 0x151   :  { %3287 = vmatpush1.bf16.msra.mxu1 %v6495_v31  ;;  %2240 = vmatprep.subr.bf16.mxu0 %v6482_v32  ;;  %v6566_v31 = vld [vmem:[#allocation10 + $0x1e4] ss:$12 sps:$4 sm:$0xff]   ;;  %v1966_v32 = vadd.f32 %v1965_v20, %v1922_v16  ;;  %v6643_v16 = vld [vmem:[#allocation10 + $0x468] ss:$12 sps:$4 sm:$0xff]  }
 0x152   :  { %3288 = vmatprep.subr.bf16.mxu1 %v6503_v33  ;;  %v1970_v33 = vadd.f32 %v1969_v50, %v1926_v24  ;;  %v6648_v20 = vld [vmem:[#allocation10 + $0x450] ss:$12 sps:$4 sm:$0xff]  }
 0x154   :  { %2241 = vmatpush1.bf16.msra.mxu0 %v6480_v34  ;;  %v1964_v34 = vadd.f32 %v1963_v15, %v1920_v9  ;;  %v6642_v9 = vld [vmem:[#allocation10 + $0x304] ss:$12 sps:$4 sm:$0xff]   ;;  %v6588_v15 = vld [vmem:[#allocation10 + $0x2a0] ss:$12 sps:$4 sm:$0xff]  }
 0x155   :  { %3289 = vmatpush1.bf16.msra.mxu1 %v6501_v35  ;;  %2242 = vmatprep.subr.bf16.mxu0 %v6488_v36 }
 0x156   :  { %3290 = vmatprep.subr.bf16.mxu1 %v6509_v37 }
 0x158   :  { %2243 = vmatpush1.bf16.msra.mxu0 %v6486_v38 }
 0x159   :  { %3291 = vmatpush1.bf16.msra.mxu1 %v6507_v39  ;;  %2244 = vmatprep.subr.bf16.mxu0 %v6494_v40  ;;  %v6621_v39 = vld [vmem:[#allocation10 + $0x3ac] ss:$12 sps:$4 sm:$0xff]  }
 0x15a   :  { %3292 = vmatprep.subr.bf16.mxu1 %v6515_v41 }
 0x15c   :  { %2245 = vmatpush1.bf16.msra.mxu0 %v6492_v42  ;;  %v6564_v42 = vld [vmem:[#allocation10 + $0x1e0] ss:$12 sps:$4 sm:$0xff]  }
 0x15d   :  { %3293 = vmatpush1.bf16.msra.mxu1 %v6513_v43  ;;  %2246 = vmatprep.subr.bf16.mxu0 %v6500_v44  ;;  %v6619_v43 = vld [vmem:[#allocation10 + $0x3a8] ss:$12 sps:$4 sm:$0xff]  }
 0x15e   :  { %3294 = vmatprep.subr.bf16.mxu1 %v6521_v45  ;;  %v6569_v45 = vld [vmem:[#allocation10 + $0x1cc] ss:$12 sps:$4 sm:$0xff]  }
 0x160   :  { %2247 = vmatpush2.bf16.msra.mxu0 %v6498_v46  ;;  %v6624_v46 = vld [vmem:[#allocation10 + $0x394] ss:$12 sps:$4 sm:$0xff]  }
 0x161   :  { %3295 = vmatpush2.bf16.msra.mxu1 %v6519_v47  ;;  %2248 = vmatprep.subr.bf16.mxu0 %v6506_v48  ;;  %v6567_v47 = vld [vmem:[#allocation10 + $0x1c8] ss:$12 sps:$4 sm:$0xff]   ;;  %v6622_v48 = vld [vmem:[#allocation10 + $0x390] ss:$12 sps:$4 sm:$0xff]  }
 0x162   :  { %3296 = vmatprep.subr.bf16.mxu1 %v6527_v49  ;;  %v6572_v49 = vld [vmem:[#allocation10 + $0x1b4] ss:$12 sps:$4 sm:$0xff]  }
 0x164   :  { %2249 = vmatpush2.bf16.msra.mxu0 %v6504_v51  ;;  %v6627_v51 = vld [vmem:[#allocation10 + $0x37c] ss:$12 sps:$4 sm:$0xff]  }
 0x165   :  { %3297 = vmatpush2.bf16.msra.mxu1 %v6525_v52  ;;  %2250 = vmatprep.subr.bf16.mxu0 %v6512_v53  ;;  %v6570_v52 = vld [vmem:[#allocation10 + $0x1b0] ss:$12 sps:$4 sm:$0xff]   ;;  %v6625_v53 = vld [vmem:[#allocation10 + $0x378] ss:$12 sps:$4 sm:$0xff]  }
 0x166   :  { %3298 = vmatprep.subr.bf16.mxu1 %v6533_v54  ;;  %v6575_v54 = vld [vmem:[#allocation10 + $0x19c] ss:$12 sps:$4 sm:$0xff]  }
 0x168   :  { %2251 = vmatpush2.bf16.msra.mxu0 %v6510_v55  ;;  %v6630_v55 = vld [vmem:[#allocation10 + $0x364] ss:$12 sps:$4 sm:$0xff]  }
 0x169   :  { %3299 = vmatpush2.bf16.msra.mxu1 %v6531_v56  ;;  %2252 = vmatprep.subr.bf16.mxu0 %v6518_v57  ;;  %v6573_v56 = vld [vmem:[#allocation10 + $0x198] ss:$12 sps:$4 sm:$0xff]   ;;  %v6628_v57 = vld [vmem:[#allocation10 + $0x360] ss:$12 sps:$4 sm:$0xff]  }
 0x16a   :  { %3300 = vmatprep.subr.bf16.mxu1 %v6539_v58  ;;  %v6578_v58 = vld [vmem:[#allocation10 + $0x184] ss:$12 sps:$4 sm:$0xff]  }
 0x16c   :  { %2253 = vmatpush2.bf16.msra.mxu0 %v6516_v59  ;;  %v6633_v59 = vld [vmem:[#allocation10 + $0x34c] ss:$12 sps:$4 sm:$0xff]  }
 0x16d   :  { %3301 = vmatpush2.bf16.msra.mxu1 %v6537_v60  ;;  %2254 = vmatprep.subr.bf16.mxu0 %v6524_v61  ;;  %v6576_v60 = vld [vmem:[#allocation10 + $0x180] ss:$12 sps:$4 sm:$0xff]   ;;  %v6631_v61 = vld [vmem:[#allocation10 + $0x348] ss:$12 sps:$4 sm:$0xff]  }
 0x16e   :  { %3302 = vmatprep.subr.bf16.mxu1 %v6545_v62  ;;  %v6581_v62 = vld [vmem:[#allocation10 + $0x2ec] ss:$12 sps:$4 sm:$0xff]  }
 0x170   :  { %2255 = vmatpush2.bf16.msra.mxu0 %v6522_v63  ;;  %v6636_v63 = vld [vmem:[#allocation10 + $0x334] ss:$12 sps:$4 sm:$0xff]  }
 0x171   :  { %3303 = vmatpush2.bf16.msra.mxu1 %v6543_v0  ;;  %2256 = vmatprep.subr.bf16.mxu0 %v6530_v1  ;;  %v6579_v0 = vld [vmem:[#allocation10 + $0x2e8] ss:$12 sps:$4 sm:$0xff]   ;;  %v6634_v1 = vld [vmem:[#allocation10 + $0x330] ss:$12 sps:$4 sm:$0xff]  }
 0x172   :  { %3304 = vmatprep.subr.bf16.mxu1 %v6548_v2  ;;  %v6584_v2 = vld [vmem:[#allocation10 + $0x2d4] ss:$12 sps:$4 sm:$0xff]  }
 0x174   :  { %2257 = vmatpush2.bf16.msra.mxu0 %v6528_v3  ;;  %v6639_v3 = vld [vmem:[#allocation10 + $0x31c] ss:$12 sps:$4 sm:$0xff]  }
 0x175   :  { %3305 = vmatpush2.bf16.msra.mxu1 %v6546_v6  ;;  %2258 = vmatprep.subr.bf16.mxu0 %v6536_v7  ;;  %v6582_v6 = vld [vmem:[#allocation10 + $0x2d0] ss:$12 sps:$4 sm:$0xff]   ;;  %v6637_v7 = vld [vmem:[#allocation10 + $0x318] ss:$12 sps:$4 sm:$0xff]  }
 0x176   :  { %3306 = vmatprep.subr.bf16.mxu1 %v6551_v8  ;;  %v6587_v8 = vld [vmem:[#allocation10 + $0x2bc] ss:$12 sps:$4 sm:$0xff]  }
 0x178   :  { %2259 = vmatpush2.bf16.msra.mxu0 %v6534_v11  ;;  %v6585_v11 = vld [vmem:[#allocation10 + $0x2b8] ss:$12 sps:$4 sm:$0xff]  }
 0x179   :  { %3307 = vmatpush2.bf16.msra.mxu1 %v6549_v12  ;;  %2260 = vmatprep.subr.bf16.mxu0 %v6542_v13  ;;  %v6640_v12 = vld [vmem:[#allocation10 + $0x300] ss:$12 sps:$4 sm:$0xff]   ;;  %v6590_v13 = vld [vmem:[#allocation10 + $0x2a4] ss:$12 sps:$4 sm:$0xff]  }
 0x17a   :  { %3308 = vmatprep.subr.bf16.mxu1 %v6554_v14  ;;  %v6645_v14 = vld [vmem:[#allocation10 + $0x46c] ss:$12 sps:$4 sm:$0xff]  }
 0x17c   :  { %2261 = vmatpush2.bf16.msra.mxu0 %v6540_v17  ;;  %v6593_v17 = vld [vmem:[#allocation10 + $0x28c] ss:$12 sps:$4 sm:$0xff]  }
 0x17d   :  { %3309 = vmatpush2.bf16.msra.mxu1 %v6552_v18  ;;  %3321 = vmatprep.subr.bf16.mxu0 %v6557_v19  ;;  %v6650_v18 = vld [vmem:[#allocation10 + $0x454] ss:$12 sps:$4 sm:$0xff]  }
 0x17e   :  { %3364 = vmatprep.subr.bf16.mxu1 %v6621_v39  ;;  %v6591_v19 = vld [vmem:[#allocation10 + $0x288] ss:$12 sps:$4 sm:$0xff]  }
 0x17f   :  { %v2006_v10 = vpop.f32.mrf.mxu0  ;;  %2263 = vmatmul.mubr.bf16.vlgmr.msra.gmra.mxu0 %v6972_v25  ;;  %v6597_v25 = vld [vmem:[#allocation10 + $0x258] ss:$12 sps:$4 sm:$0xff]  }
 0x180   :  { %3322 = vmatpush1.bf16.msra.mxu0 %v6555_v4  ;;  %v7201_v40 = vadd.f32 %v2006_v10, %v1964_v34  ;;  %v6655_v4 = vld [vmem:[#allocation10 + $0x43c] ss:$12 sps:$4 sm:$0xff]   ;;  %v2049_v24 = vpop.f32.mrf.mxu1  ;;  %v6660_v10 = vld [vmem:[#allocation10 + $0x424] ss:$12 sps:$4 sm:$0xff]  }
 0x181   :  { %v2008_v27 = vpop.f32.mrf.mxu0  ;;  %3323 = vmatprep.subr.bf16.mxu0 %v6560_v22  ;;  %v6594_v22 = vld [vmem:[#allocation10 + $0x270] ss:$12 sps:$4 sm:$0xff]  }
 0x182   :  { %v7197_v37 = vadd.f32 %v2008_v27, %v1966_v32  ;;  %v2051_v50 = vpop.f32.mrf.mxu1  ;;  %v6602_v27 = vld [vmem:[#allocation10 + $0x244] ss:$12 sps:$4 sm:$0xff]  }
 0x183   :  { %v2010_v30 = vpop.f32.mrf.mxu0  ;;  %v6603_v32 = vld [vmem:[#allocation10 + $0x170] ss:$12 sps:$4 sm:$0xff]  }
 0x184   :  { %3324 = vmatpush1.bf16.msra.mxu0 %v6558_v5  ;;  %v7195_v35 = vadd.f32 %v2010_v30, %v1968_v29  ;;  %v6599_v5 = vld [vmem:[#allocation10 + $0x25c] ss:$12 sps:$4 sm:$0xff]   ;;  %v2053_v29 = vpop.f32.mrf.mxu1  ;;  %v6600_v30 = vld [vmem:[#allocation10 + $0x240] ss:$12 sps:$4 sm:$0xff]  }
 0x185   :  { %v2012_v36 = vpop.f32.mrf.mxu0  ;;  %3325 = vmatprep.subr.bf16.mxu0 %v6563_v26  ;;  %v6658_v26 = vld [vmem:[#allocation10 + $0x420] ss:$12 sps:$4 sm:$0xff]  }
 0x186   :  { %v7199_v38 = vadd.f32 %v2012_v36, %v1970_v33  ;;  %v7209_v44 = vpack.c.bf16 %v7195_v35, %v7201_v40  ;;  %v6670_v33 = vld [vmem:[#allocation10 + $0x3f4] ss:$12 sps:$4 sm:$0xff]   ;;  %v2055_v34 = vpop.f32.mrf.mxu1  ;;  %v6668_v36 = vld [vmem:[#allocation10 + $0x3f0] ss:$12 sps:$4 sm:$0xff]  }
 0x188   :  { %v7205_v41 = vpack.c.bf16 %v7199_v38, %v7197_v37  ;;  %3326 = vmatpush1.bf16.msra.mxu0 %v6561_v28  ;;  %v6665_v28 = vld [vmem:[#allocation10 + $0x40c] ss:$12 sps:$4 sm:$0xff]  }
 0x189   :  { %3327 = vmatprep.subr.bf16.mxu0 %v6566_v31  ;;  %v6663_v31 = vld [vmem:[#allocation10 + $0x408] ss:$12 sps:$4 sm:$0xff]  }
 0x18a   :  { %3310 = vmatprep.mubr.bf16.mxu1 %v7205_v41 }
 0x18b   :  { %3311 = vmatmul.mubr.bf16.vlgmr.msra.gmra.mxu1 %v7209_v44 }
 0x18c   :  { %3328 = vmatpush1.bf16.msra.mxu0 %v6564_v42  ;;  %3365 = vmatpush1.bf16.msra.mxu1 %v6619_v43 }
 0x18d   :  { %3329 = vmatprep.subr.bf16.mxu0 %v6569_v45  ;;  %3366 = vmatprep.subr.bf16.mxu1 %v6624_v46  ;;  %v6675_v46 = vld [vmem:[#allocation10 + $0x3dc] ss:$12 sps:$4 sm:$0xff]  }
 0x190   :  { %3330 = vmatpush1.bf16.msra.mxu0 %v6567_v47  ;;  %3367 = vmatpush1.bf16.msra.mxu1 %v6622_v48  ;;  %v6673_v47 = vld [vmem:[#allocation10 + $0x3d8] ss:$12 sps:$4 sm:$0xff]  }
 0x191   :  { %3331 = vmatprep.subr.bf16.mxu0 %v6572_v49  ;;  %3368 = vmatprep.subr.bf16.mxu1 %v6627_v51 }
 0x194   :  { %3332 = vmatpush1.bf16.msra.mxu0 %v6570_v52  ;;  %3369 = vmatpush1.bf16.msra.mxu1 %v6625_v53 }
 0x195   :  { %3333 = vmatprep.subr.bf16.mxu0 %v6575_v54  ;;  %3370 = vmatprep.subr.bf16.mxu1 %v6630_v55 }
 0x198   :  { %3334 = vmatpush1.bf16.msra.mxu0 %v6573_v56  ;;  %3371 = vmatpush1.bf16.msra.mxu1 %v6628_v57  ;;  %v6680_v56 = vld [vmem:[#allocation10 + $0x3c4] ss:$12 sps:$4 sm:$0xff]  }
 0x199   :  { %3335 = vmatprep.subr.bf16.mxu0 %v6578_v58  ;;  %3372 = vmatprep.subr.bf16.mxu1 %v6633_v59  ;;  %v6678_v58 = vld [vmem:[#allocation10 + $0x3c0] ss:$12 sps:$4 sm:$0xff]  }
 0x19c   :  { %3336 = vmatpush1.bf16.msra.mxu0 %v6576_v60  ;;  %3373 = vmatpush1.bf16.msra.mxu1 %v6631_v61 }
 0x19d   :  { %3337 = vmatprep.subr.bf16.mxu0 %v6581_v62  ;;  %3374 = vmatprep.subr.bf16.mxu1 %v6636_v63  ;;  %v6683_v63 = vld [vmem:[#allocation10 + $0x2f0] ss:$12 sps:$4 sm:$0xff]  }
 0x1a0   :  { %3338 = vmatpush2.bf16.msra.mxu0 %v6579_v0  ;;  %3375 = vmatpush1.bf16.msra.mxu1 %v6634_v1  ;;  %v6604_v1 = vld [vmem:[#allocation10 + $0xb0] ss:$12 sps:$4 sm:$0xff]  }
 0x1a1   :  { %3339 = vmatprep.subr.bf16.mxu0 %v6584_v2  ;;  %3376 = vmatprep.subr.bf16.mxu1 %v6639_v3  ;;  %v6605_v3 = vld [vmem:[#allocation10 + $0x158] ss:$12 sps:$4 sm:$0xff]  }
 0x1a4   :  { %3340 = vmatpush2.bf16.msra.mxu0 %v6582_v6  ;;  %3377 = vmatpush1.bf16.msra.mxu1 %v6637_v7  ;;  %v6606_v6 = vld [vmem:[#allocation10 + $0x98] ss:$12 sps:$4 sm:$0xff]   ;;  %v6607_v7 = vld [vmem:[#allocation10 + $0x140] ss:$12 sps:$4 sm:$0xff]  }
 0x1a5   :  { %3341 = vmatprep.subr.bf16.mxu0 %v6587_v8  ;;  %3378 = vmatprep.subr.bf16.mxu1 %v6642_v9  ;;  %v6608_v8 = vld [vmem:[#allocation10 + $0x80] ss:$12 sps:$4 sm:$0xff]   ;;  %v6609_v9 = vld [vmem:[#allocation10 + $0x128] ss:$12 sps:$4 sm:$0xff]  }
 0x1a8   :  { %3342 = vmatpush2.bf16.msra.mxu0 %v6585_v11  ;;  %3379 = vmatpush1.bf16.msra.mxu1 %v6640_v12  ;;  %v6610_v11 = vld [vmem:[#allocation10 + $0x68] ss:$12 sps:$4 sm:$0xff]   ;;  %v6611_v12 = vld [vmem:[#allocation10 + $0x110] ss:$12 sps:$4 sm:$0xff]  }
 0x1a9   :  { %3343 = vmatprep.subr.bf16.mxu0 %v6590_v13  ;;  %3380 = vmatprep.subr.bf16.mxu1 %v6645_v14  ;;  %v6612_v13 = vld [vmem:[#allocation10 + $0x50] ss:$12 sps:$4 sm:$0xff]   ;;  %v6613_v14 = vld [vmem:[#allocation10 + $0xf8] ss:$12 sps:$4 sm:$0xff]  }
 0x1ac   :  { %3344 = vmatpush2.bf16.msra.mxu0 %v6588_v15  ;;  %3381 = vmatpush2.bf16.msra.mxu1 %v6643_v16  ;;  %v6614_v15 = vld [vmem:[#allocation10 + $0x38] ss:$12 sps:$4 sm:$0xff]   ;;  %v6615_v16 = vld [vmem:[#allocation10 + $0xe0] ss:$12 sps:$4 sm:$0xff]  }
 0x1ad   :  { %3345 = vmatprep.subr.bf16.mxu0 %v6593_v17  ;;  %3382 = vmatprep.subr.bf16.mxu1 %v6650_v18  ;;  %v6617_v17 = vld [vmem:[#allocation10 + $0xc8] ss:$12 sps:$4 sm:$0xff]  }
 0x1ae   :  { %v6618_v18 = vld [vmem:[#allocation10 + $0x8] ss:$12 sps:$4 sm:$0xff]  }
 0x1b0   :  { %3346 = vmatpush2.bf16.msra.mxu0 %v6591_v19  ;;  %3383 = vmatpush2.bf16.msra.mxu1 %v6648_v20  ;;  %v6646_v19 = vld [vmem:[#allocation10 + $0x470] ss:$12 sps:$4 sm:$0xff]  }
 0x1b1   :  { %3347 = vmatprep.subr.bf16.mxu0 %v6596_v21  ;;  %3384 = vmatprep.subr.bf16.mxu1 %v6655_v4  ;;  %v6647_v20 = vld [vmem:[#allocation10 + $0x3b0] ss:$12 sps:$4 sm:$0xff]   ;;  %v6651_v21 = vld [vmem:[#allocation10 + $0x458] ss:$12 sps:$4 sm:$0xff]  }
 0x1b2   :  { %v6652_v4 = vld [vmem:[#allocation10 + $0x398] ss:$12 sps:$4 sm:$0xff]  }
 0x1b4   :  { %3348 = vmatpush2.bf16.msra.mxu0 %v6594_v22  ;;  %3385 = vmatpush2.bf16.msra.mxu1 %v6653_v23  ;;  %v6656_v22 = vld [vmem:[#allocation10 + $0x440] ss:$12 sps:$4 sm:$0xff]  }
 0x1b5   :  { %3349 = vmatprep.subr.bf16.mxu0 %v6599_v5  ;;  %3386 = vmatprep.subr.bf16.mxu1 %v6660_v10  ;;  %v6657_v23 = vld [vmem:[#allocation10 + $0x380] ss:$12 sps:$4 sm:$0xff]   ;;  %v6662_v5 = vld [vmem:[#allocation10 + $0x368] ss:$12 sps:$4 sm:$0xff]   ;;  %v6666_v10 = vld [vmem:[#allocation10 + $0x410] ss:$12 sps:$4 sm:$0xff]  }
 0x1b8   :  { %3350 = vmatpush2.bf16.msra.mxu0 %v6597_v25  ;;  %3387 = vmatpush2.bf16.msra.mxu1 %v6658_v26  ;;  %v6667_v25 = vld [vmem:[#allocation10 + $0x350] ss:$12 sps:$4 sm:$0xff]   ;;  %v6671_v26 = vld [vmem:[#allocation10 + $0x3f8] ss:$12 sps:$4 sm:$0xff]  }
 0x1b9   :  { %3351 = vmatprep.subr.bf16.mxu0 %v6602_v27  ;;  %3388 = vmatprep.subr.bf16.mxu1 %v6665_v28  ;;  %v6677_v27 = vld [vmem:[#allocation10 + $0x320] ss:$12 sps:$4 sm:$0xff]   ;;  %v6681_v28 = vld [vmem:[#allocation10 + $0x3c8] ss:$12 sps:$4 sm:$0xff]  }
 0x1bc   :  { %3352 = vmatpush2.bf16.msra.mxu0 %v6600_v30  ;;  %3389 = vmatpush2.bf16.msra.mxu1 %v6663_v31 }
 0x1bd   :  { %5919 = vmatprep.subr.bf16.mxu0 %v6603_v32  ;;  %3390 = vmatprep.subr.bf16.mxu1 %v6670_v33 }
 0x1bf   :  { %v2092_v39 = vpop.f32.mrf.mxu0 }
 0x1c0   :  { %v2135_v42 = vpop.f32.mrf.mxu1  ;;  %3391 = vmatpush2.bf16.msra.mxu1 %v6668_v36  ;;  %v2093_v53 = vadd.f32 %v2092_v39, %v2049_v24  ;;  %v6661_v24 = vld [vmem:[#allocation10 + $0x428] ss:$12 sps:$4 sm:$0xff]  }
 0x1c1   :  { %v2094_v43 = vpop.f32.mrf.mxu0  ;;  %3392 = vmatprep.subr.bf16.mxu1 %v6675_v46 }
 0x1c2   :  { %v2137_v45 = vpop.f32.mrf.mxu1  ;;  %v2095_v51 = vadd.f32 %v2094_v43, %v2051_v50  ;;  %v7219_v62 = vadd.f32 %v2135_v42, %v2093_v53  ;;  %v6672_v50 = vld [vmem:[#allocation10 + $0x338] ss:$12 sps:$4 sm:$0xff]  }
 0x1c3   :  { %v2096_v48 = vpop.f32.mrf.mxu0 }
 0x1c4   :  { %v2139_v49 = vpop.f32.mrf.mxu1  ;;  %v2097_v52 = vadd.f32 %v2096_v48, %v2053_v29  ;;  %3393 = vmatpush2.bf16.msra.mxu1 %v6673_v47  ;;  %v7215_v60 = vadd.f32 %v2137_v45, %v2095_v51  ;;  %v6682_v29 = vld [vmem:[#allocation10 + $0x308] ss:$12 sps:$4 sm:$0xff]  }
 0x1c5   :  { %v2098_v54 = vpop.f32.mrf.mxu0  ;;  %3394 = vmatprep.subr.bf16.mxu1 %v6680_v56 }
 0x1c6   :  { %v2141_v55 = vpop.f32.mrf.mxu1  ;;  %v2099_v57 = vadd.f32 %v2098_v54, %v2055_v34  ;;  %v7213_v59 = vadd.f32 %v2139_v49, %v2097_v52 }
 0x1c8   :  { %v7217_v61 = vadd.f32 %v2141_v55, %v2099_v57  ;;  %3395 = vmatpush2.bf16.msra.mxu1 %v6678_v58  ;;  %v7227_v2 = vpack.c.bf16 %v7213_v59, %v7219_v62  ;;  %v6684_v58 = vld [vmem:[#allocation10 + $0x230] ss:$12 sps:$4 sm:$0xff]  }
 0x1c9   :  { %5941 = vmatprep.subr.bf16.mxu1 %v6683_v63 }
 0x1ca   :  { %v7223_v0 = vpack.c.bf16 %v7217_v61, %v7215_v60 }
 0x1cc   :  { %3353 = vmatprep.mubr.bf16.mxu0 %v7223_v0 }
 0x1cd   :  { %3354 = vmatmul.mubr.bf16.vlgmr.msra.gmra.mxu0 %v7227_v2 }
 0x1ce   :  { %5920 = vmatpush3.bf16.msra.mxu0 %v6604_v1  ;;  %3439 = vmatprep.mubr.bf16.mxu0 %v7205_v41  ;;  %v6616_v41 = vld [vmem:[#allocation10 + $0x20] ss:$12 sps:$4 sm:$0xff]   ;;  %v6685_v1 = vld [vmem:[#allocation10 + $0x2d8] ss:$12 sps:$4 sm:$0xff]  }
 0x1cf   :  { %5921 = vmatprep.subr.bf16.mxu0 %v6605_v3  ;;  %v6686_v3 = vld [vmem:[#allocation10 + $0x218] ss:$12 sps:$4 sm:$0xff]  }
 0x1d2   :  { %5922 = vmatpush3.bf16.msra.mxu0 %v6606_v6  ;;  %v6687_v6 = vld [vmem:[#allocation10 + $0x2c0] ss:$12 sps:$4 sm:$0xff]  }
 0x1d3   :  { %5923 = vmatprep.subr.bf16.mxu0 %v6607_v7  ;;  %v6688_v7 = vld [vmem:[#allocation10 + $0x200] ss:$12 sps:$4 sm:$0xff]  }
 0x1d6   :  { %5924 = vmatpush3.bf16.msra.mxu0 %v6608_v8  ;;  %v6689_v8 = vld [vmem:[#allocation10 + $0x2a8] ss:$12 sps:$4 sm:$0xff]  }
 0x1d7   :  { %5925 = vmatprep.subr.bf16.mxu0 %v6609_v9  ;;  %v6690_v9 = vld [vmem:[#allocation10 + $0x1e8] ss:$12 sps:$4 sm:$0xff]  }
 0x1da   :  { %5926 = vmatpush3.bf16.msra.mxu0 %v6610_v11  ;;  %v6691_v11 = vld [vmem:[#allocation10 + $0x290] ss:$12 sps:$4 sm:$0xff]  }
 0x1db   :  { %5927 = vmatprep.subr.bf16.mxu0 %v6611_v12  ;;  %v6692_v12 = vld [vmem:[#allocation10 + $0x1d0] ss:$12 sps:$4 sm:$0xff]  }
 0x1de   :  { %5928 = vmatpush3.bf16.msra.mxu0 %v6612_v13  ;;  %v6693_v13 = vld [vmem:[#allocation10 + $0x278] ss:$12 sps:$4 sm:$0xff]  }
 0x1df   :  { %5929 = vmatprep.subr.bf16.mxu0 %v6613_v14  ;;  %v6694_v14 = vld [vmem:[#allocation10 + $0x1b8] ss:$12 sps:$4 sm:$0xff]  }
 0x1e2   :  { %5930 = vmatpush3.bf16.msra.mxu0 %v6614_v15  ;;  %v6695_v15 = vld [vmem:[#allocation10 + $0x260] ss:$12 sps:$4 sm:$0xff]  }
 0x1e3   :  { %5931 = vmatprep.subr.bf16.mxu0 %v6615_v16  ;;  %v6697_v16 = vld [vmem:[#allocation10 + $0x248] ss:$12 sps:$4 sm:$0xff]  }
 0x1e6   :  { %5932 = vmatpush3.bf16.msra.mxu0 %v6616_v41  ;;  %v6698_v41 = vld [vmem:[#allocation10 + $0x188] ss:$12 sps:$4 sm:$0xff]  }
 0x1e7   :  { %5933 = vmatprep.subr.bf16.mxu0 %v6617_v17  ;;  %v6701_v17 = vld [vmem:[#allocation12 + $0x154] ss:$24 sps:$4 sm:$0xff]  }
 0x1ea   :  { %5934 = vmatpush3.bf16.msra.mxu0 %v6618_v18  ;;  %v6699_v18 = vld [vmem:[#allocation12 + $0x150] ss:$24 sps:$4 sm:$0xff]  }
 0x1eb   :  { %5963 = vmatprep.subr.bf16.mxu0 %v6646_v19  ;;  %v6704_v19 = vld [vmem:[#allocation12 + $0x124] ss:$24 sps:$4 sm:$0xff]  }
 0x1ed   :  { %3440 = vmatmul.mubr.bf16.vlgmr.msra.gmra.mxu0 %v7209_v44  ;;  %v6676_v44 = vld [vmem:[#allocation10 + $0x3e0] ss:$12 sps:$4 sm:$0xff]  }
 0x1ee   :  { %5964 = vmatpush3.bf16.msra.mxu0 %v6647_v20  ;;  %v6702_v20 = vld [vmem:[#allocation12 + $0x120] ss:$24 sps:$4 sm:$0xff]  }
 0x1ef   :  { %5965 = vmatprep.subr.bf16.mxu0 %v6651_v21  ;;  %v6707_v21 = vld [vmem:[#allocation12 + $0xf4] ss:$24 sps:$4 sm:$0xff]  }
 0x1f2   :  { %5966 = vmatpush3.bf16.msra.mxu0 %v6652_v4  ;;  %v6705_v4 = vld [vmem:[#allocation12 + $0xf0] ss:$24 sps:$4 sm:$0xff]  }
 0x1f3   :  { %5967 = vmatprep.subr.bf16.mxu0 %v6656_v22  ;;  %v6710_v22 = vld [vmem:[#allocation12 + $0xc4] ss:$24 sps:$4 sm:$0xff]  }
 0x1f6   :  { %5968 = vmatpush3.bf16.msra.mxu0 %v6657_v23  ;;  %v6708_v23 = vld [vmem:[#allocation12 + $0xc0] ss:$24 sps:$4 sm:$0xff]  }
 0x1f7   :  { %5969 = vmatprep.subr.bf16.mxu0 %v6661_v24  ;;  %v6713_v24 = vld [vmem:[#allocation12 + $0x94] ss:$24 sps:$4 sm:$0xff]  }
 0x1fa   :  { %5970 = vmatpush3.bf16.msra.mxu0 %v6662_v5  ;;  %v6711_v5 = vld [vmem:[#allocation12 + $0x90] ss:$24 sps:$4 sm:$0xff]  }
 0x1fb   :  { %5971 = vmatprep.subr.bf16.mxu0 %v6666_v10  ;;  %v6716_v10 = vld [vmem:[#allocation12 + $0x64] ss:$24 sps:$4 sm:$0xff]  }
 0x1fe   :  { %5972 = vmatpush3.bf16.msra.mxu0 %v6667_v25  ;;  %v6714_v25 = vld [vmem:[#allocation12 + $0x60] ss:$24 sps:$4 sm:$0xff]  }
 0x1ff   :  { %5973 = vmatprep.subr.bf16.mxu0 %v6671_v26  ;;  %v2178_v30 = vpop.f32.mrf.mxu0  ;;  %v6717_v26 = vld [vmem:[#allocation12 + $0x30] ss:$24 sps:$4 sm:$0xff]  }
 0x200   :  { %v2221_v31 = vpop.f32.mrf.mxu1 }
 0x201   :  { %v2180_v32 = vpop.f32.mrf.mxu0  ;;  %v2222_v51 = vadd.f32 %v2221_v31, %v2178_v30  ;;  %v6726_v30 = vld [vmem:[#allocation12 + $0x2a0] ss:$24 sps:$4 sm:$0xff]   ;;  %v6731_v31 = vld [vmem:[#allocation12 + $0x274] ss:$24 sps:$4 sm:$0xff]  }
 0x202   :  { %5974 = vmatpush3.bf16.msra.mxu0 %v6672_v50  ;;  %v2223_v33 = vpop.f32.mrf.mxu1  ;;  %v6722_v50 = vld [vmem:[#allocation12 + $0x4] ss:$24 sps:$4 sm:$0xff]  }
 0x203   :  { %5975 = vmatprep.subr.bf16.mxu0 %v6676_v44  ;;  %v2182_v34 = vpop.f32.mrf.mxu0  ;;  %v2224_v48 = vadd.f32 %v2223_v33, %v2180_v32  ;;  %v6720_v44 = vld [vmem:[#allocation12] ss:$24 sps:$4 sm:$0xff]   ;;  %v6729_v32 = vld [vmem:[#allocation12 + $0x270] ss:$24 sps:$4 sm:$0xff]   ;;  %v6734_v33 = vld [vmem:[#allocation12 + $0x244] ss:$24 sps:$4 sm:$0xff]  }
 0x204   :  { %v2225_v36 = vpop.f32.mrf.mxu1 }
 0x205   :  { %v2184_v39 = vpop.f32.mrf.mxu0  ;;  %v2226_v46 = vadd.f32 %v2225_v36, %v2182_v34  ;;  %v6732_v34 = vld [vmem:[#allocation12 + $0x240] ss:$24 sps:$4 sm:$0xff]   ;;  %v6737_v36 = vld [vmem:[#allocation12 + $0x214] ss:$24 sps:$4 sm:$0xff]  }
 0x206   :  { %5976 = vmatpush3.bf16.msra.mxu0 %v6677_v27  ;;  %v2227_v43 = vpop.f32.mrf.mxu1  ;;  %v6725_v27 = vld [vmem:[#allocation12 + $0x2d4] ss:$24 sps:$4 sm:$0xff]  }
 0x207   :  { %5977 = vmatprep.subr.bf16.mxu0 %v6681_v28  ;;  %v2228_v49 = vadd.f32 %v2227_v43, %v2184_v39  ;;  %v6723_v28 = vld [vmem:[#allocation12 + $0x2d0] ss:$24 sps:$4 sm:$0xff]  }
 0x208   :  { %v6735_v39 = vld [vmem:[#allocation12 + $0x210] ss:$24 sps:$4 sm:$0xff]  }
 0x209   :  { %v6747_v43 = vld [vmem:[#allocation12 + $0x450] ss:$24 sps:$4 sm:$0xff]  }
 0x20a   :  { %5978 = vmatpush3.bf16.msra.mxu0 %v6682_v29  ;;  %v6728_v29 = vld [vmem:[#allocation12 + $0x2a4] ss:$24 sps:$4 sm:$0xff]  }
 0x23f   :  { %v2264_v42 = vpop.f32.mrf.mxu0 }
 0x240   :  { %v7239_v56 = vadd.f32 %v2264_v42, %v2222_v51  ;;  %v6740_v42 = vld [vmem:[#allocation12 + $0x1e4] ss:$24 sps:$4 sm:$0xff]   ;;  %v6761_v51 = vld [vmem:[#allocation12 + $0x3f4] ss:$24 sps:$4 sm:$0xff]  }
 0x241   :  { %v2266_v45 = vpop.f32.mrf.mxu0 }
 0x242   :  { %v7235_v54 = vadd.f32 %v2266_v45, %v2224_v48  ;;  %v6749_v45 = vld [vmem:[#allocation12 + $0x454] ss:$24 sps:$4 sm:$0xff]   ;;  %v6753_v48 = vld [vmem:[#allocation12 + $0x420] ss:$24 sps:$4 sm:$0xff]  }
 0x243   :  { %v2268_v47 = vpop.f32.mrf.mxu0  ;;  %4446 = vmatprep.subr.bf16.mxu0 %v6749_v45  ;;  %v6756_v45 = vld [vmem:[#allocation12 + $0x428] ss:$24 sps:$4 sm:$0xff]  }
 0x244   :  { %v7233_v52 = vadd.f32 %v2268_v47, %v2226_v46  ;;  %v6755_v46 = vld [vmem:[#allocation12 + $0x424] ss:$24 sps:$4 sm:$0xff]   ;;  %v6738_v47 = vld [vmem:[#allocation12 + $0x1e0] ss:$24 sps:$4 sm:$0xff]  }
 0x245   :  { %v2270_v53 = vpop.f32.mrf.mxu0 }
 0x246   :  { %v7237_v55 = vadd.f32 %v2270_v53, %v2228_v49  ;;  %v2316_v63 = vpack.c.bf16 %v7233_v52, %v7239_v56  ;;  %v6743_v49 = vld [vmem:[#allocation12 + $0x1b4] ss:$24 sps:$4 sm:$0xff]   ;;  %v6741_v53 = vld [vmem:[#allocation12 + $0x1b0] ss:$24 sps:$4 sm:$0xff]  }
 0x248   :  { %v2317_v57 = vpack.c.bf16 %v7237_v55, %v7235_v54 }
 0x24a   :  { %3396 = vmatprep.mubr.bf16.mxu1 %v2317_v57  ;;  %3521 = vmatprep.mubr.bf16.mxu0 %v2317_v57  ;;  %v6759_v57 = vld [vmem:[#allocation12 + $0x3f0] ss:$24 sps:$4 sm:$0xff]  }
 0x24b   :  { %3397 = vmatmul.mubr.bf16.vlgmr.msra.gmra.mxu1 %v2316_v63  ;;  %3522 = vmatmul.mubr.bf16.vlgmr.msra.gmra.mxu0 %v2316_v63  ;;  %v6767_v63 = vld [vmem:[#allocation12 + $0x3c4] ss:$24 sps:$4 sm:$0xff]  }
 0x24c   :  { %5942 = vmatpush3.bf16.msra.mxu1 %v6684_v58  ;;  %3480 = vmatprep.mubr.bf16.mxu1 %v7223_v0  ;;  %v6696_v0 = vld [vmem:[#allocation10 + $0x1a0] ss:$12 sps:$4 sm:$0xff]   ;;  %v6746_v58 = vld [vmem:[#allocation12 + $0x184] ss:$24 sps:$4 sm:$0xff]  }
 0x24d   :  { %5943 = vmatprep.subr.bf16.mxu1 %v6685_v1  ;;  %4447 = vmatpush1.bf16.msra.mxu0 %v6747_v43  ;;  %v6744_v1 = vld [vmem:[#allocation12 + $0x180] ss:$24 sps:$4 sm:$0xff]   ;;  %v6758_v43 = vld [vmem:[#allocation12 + $0x42c] ss:$24 sps:$4 sm:$0xff]  }
 0x24e   :  { %4448 = vmatprep.subr.bf16.mxu0 %v6755_v46 }
 0x250   :  { %5944 = vmatpush3.bf16.msra.mxu1 %v6686_v3  ;;  %v6765_v3 = vld [vmem:[#allocation12 + $0x3c0] ss:$24 sps:$4 sm:$0xff]  }
 0x251   :  { %5945 = vmatprep.subr.bf16.mxu1 %v6687_v6  ;;  %4449 = vmatpush1.bf16.msra.mxu0 %v6753_v48  ;;  %v6752_v6 = vld [vmem:[#allocation12 + $0x45c] ss:$24 sps:$4 sm:$0xff]   ;;  %v6762_v48 = vld [vmem:[#allocation12 + $0x3f8] ss:$24 sps:$4 sm:$0xff]  }
 0x252   :  { %4450 = vmatprep.subr.bf16.mxu0 %v6761_v51  ;;  %v6770_v51 = vld [vmem:[#allocation12 + $0x3cc] ss:$24 sps:$4 sm:$0xff]  }
 0x254   :  { %5946 = vmatpush3.bf16.msra.mxu1 %v6688_v7  ;;  %v6773_v7 = vld [vmem:[#allocation12 + $0x394] ss:$24 sps:$4 sm:$0xff]  }
 0x255   :  { %5947 = vmatprep.subr.bf16.mxu1 %v6689_v8  ;;  %4451 = vmatpush1.bf16.msra.mxu0 %v6759_v57  ;;  %v6771_v8 = vld [vmem:[#allocation12 + $0x390] ss:$24 sps:$4 sm:$0xff]  }
 0x256   :  { %4452 = vmatprep.subr.bf16.mxu0 %v6767_v63 }
 0x258   :  { %5948 = vmatpush3.bf16.msra.mxu1 %v6690_v9  ;;  %v6779_v9 = vld [vmem:[#allocation12 + $0x364] ss:$24 sps:$4 sm:$0xff]  }
 0x259   :  { %5949 = vmatprep.subr.bf16.mxu1 %v6691_v11  ;;  %4453 = vmatpush1.bf16.msra.mxu0 %v6765_v3  ;;  %v6777_v11 = vld [vmem:[#allocation12 + $0x360] ss:$24 sps:$4 sm:$0xff]   ;;  %v6782_v3 = vld [vmem:[#allocation12 + $0x36c] ss:$24 sps:$4 sm:$0xff]  }
 0x25a   :  { %4454 = vmatprep.subr.bf16.mxu0 %v6773_v7  ;;  %v6780_v7 = vld [vmem:[#allocation12 + $0x368] ss:$24 sps:$4 sm:$0xff]  }
 0x25c   :  { %5950 = vmatpush3.bf16.msra.mxu1 %v6692_v12  ;;  %v6785_v12 = vld [vmem:[#allocation12 + $0x334] ss:$24 sps:$4 sm:$0xff]  }
 0x25d   :  { %5951 = vmatprep.subr.bf16.mxu1 %v6693_v13  ;;  %4455 = vmatpush1.bf16.msra.mxu0 %v6771_v8  ;;  %v6783_v13 = vld [vmem:[#allocation12 + $0x330] ss:$24 sps:$4 sm:$0xff]  }
 0x25e   :  { %4456 = vmatprep.subr.bf16.mxu0 %v6779_v9  ;;  %v6788_v9 = vld [vmem:[#allocation12 + $0x33c] ss:$24 sps:$4 sm:$0xff]  }
 0x260   :  { %5952 = vmatpush3.bf16.msra.mxu1 %v6694_v14  ;;  %v6791_v14 = vld [vmem:[#allocation12 + $0x304] ss:$24 sps:$4 sm:$0xff]  }
 0x261   :  { %5953 = vmatprep.subr.bf16.mxu1 %v6695_v15  ;;  %4457 = vmatpush1.bf16.msra.mxu0 %v6777_v11  ;;  %v6789_v15 = vld [vmem:[#allocation12 + $0x300] ss:$24 sps:$4 sm:$0xff]  }
 0x262   :  { %4458 = vmatprep.subr.bf16.mxu0 %v6785_v12 }
 0x264   :  { %5954 = vmatpush3.bf16.msra.mxu1 %v6696_v0  ;;  %v6797_v0 = vld [vmem:[#allocation12 + $0x15c] ss:$24 sps:$4 sm:$0xff]  }
 0x265   :  { %5955 = vmatprep.subr.bf16.mxu1 %v6697_v16  ;;  %4459 = vmatpush1.bf16.msra.mxu0 %v6783_v13  ;;  %v7112_v16 = vmov 0  }
 0x266   :  { %4460 = vmatprep.subr.bf16.mxu0 %v6791_v14  ;;  %4478 = vmatprep.mubr.bf16.mxu0 %v7112_v16 }
 0x268   :  { %5956 = vmatpush3.bf16.msra.mxu1 %v6698_v41  ;;  %v3312_v41 = vpop.f32.mrf.mxu1 }
 0x269   :  { %4403 = vmatprep.subr.bf16.mxu1 %v6701_v17  ;;  %4461 = vmatpush1.bf16.msra.mxu0 %v6789_v15  ;;  %v6786_v15 = vld [vmem:[#allocation12 + $0x338] ss:$24 sps:$4 sm:$0xff]  }
 0x26a   :  { %4489 = vmatprep.subr.bf16.mxu0 %v6797_v0  ;;  %v3314_v17 = vpop.f32.mrf.mxu1 }
 0x26b   :  { %3481 = vmatmul.mubr.bf16.vlgmr.msra.gmra.mxu1 %v7227_v2  ;;  %v6719_v2 = vld [vmem:[#allocation12 + $0x34] ss:$24 sps:$4 sm:$0xff]  }
 0x26c   :  { %4404 = vmatpush1.bf16.msra.mxu1 %v6699_v18 }
 0x26d   :  { %4405 = vmatprep.subr.bf16.mxu1 %v6704_v19  ;;  %v3316_v19 = vpop.f32.mrf.mxu1 }
 0x270   :  { %4406 = vmatpush1.bf16.msra.mxu1 %v6702_v20 }
 0x271   :  { %4407 = vmatprep.subr.bf16.mxu1 %v6707_v21  ;;  %v3318_v21 = vpop.f32.mrf.mxu1 }
 0x274   :  { %4408 = vmatpush1.bf16.msra.mxu1 %v6705_v4 }
 0x275   :  { %4409 = vmatprep.subr.bf16.mxu1 %v6710_v22 }
 0x278   :  { %4410 = vmatpush1.bf16.msra.mxu1 %v6708_v23 }
 0x279   :  { %4411 = vmatprep.subr.bf16.mxu1 %v6713_v24 }
 0x27c   :  { %4412 = vmatpush1.bf16.msra.mxu1 %v6711_v5 }
 0x27d   :  { %4413 = vmatprep.subr.bf16.mxu1 %v6716_v10 }
 0x280   :  { %4414 = vmatpush1.bf16.msra.mxu1 %v6714_v25 }
 0x281   :  { %4415 = vmatprep.subr.bf16.mxu1 %v6719_v2 }
 0x284   :  { %4416 = vmatpush1.bf16.msra.mxu1 %v6717_v26 }
 0x285   :  { %4417 = vmatprep.subr.bf16.mxu1 %v6722_v50 }
 0x288   :  { %4418 = vmatpush1.bf16.msra.mxu1 %v6720_v44 }
 0x289   :  { %4419 = vmatprep.subr.bf16.mxu1 %v6725_v27 }
 0x28c   :  { %4420 = vmatpush2.bf16.msra.mxu1 %v6723_v28 }
 0x28d   :  { %4421 = vmatprep.subr.bf16.mxu1 %v6728_v29  ;;  %v3355_v18 = vpop.f32.mrf.mxu0 }
 0x28e   :  { %v3356_v25 = vadd.f32 %v3355_v18, %v3312_v41  ;;  %v6794_v41 = vld [vmem:[#allocation12 + $0x30c] ss:$24 sps:$4 sm:$0xff]  }
 0x28f   :  { %v3357_v20 = vpop.f32.mrf.mxu0 }
 0x290   :  { %4422 = vmatpush2.bf16.msra.mxu1 %v6726_v30  ;;  %v3358_v5 = vadd.f32 %v3357_v20, %v3314_v17 }
 0x291   :  { %4423 = vmatprep.subr.bf16.mxu1 %v6731_v31  ;;  %v3359_v4 = vpop.f32.mrf.mxu0 }
 0x292   :  { %v3360_v10 = vadd.f32 %v3359_v4, %v3316_v19 }
 0x293   :  { %v3361_v23 = vpop.f32.mrf.mxu0 }
 0x294   :  { %4424 = vmatpush2.bf16.msra.mxu1 %v6729_v32  ;;  %v3362_v26 = vadd.f32 %v3361_v23, %v3318_v21  ;;  %v6800_v23 = vld [vmem:[#allocation12 + $0x164] ss:$24 sps:$4 sm:$0xff]  }
 0x295   :  { %4425 = vmatprep.subr.bf16.mxu1 %v6734_v33 }
 0x298   :  { %4426 = vmatpush2.bf16.msra.mxu1 %v6732_v34 }
 0x299   :  { %4427 = vmatprep.subr.bf16.mxu1 %v6737_v36  ;;  %v6750_v36 = vld [vmem:[#allocation12 + $0x458] ss:$24 sps:$4 sm:$0xff]  }
 0x29c   :  { %4428 = vmatpush2.bf16.msra.mxu1 %v6735_v39 }
 0x29d   :  { %4429 = vmatprep.subr.bf16.mxu1 %v6740_v42 }
 0x2a0   :  { %4430 = vmatpush2.bf16.msra.mxu1 %v6738_v47  ;;  %v6764_v47 = vld [vmem:[#allocation12 + $0x3fc] ss:$24 sps:$4 sm:$0xff]  }
 0x2a1   :  { %4431 = vmatprep.subr.bf16.mxu1 %v6743_v49 }
 0x2a4   :  { %4432 = vmatpush2.bf16.msra.mxu1 %v6741_v53  ;;  %v6768_v53 = vld [vmem:[#allocation12 + $0x3c8] ss:$24 sps:$4 sm:$0xff]  }
 0x2a5   :  { %4433 = vmatprep.subr.bf16.mxu1 %v6746_v58  ;;  %v6776_v58 = vld [vmem:[#allocation12 + $0x39c] ss:$24 sps:$4 sm:$0xff]  }
 0x2a8   :  { %4434 = vmatpush2.bf16.msra.mxu1 %v6744_v1  ;;  %v6774_v1 = vld [vmem:[#allocation12 + $0x398] ss:$24 sps:$4 sm:$0xff]  }
 0x2a9   :  { %4532 = vmatprep.subr.bf16.mxu1 %v6752_v6 }
 0x2ad   :  { %v5935_v39 = vpop.f32.mrf.mxu0 }
 0x2af   :  { %v5936_v46 = vpop.f32.mrf.mxu0 }
 0x2b0   :  { %v5937_v13 = vadd.f32 %v5936_v46, %v5935_v39  ;;  %v6810_v39 = vld [vmem:[#allocation12 + $0x100] ss:$24 sps:$4 sm:$0xff]  }
 0x2b1   :  { %v5938_v49 = vpop.f32.mrf.mxu0  ;;  %v6813_v46 = vld [vmem:[#allocation12 + $0xc8] ss:$24 sps:$4 sm:$0xff]  }
 0x2b3   :  { %v5939_v57 = vpop.f32.mrf.mxu0 }
 0x2b4   :  { %v5940_v20 = vadd.f32 %v5939_v57, %v5938_v49  ;;  %v6819_v49 = vld [vmem:[#allocation12 + $0x98] ss:$24 sps:$4 sm:$0xff]   ;;  %v6830_v57 = vld [vmem:[#allocation12 + $0x74] ss:$24 sps:$4 sm:$0xff]  }
 0x30b   :  { %v3398_v22 = vpop.f32.mrf.mxu1  ;;  %v5979_v63 = vpop.f32.mrf.mxu0 }
 0x30c   :  { %v3399_v27 = vadd.f32 %v3398_v22, %v3356_v25  ;;  %v6792_v22 = vld [vmem:[#allocation12 + $0x308] ss:$24 sps:$4 sm:$0xff]  }
 0x30d   :  { %v3400_v24 = vpop.f32.mrf.mxu1  ;;  %v5980_v6 = vpop.f32.mrf.mxu0 }
 0x30e   :  { %v3401_v50 = vadd.f32 %v3400_v24, %v3358_v5  ;;  %v3530_v33 = vmax.f32 %v3399_v27, 0.0  ;;  %v5981_v21 = vadd.f32 %v5980_v6, %v5979_v63  ;;  %v6828_v63 = vld [vmem:[#allocation12 + $0x70] ss:$24 sps:$4 sm:$0xff]  }
 0x30f   :  { %v3402_v2 = vpop.f32.mrf.mxu1  ;;  %v5982_v11 = vpop.f32.mrf.mxu0  ;;  %v6831_v6 = vld [vmem:[#allocation12 + $0x38] ss:$24 sps:$4 sm:$0xff]  }
 0x310   :  { %v3403_v44 = vadd.f32 %v3402_v2, %v3360_v10  ;;  %v3531_v31 = vmax.f32 %v3401_v50, 0.0  ;;  %v6795_v50 = vld [vmem:[#allocation12 + $0x158] ss:$24 sps:$4 sm:$0xff]  }
 0x311   :  { %v3404_v28 = vpop.f32.mrf.mxu1  ;;  %v5983_v18 = vpop.f32.mrf.mxu0 }
 0x312   :  { %v3405_v29 = vadd.f32 %v3404_v28, %v3362_v26  ;;  %v3533_v30 = vmax.f32 %v3403_v44, 0.0  ;;  %v5984_v24 = vadd.f32 %v5983_v18, %v5982_v11  ;;  %v6798_v44 = vld [vmem:[#allocation12 + $0x160] ss:$24 sps:$4 sm:$0xff]   ;;  %v6803_v28 = vld [vmem:[#allocation12 + $0x12c] ss:$24 sps:$4 sm:$0xff]  }
 0x313   :  { %v6837_v11 = vld [vmem:[#allocation12 + $0x8] ss:$24 sps:$4 sm:$0xff]  }
 0x314   :  { %v3534_v32 = vmax.f32 %v3405_v29, 0.0  ;;  %v7250_v42 = vpack.c.bf16 %v3533_v30, %v3530_v33  ;;  %v6806_v29 = vld [vmem:[#allocation12 + $0x134] ss:$24 sps:$4 sm:$0xff]   ;;  %v6801_v30 = vld [vmem:[#allocation12 + $0x128] ss:$24 sps:$4 sm:$0xff]  }
 0x315   :  { %v6812_v33 = vld [vmem:[#allocation12 + $0x104] ss:$24 sps:$4 sm:$0xff]   ;;  %v6849_v18 = vld [vmem:[#allocation12 + $0x2a8] ss:$24 sps:$4 sm:$0xff]  }
 0x316   :  { %v7248_v34 = vpack.c.bf16 %v3534_v32, %v3531_v31  ;;  %v6804_v31 = vld [vmem:[#allocation12 + $0x130] ss:$24 sps:$4 sm:$0xff]   ;;  %v6809_v32 = vld [vmem:[#allocation12 + $0xfc] ss:$24 sps:$4 sm:$0xff]  }
 0x318   :  { %4435 = vmatprep.mubr.bf16.mxu1 %v7248_v34 }
 0x319   :  { %4436 = vmatmul.mubr.bf16.vlgmr.msra.gmra.mxu1 %v7250_v42 }
 0x31a   :  { %4533 = vmatpush1.bf16.msra.mxu1 %v6750_v36  ;;  %4564 = vmatprep.mubr.bf16.mxu1 %v7112_v16  ;;  %v6807_v36 = vld [vmem:[#allocation12 + $0xf8] ss:$24 sps:$4 sm:$0xff]  }
 0x31b   :  { %4534 = vmatprep.subr.bf16.mxu1 %v6758_v43  ;;  %v6815_v43 = vld [vmem:[#allocation12 + $0xcc] ss:$24 sps:$4 sm:$0xff]  }
 0x31e   :  { %4535 = vmatpush1.bf16.msra.mxu1 %v6756_v45  ;;  %v6818_v45 = vld [vmem:[#allocation12 + $0xd4] ss:$24 sps:$4 sm:$0xff]  }
 0x31f   :  { %4536 = vmatprep.subr.bf16.mxu1 %v6764_v47  ;;  %v6816_v47 = vld [vmem:[#allocation12 + $0xd0] ss:$24 sps:$4 sm:$0xff]  }
 0x322   :  { %4537 = vmatpush1.bf16.msra.mxu1 %v6762_v48  ;;  %v6821_v48 = vld [vmem:[#allocation12 + $0x9c] ss:$24 sps:$4 sm:$0xff]  }
 0x323   :  { %4538 = vmatprep.subr.bf16.mxu1 %v6770_v51  ;;  %v6822_v51 = vld [vmem:[#allocation12 + $0xa0] ss:$24 sps:$4 sm:$0xff]  }
 0x326   :  { %4539 = vmatpush1.bf16.msra.mxu1 %v6768_v53  ;;  %v6827_v53 = vld [vmem:[#allocation12 + $0x6c] ss:$24 sps:$4 sm:$0xff]  }
 0x327   :  { %4540 = vmatprep.subr.bf16.mxu1 %v6776_v58  ;;  %v6825_v58 = vld [vmem:[#allocation12 + $0x68] ss:$24 sps:$4 sm:$0xff]  }
 0x32a   :  { %4541 = vmatpush1.bf16.msra.mxu1 %v6774_v1  ;;  %v6833_v1 = vld [vmem:[#allocation12 + $0x3c] ss:$24 sps:$4 sm:$0xff]  }
 0x32b   :  { %v5957_v8 = vpop.f32.mrf.mxu1  ;;  %4542 = vmatprep.subr.bf16.mxu1 %v6782_v3  ;;  %v6836_v3 = vld [vmem:[#allocation12 + $0x44] ss:$24 sps:$4 sm:$0xff]  }
 0x32d   :  { %v5958_v12 = vpop.f32.mrf.mxu1 }
 0x32e   :  { %v5959_v14 = vadd.f32 %v5958_v12, %v5957_v8  ;;  %4543 = vmatpush1.bf16.msra.mxu1 %v6780_v7  ;;  %v6834_v7 = vld [vmem:[#allocation12 + $0x40] ss:$24 sps:$4 sm:$0xff]   ;;  %v6839_v8 = vld [vmem:[#allocation12 + $0xc] ss:$24 sps:$4 sm:$0xff]   ;;  %v6840_v12 = vld [vmem:[#allocation12 + $0x10] ss:$24 sps:$4 sm:$0xff]  }
 0x32f   :  { %v5960_v0 = vpop.f32.mrf.mxu1  ;;  %4544 = vmatprep.subr.bf16.mxu1 %v6788_v9  ;;  %v6842_v9 = vld [vmem:[#allocation12 + $0x14] ss:$24 sps:$4 sm:$0xff]  }
 0x330   :  { %v3483_v17 = vadd.f32 %v5959_v14, %v5937_v13  ;;  %v6845_v13 = vld [vmem:[#allocation12 + $0x2dc] ss:$24 sps:$4 sm:$0xff]  }
 0x331   :  { %v5961_v19 = vpop.f32.mrf.mxu1  ;;  %v6848_v14 = vld [vmem:[#allocation12 + $0x2e4] ss:$24 sps:$4 sm:$0xff]  }
 0x332   :  { %v5962_v4 = vadd.f32 %v5961_v19, %v5960_v0  ;;  %4545 = vmatpush1.bf16.msra.mxu1 %v6786_v15  ;;  %v3524_v5 = vadd.f32 %v5981_v21, %v3483_v17  ;;  %v6843_v15 = vld [vmem:[#allocation12 + $0x2d8] ss:$24 sps:$4 sm:$0xff]   ;;  %v6854_v17 = vld [vmem:[#allocation12 + $0x2b4] ss:$24 sps:$4 sm:$0xff]   ;;  %v6860_v21 = vld [vmem:[#allocation12 + $0x284] ss:$24 sps:$4 sm:$0xff]  }
 0x333   :  { %4546 = vmatprep.subr.bf16.mxu1 %v6794_v41  ;;  %v6846_v0 = vld [vmem:[#allocation12 + $0x2e0] ss:$24 sps:$4 sm:$0xff]   ;;  %v6851_v41 = vld [vmem:[#allocation12 + $0x2ac] ss:$24 sps:$4 sm:$0xff]   ;;  %v6852_v19 = vld [vmem:[#allocation12 + $0x2b0] ss:$24 sps:$4 sm:$0xff]  }
 0x334   :  { %v3486_v10 = vadd.f32 %v5962_v4, %v5940_v20  ;;  %v3532_v2 = vmax.f32 %v3524_v5, 0.0  ;;  %v6857_v20 = vld [vmem:[#allocation12 + $0x27c] ss:$24 sps:$4 sm:$0xff]   ;;  %v6855_v4 = vld [vmem:[#allocation12 + $0x278] ss:$24 sps:$4 sm:$0xff]  }
 0x335   :  { %v6861_v5 = vld [vmem:[#allocation12 + $0x248] ss:$24 sps:$4 sm:$0xff]  }
 0x336   :  { %v3527_v25 = vadd.f32 %v5984_v24, %v3486_v10  ;;  %4547 = vmatpush1.bf16.msra.mxu1 %v6792_v22  ;;  %v6858_v22 = vld [vmem:[#allocation12 + $0x280] ss:$24 sps:$4 sm:$0xff]   ;;  %v6866_v24 = vld [vmem:[#allocation12 + $0x254] ss:$24 sps:$4 sm:$0xff]   ;;  %v6864_v10 = vld [vmem:[#allocation12 + $0x250] ss:$24 sps:$4 sm:$0xff]  }
 0x337   :  { %4575 = vmatprep.subr.bf16.mxu1 %v6800_v23  ;;  %v6863_v23 = vld [vmem:[#allocation12 + $0x24c] ss:$24 sps:$4 sm:$0xff]  }
 0x338   :  { %v3535_v26 = vmax.f32 %v3527_v25, 0.0  ;;  %v6869_v25 = vld [vmem:[#allocation12 + $0x21c] ss:$24 sps:$4 sm:$0xff]  }
 0x33a   :  { %v7255_v27 = vpack.c.bf16 %v3535_v26, %v3532_v2  ;;  %v6872_v2 = vld [vmem:[#allocation12 + $0x224] ss:$24 sps:$4 sm:$0xff]   ;;  %v6867_v26 = vld [vmem:[#allocation12 + $0x218] ss:$24 sps:$4 sm:$0xff]  }
 0x33c   :  { %4479 = vmatmul.mubr.bf16.vlgmr.msra.gmra.mxu0 %v7255_v27  ;;  %4565 = vmatmul.mubr.bf16.vlgmr.msra.gmra.mxu1 %v7255_v27 }
 0x33d   :  { %4490 = vmatpush1.bf16.msra.mxu0 %v6795_v50  ;;  %4576 = vmatpush1.bf16.msra.mxu1 %v6798_v44  ;;  %v6870_v50 = vld [vmem:[#allocation12 + $0x220] ss:$24 sps:$4 sm:$0xff]   ;;  %v6875_v44 = vld [vmem:[#allocation12 + $0x1ec] ss:$24 sps:$4 sm:$0xff]  }
 0x33e   :  { %4521 = vmatprep.mubr.bf16.mxu0 %v7248_v34  ;;  %4607 = vmatprep.mubr.bf16.mxu1 %v7248_v34  ;;  %v6824_v34 = vld [vmem:[#allocation12 + $0xa4] ss:$24 sps:$4 sm:$0xff]  }
 0x33f   :  { %4491 = vmatprep.subr.bf16.mxu0 %v6803_v28  ;;  %4577 = vmatprep.subr.bf16.mxu1 %v6806_v29  ;;  %v6878_v28 = vld [vmem:[#allocation12 + $0x1f4] ss:$24 sps:$4 sm:$0xff]   ;;  %v6873_v29 = vld [vmem:[#allocation12 + $0x1e8] ss:$24 sps:$4 sm:$0xff]  }
 0x341   :  { %4492 = vmatpush1.bf16.msra.mxu0 %v6801_v30  ;;  %4578 = vmatpush1.bf16.msra.mxu1 %v6804_v31  ;;  %v6876_v30 = vld [vmem:[#allocation12 + $0x1f0] ss:$24 sps:$4 sm:$0xff]   ;;  %v6881_v31 = vld [vmem:[#allocation12 + $0x1bc] ss:$24 sps:$4 sm:$0xff]  }
 0x342   :  { %4493 = vmatprep.subr.bf16.mxu0 %v6809_v32  ;;  %4579 = vmatprep.subr.bf16.mxu1 %v6812_v33  ;;  %v6884_v32 = vld [vmem:[#allocation12 + $0x1c4] ss:$24 sps:$4 sm:$0xff]   ;;  %v6879_v33 = vld [vmem:[#allocation12 + $0x1b8] ss:$24 sps:$4 sm:$0xff]  }
 0x345   :  { %4494 = vmatpush1.bf16.msra.mxu0 %v6807_v36  ;;  %4580 = vmatpush1.bf16.msra.mxu1 %v6810_v39  ;;  %v6882_v36 = vld [vmem:[#allocation12 + $0x1c0] ss:$24 sps:$4 sm:$0xff]   ;;  %v6887_v39 = vld [vmem:[#allocation12 + $0x18c] ss:$24 sps:$4 sm:$0xff]  }
 0x346   :  { %4495 = vmatprep.subr.bf16.mxu0 %v6815_v43  ;;  %4581 = vmatprep.subr.bf16.mxu1 %v6818_v45  ;;  %v6890_v43 = vld [vmem:[#allocation12 + $0x194] ss:$24 sps:$4 sm:$0xff]   ;;  %v6885_v45 = vld [vmem:[#allocation12 + $0x188] ss:$24 sps:$4 sm:$0xff]  }
 0x349   :  { %4496 = vmatpush1.bf16.msra.mxu0 %v6813_v46  ;;  %4582 = vmatpush1.bf16.msra.mxu1 %v6816_v47  ;;  %v6888_v46 = vld [vmem:[#allocation12 + $0x190] ss:$24 sps:$4 sm:$0xff]   ;;  %v6893_v47 = vld [vmem:[#allocation12 + $0x464] ss:$24 sps:$4 sm:$0xff]  }
 0x34a   :  { %4497 = vmatprep.subr.bf16.mxu0 %v6821_v48  ;;  %4583 = vmatprep.subr.bf16.mxu1 %v6824_v34  ;;  %v6891_v48 = vld [vmem:[#allocation12 + $0x460] ss:$24 sps:$4 sm:$0xff]   ;;  %v6896_v34 = vld [vmem:[#allocation12 + $0x434] ss:$24 sps:$4 sm:$0xff]  }
 0x34d   :  { %4498 = vmatpush1.bf16.msra.mxu0 %v6819_v49  ;;  %4584 = vmatpush1.bf16.msra.mxu1 %v6822_v51  ;;  %v6894_v49 = vld [vmem:[#allocation12 + $0x430] ss:$24 sps:$4 sm:$0xff]   ;;  %v6899_v51 = vld [vmem:[#allocation12 + $0x404] ss:$24 sps:$4 sm:$0xff]  }
 0x34e   :  { %4499 = vmatprep.subr.bf16.mxu0 %v6827_v53  ;;  %4585 = vmatprep.subr.bf16.mxu1 %v6830_v57  ;;  %v6897_v53 = vld [vmem:[#allocation12 + $0x400] ss:$24 sps:$4 sm:$0xff]   ;;  %v6902_v57 = vld [vmem:[#allocation12 + $0x3d4] ss:$24 sps:$4 sm:$0xff]  }
 0x351   :  { %4500 = vmatpush1.bf16.msra.mxu0 %v6825_v58  ;;  %4586 = vmatpush1.bf16.msra.mxu1 %v6828_v63  ;;  %v6900_v58 = vld [vmem:[#allocation12 + $0x3d0] ss:$24 sps:$4 sm:$0xff]   ;;  %v6905_v63 = vld [vmem:[#allocation12 + $0x3a4] ss:$24 sps:$4 sm:$0xff]  }
 0x352   :  { %4501 = vmatprep.subr.bf16.mxu0 %v6833_v1  ;;  %4587 = vmatprep.subr.bf16.mxu1 %v6836_v3  ;;  %v6903_v1 = vld [vmem:[#allocation12 + $0x3a0] ss:$24 sps:$4 sm:$0xff]   ;;  %v6908_v3 = vld [vmem:[#allocation12 + $0x374] ss:$24 sps:$4 sm:$0xff]  }
 0x355   :  { %4502 = vmatpush1.bf16.msra.mxu0 %v6831_v6  ;;  %4588 = vmatpush1.bf16.msra.mxu1 %v6834_v7  ;;  %v6911_v6 = vld [vmem:[#allocation12 + $0x344] ss:$24 sps:$4 sm:$0xff]   ;;  %v6914_v7 = vld [vmem:[#allocation12 + $0x314] ss:$24 sps:$4 sm:$0xff]  }
 0x356   :  { %4503 = vmatprep.subr.bf16.mxu0 %v6839_v8  ;;  %4589 = vmatprep.subr.bf16.mxu1 %v6842_v9  ;;  %v6912_v8 = vld [vmem:[#allocation12 + $0x310] ss:$24 sps:$4 sm:$0xff]   ;;  %v6915_v9 = vld [vmem:[#allocation9 + $0x78] sm:$0xff]  }
 0x359   :  { %4504 = vmatpush1.bf16.msra.mxu0 %v6837_v11  ;;  %4590 = vmatpush1.bf16.msra.mxu1 %v6840_v12  ;;  %v6916_v11 = vld [vmem:[#allocation9 + $0x38] sm:$0xff]  }
 0x35a   :  { %4505 = vmatprep.subr.bf16.mxu0 %v6845_v13  ;;  %4591 = vmatprep.subr.bf16.mxu1 %v6848_v14  ;;  %v6917_v12 = vld [vmem:[#allocation9 + $0xf8] sm:$0xff]   ;;  %v6919_v14 = vld [vmem:[#allocation9 + $0x70] sm:$0xff]  }
 0x35b   :  { %v6918_v13 = vld [vmem:[#allocation9 + $0xb8] sm:$0xff]  }
 0x35d   :  { %4506 = vmatpush2.bf16.msra.mxu0 %v6843_v15  ;;  %4592 = vmatpush2.bf16.msra.mxu1 %v6846_v0  ;;  %v6921_v15 = vld [vmem:[#allocation9 + $0xf0] sm:$0xff]  }
 0x35e   :  { %4507 = vmatprep.subr.bf16.mxu0 %v6851_v41  ;;  %4593 = vmatprep.subr.bf16.mxu1 %v6854_v17  ;;  %v6920_v0 = vld [vmem:[#allocation9 + $0x30] sm:$0xff]  }
 0x35f   :  { %v6922_v41 = vld [vmem:[#allocation9 + $0xb0] sm:$0xff]  }
 0x361   :  { %4508 = vmatpush2.bf16.msra.mxu0 %v6849_v18  ;;  %4594 = vmatpush2.bf16.msra.mxu1 %v6852_v19 }
 0x362   :  { %4509 = vmatprep.subr.bf16.mxu0 %v6857_v20  ;;  %4595 = vmatprep.subr.bf16.mxu1 %v6860_v21 }
 0x365   :  { %4510 = vmatpush2.bf16.msra.mxu0 %v6855_v4  ;;  %4596 = vmatpush2.bf16.msra.mxu1 %v6858_v22 }
 0x366   :  { %4511 = vmatprep.subr.bf16.mxu0 %v6863_v23  ;;  %4597 = vmatprep.subr.bf16.mxu1 %v6866_v24 }
 0x369   :  { %4512 = vmatpush2.bf16.msra.mxu0 %v6861_v5  ;;  %4598 = vmatpush2.bf16.msra.mxu1 %v6864_v10 }
 0x36a   :  { %4513 = vmatprep.subr.bf16.mxu0 %v6869_v25  ;;  %4599 = vmatprep.subr.bf16.mxu1 %v6872_v2 }
 0x36d   :  { %4514 = vmatpush2.bf16.msra.mxu0 %v6867_v26  ;;  %4600 = vmatpush2.bf16.msra.mxu1 %v6870_v50 }
 0x36e   :  { %4515 = vmatprep.subr.bf16.mxu0 %v6875_v44  ;;  %4601 = vmatprep.subr.bf16.mxu1 %v6878_v28 }
 0x371   :  { %4516 = vmatpush2.bf16.msra.mxu0 %v6873_v29  ;;  %4602 = vmatpush2.bf16.msra.mxu1 %v6876_v30 }
 0x372   :  { %4517 = vmatprep.subr.bf16.mxu0 %v6881_v31  ;;  %4603 = vmatprep.subr.bf16.mxu1 %v6884_v32 }
 0x375   :  { %4518 = vmatpush2.bf16.msra.mxu0 %v6879_v33  ;;  %4604 = vmatpush2.bf16.msra.mxu1 %v6882_v36 }
 0x376   :  { %4519 = vmatprep.subr.bf16.mxu0 %v6887_v39  ;;  %4605 = vmatprep.subr.bf16.mxu1 %v6890_v43 }
 0x379   :  { %4520 = vmatpush2.bf16.msra.mxu0 %v6885_v45  ;;  %4606 = vmatpush2.bf16.msra.mxu1 %v6888_v46  ;;  %v4686_v46 = vmul.f32 0.6, %v7197_v37 }
 0x37a   :  { %4618 = vmatprep.subr.bf16.mxu0 %v6893_v47  ;;  %6007 = vmatprep.subr.bf16.mxu1 %v6917_v12  ;;  %v4691_v12 = vmul.f32 0.6, %v7195_v35 }
 0x37c   :  { %4522 = vmatmul.mubr.bf16.vlgmr.msra.gmra.mxu0 %v7250_v42  ;;  %4608 = vmatmul.mubr.bf16.vlgmr.msra.gmra.mxu1 %v7250_v42  ;;  %v6906_v42 = vld [vmem:[#allocation12 + $0x370] ss:$24 sps:$4 sm:$0xff]  }
 0x37d   :  { %4619 = vmatpush1.bf16.msra.mxu0 %v6891_v48  ;;  %4650 = vmatprep.mubr.bf16.mxu0 %v7112_v16  ;;  %v6909_v16 = vld [vmem:[#allocation12 + $0x340] ss:$24 sps:$4 sm:$0xff]  }
 0x37e   :  { %4620 = vmatprep.subr.bf16.mxu0 %v6896_v34  ;;  %6008 = vmatpush3.bf16.msra.mxu1 %v6918_v13 }
 0x37f   :  { %6009 = vmatprep.subr.bf16.mxu1 %v6921_v15 }
 0x381   :  { %4621 = vmatpush1.bf16.msra.mxu0 %v6894_v49 }
 0x382   :  { %4622 = vmatprep.subr.bf16.mxu0 %v6899_v51  ;;  %6010 = vmatpush3.bf16.msra.mxu1 %v6922_v41 }
 0x385   :  { %4623 = vmatpush1.bf16.msra.mxu0 %v6897_v53 }
 0x386   :  { %4624 = vmatprep.subr.bf16.mxu0 %v6902_v57 }
 0x389   :  { %4625 = vmatpush1.bf16.msra.mxu0 %v6900_v58  ;;  %v4685_v58 = vmul.f32 0.6, %v7201_v40  ;;  %v4688_v40 = vmul.f32 0.6, %v7215_v60 }
 0x38a   :  { %4626 = vmatprep.subr.bf16.mxu0 %v6905_v63  ;;  %v4687_v63 = vmul.f32 0.6, %v7219_v62  ;;  %v4693_v62 = vmul.f32 0.6, %v7213_v59 }
 0x38d   :  { %4627 = vmatpush1.bf16.msra.mxu0 %v6903_v1 }
 0x38e   :  { %4628 = vmatprep.subr.bf16.mxu0 %v6908_v3 }
 0x391   :  { %4629 = vmatpush1.bf16.msra.mxu0 %v6906_v42 }
 0x392   :  { %4630 = vmatprep.subr.bf16.mxu0 %v6911_v6  ;;  %v4692_v6 = vmul.f32 0.6, %v7199_v38 }
 0x395   :  { %4631 = vmatpush1.bf16.msra.mxu0 %v6909_v16 }
 0x396   :  { %4632 = vmatprep.subr.bf16.mxu0 %v6914_v7 }
 0x399   :  { %4633 = vmatpush1.bf16.msra.mxu0 %v6912_v8 }
 0x39a   :  { %5985 = vmatprep.subr.bf16.mxu0 %v6915_v9 }
 0x39c   :  { %4651 = vmatmul.mubr.bf16.vlgmr.msra.gmra.mxu0 %v7255_v27 }
 0x39d   :  { %5986 = vmatpush3.bf16.msra.mxu0 %v6916_v11 }
 0x39e   :  { %5987 = vmatprep.subr.bf16.mxu0 %v6919_v14 }
 0x3a1   :  { %5988 = vmatpush3.bf16.msra.mxu0 %v6920_v0 }
 0x3d9   :  { %v4437_v18 = vpop.f32.mrf.mxu1 }
 0x3db   :  { %v4439_v27 = vpop.f32.mrf.mxu1 }
 0x3dd   :  { %v4441_v21 = vpop.f32.mrf.mxu1 }
 0x3df   :  { %v4443_v22 = vpop.f32.mrf.mxu1 }
 0x3fc   :  { %v4480_v17 = vpop.f32.mrf.mxu0  ;;  %v4566_v24 = vpop.f32.mrf.mxu1 }
 0x3fd   :  { %v4481_v25 = vadd.f32 %v4480_v17, %v4437_v18 }
 0x3fe   :  { %v4482_v19 = vpop.f32.mrf.mxu0  ;;  %v4568_v2 = vpop.f32.mrf.mxu1 }
 0x3ff   :  { %v4483_v10 = vadd.f32 %v4482_v19, %v4439_v27  ;;  %v4661_v29 = vmax.f32 %v4481_v25, 0.0  ;;  %v4694_v19 = vmul.f32 0.6, %v7217_v61 }
 0x400   :  { %v4484_v20 = vpop.f32.mrf.mxu0  ;;  %v4570_v31 = vpop.f32.mrf.mxu1 }
 0x401   :  { %v4662_v44 = vmax.f32 %v4483_v10, 0.0  ;;  %v4485_v30 = vadd.f32 %v4484_v20, %v4441_v21  ;;  %v4673_v47 = vmul.f32 0.4, %v4661_v29  ;;  %v4690_v29 = vmul.f32 0.6, %v7235_v54 }
 0x402   :  { %v4486_v4 = vpop.f32.mrf.mxu0  ;;  %v4572_v34 = vpop.f32.mrf.mxu1 }
 0x403   :  { %v4487_v28 = vadd.f32 %v4486_v4, %v4443_v22  ;;  %v4674_v43 = vmul.f32 0.4, %v4662_v44  ;;  %v4667_v48 = vmax.f32 %v4485_v30, 0.0  ;;  %v7271_v16 = vadd.f32 %v4685_v58, %v4673_v47 }
 0x405   :  { %v4668_v45 = vmax.f32 %v4487_v28, 0.0  ;;  %v7268_v1 = vadd.f32 %v4686_v46, %v4674_v43  ;;  %v4679_v37 = vmul.f32 0.4, %v4667_v48  ;;  %v4709_v15 = vmul.f32 %v7271_v16, %v7271_v16 }
 0x407   :  { %v4680_v3 = vmul.f32 0.4, %v4668_v45  ;;  %v4710_v13 = vmul.f32 %v7268_v1, %v7268_v1  ;;  %v7284_v0 = vadd.f32 %v4691_v12, %v4679_v37  ;;  %v4695_v45 = vmul.f32 0.6, %v7233_v52  ;;  %v6925_v12 = vld [vmem:[#allocation9 + $0xe8] sm:$0xff]  }
 0x408   :  { %6011 = vmatprep.subr.bf16.mxu1 %v6925_v12 }
 0x409   :  { %v7280_v14 = vadd.f32 %v4692_v6, %v4680_v3  ;;  %v4721_v27 = vadd.f32 %v4710_v13, %v4709_v15  ;;  %v4715_v22 = vmul.f32 %v7284_v0, %v7284_v0  ;;  %v6928_v13 = vld [vmem:[#allocation9 + $0x20] sm:$0xff]  }
 0x40a   :  { %v6930_v15 = vld [vmem:[#allocation9 + $0xa0] sm:$0xff]  }
 0x40b   :  { %v4716_v20 = vmul.f32 %v7280_v14, %v7280_v14 }
 0x40d   :  { %v4728_v30 = vadd.f32 %v4716_v20, %v4715_v22  ;;  %v6936_v20 = vld [vmem:[#allocation9 + $0x10] sm:$0xff]   ;;  %v6941_v22 = vld [vmem:[#allocation9 + $0xc8] sm:$0xff]  }
 0x43c   :  { %v4523_v23 = vpop.f32.mrf.mxu0  ;;  %v4609_v42 = vpop.f32.mrf.mxu1 }
 0x43d   :  { %v4567_v26 = vadd.f32 %v4566_v24, %v4523_v23 }
 0x43e   :  { %v4525_v5 = vpop.f32.mrf.mxu0  ;;  %v4611_v38 = vpop.f32.mrf.mxu1 }
 0x43f   :  { %v4663_v32 = vmax.f32 %v4567_v26, 0.0  ;;  %v4569_v33 = vadd.f32 %v4568_v2, %v4525_v5  ;;  %v4689_v26 = vmul.f32 0.6, %v7239_v56 }
 0x440   :  { %v4527_v50 = vpop.f32.mrf.mxu0  ;;  %v4613_v21 = vpop.f32.mrf.mxu1 }
 0x441   :  { %v4571_v36 = vadd.f32 %v4570_v31, %v4527_v50  ;;  %v4675_v49 = vmul.f32 0.4, %v4663_v32  ;;  %v4664_v51 = vmax.f32 %v4569_v33, 0.0 }
 0x442   :  { %v4529_v39 = vpop.f32.mrf.mxu0  ;;  %v4615_v31 = vpop.f32.mrf.mxu1 }
 0x443   :  { %v4669_v53 = vmax.f32 %v4571_v36, 0.0  ;;  %v4573_v57 = vadd.f32 %v4572_v34, %v4529_v39  ;;  %v7273_v7 = vadd.f32 %v4687_v63, %v4675_v49  ;;  %v4676_v8 = vmul.f32 0.4, %v4664_v51 }
 0x444   :  { %v4696_v51 = vmul.f32 0.6, %v7237_v55 }
 0x445   :  { %v4681_v9 = vmul.f32 0.4, %v4669_v53  ;;  %v4670_v11 = vmax.f32 %v4573_v57, 0.0  ;;  %v4711_v41 = vmul.f32 %v7273_v7, %v7273_v7  ;;  %v7288_v17 = vadd.f32 %v4688_v40, %v4676_v8  ;;  %v6926_v40 = vld [vmem:[#allocation9 + $0xa8] sm:$0xff]  }
 0x446   :  { %6012 = vmatpush3.bf16.msra.mxu1 %v6926_v40 }
 0x447   :  { %v7290_v35 = vadd.f32 %v4693_v62, %v4681_v9  ;;  %v4682_v60 = vmul.f32 0.4, %v4670_v11  ;;  %v4712_v5 = vmul.f32 %v7288_v17, %v7288_v17  ;;  %v4722_v2 = vadd.f32 %v4721_v27, %v4711_v41  ;;  %v6923_v9 = vld [vmem:[#allocation9 + $0x68] sm:$0xff]   ;;  %v6927_v62 = vld [vmem:[#allocation9 + $0x60] sm:$0xff]   ;;  %v6931_v41 = vld [vmem:[#allocation9 + $0x58] sm:$0xff]  }
 0x448   :  { %v6924_v11 = vld [vmem:[#allocation9 + $0x28] sm:$0xff]   ;;  %5989 = vmatprep.subr.bf16.mxu0 %v6923_v9  ;;  %v6937_v27 = vld [vmem:[#allocation9 + $0xd0] sm:$0xff]  }
 0x449   :  { %v4717_v10 = vmul.f32 %v7290_v35, %v7290_v35  ;;  %v7301_v25 = vadd.f32 %v4694_v19, %v4682_v60  ;;  %v4723_v47 = vadd.f32 %v4722_v2, %v4712_v5  ;;  %5990 = vmatpush3.bf16.msra.mxu0 %v6924_v11  ;;  %v6932_v60 = vld [vmem:[#allocation9 + $0x18] sm:$0xff]   ;;  %v6935_v19 = vld [vmem:[#allocation9 + $0x50] sm:$0xff]   ;;  %v6943_v5 = vld [vmem:[#allocation9 + $0x40] sm:$0xff]  }
 0x44a   :  { %5991 = vmatprep.subr.bf16.mxu0 %v6927_v62  ;;  %v6946_v2 = vld [vmem:[#allocation9 + $0x80] sm:$0xff]  }
 0x44b   :  { %v4718_v46 = vmul.f32 %v7301_v25, %v7301_v25  ;;  %v4729_v56 = vadd.f32 %v4728_v30, %v4717_v10  ;;  %v6945_v10 = vld [vmem:[#allocation9 + $0xc0] sm:$0xff]  }
 0x44d   :  { %v4730_v6 = vadd.f32 %v4729_v56, %v4718_v46  ;;  %5992 = vmatpush3.bf16.msra.mxu0 %v6928_v13 }
 0x44e   :  { %5993 = vmatprep.subr.bf16.mxu0 %v6931_v41 }
 0x451   :  { %5994 = vmatpush3.bf16.msra.mxu0 %v6932_v60 }
 0x452   :  { %5995 = vmatprep.subr.bf16.mxu0 %v6935_v19 }
 0x455   :  { %5996 = vmatpush3.bf16.msra.mxu0 %v6936_v20 }
 0x45c   :  { %v4652_v59 = vpop.f32.mrf.mxu0 }
 0x45d   :  { %v4653_v18 = vadd.f32 %v4652_v59, %v4609_v42  ;;  %v6933_v59 = vld [vmem:[#allocation9 + $0xd8] sm:$0xff]  }
 0x45e   :  { %v4654_v4 = vpop.f32.mrf.mxu0 }
 0x45f   :  { %v4665_v23 = vmax.f32 %v4653_v18, 0.0  ;;  %v4655_v24 = vadd.f32 %v4654_v4, %v4611_v38  ;;  %v6929_v38 = vld [vmem:[#allocation9 + $0xe0] sm:$0xff]   ;;  %v6934_v18 = vld [vmem:[#allocation9 + $0x98] sm:$0xff]   ;;  %v6939_v4 = vld [vmem:[#allocation9 + $0x48] sm:$0xff]  }
 0x460   :  { %v4656_v61 = vpop.f32.mrf.mxu0  ;;  %6013 = vmatprep.subr.bf16.mxu1 %v6929_v38  ;;  %5997 = vmatprep.subr.bf16.mxu0 %v6939_v4 }
 0x461   :  { %v4677_v50 = vmul.f32 0.4, %v4665_v23  ;;  %v4666_v44 = vmax.f32 %v4655_v24, 0.0  ;;  %v4657_v28 = vadd.f32 %v4656_v61, %v4613_v21  ;;  %6014 = vmatpush3.bf16.msra.mxu1 %v6930_v15  ;;  %v6938_v21 = vld [vmem:[#allocation9 + $0x90] sm:$0xff]   ;;  %v6940_v23 = vld [vmem:[#allocation9 + $0x8] sm:$0xff]   ;;  %v6944_v61 = vld [vmem:[#allocation9] sm:$0xff]  }
 0x462   :  { %v4658_v32 = vpop.f32.mrf.mxu0  ;;  %6015 = vmatprep.subr.bf16.mxu1 %v6933_v59  ;;  %v6942_v24 = vld [vmem:[#allocation9 + $0x88] sm:$0xff]   ;;  %5998 = vmatpush3.bf16.msra.mxu0 %v6940_v23 }
 0x463   :  { %v7305_v33 = vadd.f32 %v4689_v26, %v4677_v50  ;;  %v4678_v36 = vmul.f32 0.4, %v4666_v44  ;;  %v4671_v39 = vmax.f32 %v4657_v28, 0.0  ;;  %v4659_v43 = vadd.f32 %v4658_v32, %v4615_v31  ;;  %5999 = vmatprep.subr.bf16.mxu0 %v6943_v5  ;;  %v6947_v26 = vld [vmem:[#allocation9 + $0x178] sm:$0xff]  }
 0x465   :  { %v7310_v48 = vadd.f32 %v4690_v29, %v4678_v36  ;;  %v4683_v34 = vmul.f32 0.4, %v4671_v39  ;;  %v4672_v49 = vmax.f32 %v4659_v43, 0.0  ;;  %v4713_v54 = vmul.f32 %v7305_v33, %v7305_v33  ;;  %6016 = vmatpush3.bf16.msra.mxu1 %v6934_v18 }
 0x466   :  { %6017 = vmatprep.subr.bf16.mxu1 %v6937_v27  ;;  %6000 = vmatpush3.bf16.msra.mxu0 %v6944_v61 }
 0x467   :  { %v7315_v53 = vadd.f32 %v4695_v45, %v4683_v34  ;;  %v4684_v57 = vmul.f32 0.4, %v4672_v49  ;;  %v4714_v52 = vmul.f32 %v7310_v48, %v7310_v48  ;;  %v4724_v58 = vadd.f32 %v4723_v47, %v4713_v54  ;;  %6029 = vmatprep.subr.bf16.mxu0 %v6947_v26 }
 0x469   :  { %v7319_v63 = vadd.f32 %v4696_v51, %v4684_v57  ;;  %v4725_v3 = vadd.f32 %v4724_v58, %v4714_v52  ;;  %v4719_v42 = vmul.f32 %v7315_v53, %v7315_v53  ;;  %6018 = vmatpush3.bf16.msra.mxu1 %v6938_v21  ;;  %v6948_v57 = vld [vmem:[#allocation9 + $0x138] sm:$0xff]  }
 0x46a   :  { %6019 = vmatprep.subr.bf16.mxu1 %v6941_v22  ;;  %v6955_v52 = vld [vmem:[#allocation9 + $0x158] sm:$0xff]  }
 0x46b   :  { %4726 = vadd.xlane.f32.xlu0 %v4725_v3  ;;  %v4720_v37 = vmul.f32 %v7319_v63, %v7319_v63  ;;  %v4731_v8 = vadd.f32 %v4730_v6, %v4719_v42  ;;  %v6956_v58 = vld [vmem:[#allocation9 + $0x118] sm:$0xff]   ;;  %v6958_v3 = vld [vmem:[#allocation9 + $0x110] sm:$0xff]   ;;  %v6959_v42 = vld [vmem:[#allocation9 + $0x148] sm:$0xff]  }
 0x46c   :  { %v6960_v6 = vld [vmem:[#allocation9 + $0x108] sm:$0xff]  }
 0x46d   :  { %v4732_v55 = vadd.f32 %v4731_v8, %v4720_v37  ;;  %6020 = vmatpush3.bf16.msra.mxu1 %v6942_v24  ;;  %v6961_v37 = vld [vmem:[#allocation9 + $0x140] sm:$0xff]  }
 0x46e   :  { %6021 = vmatprep.subr.bf16.mxu1 %v6945_v10  ;;  %v6962_v8 = vld [vmem:[#allocation9 + $0x100] sm:$0xff]  }
 0x46f   :  { %4733 = vadd.xlane.f32.xlu0 %v4732_v55 }
 0x471   :  { %6022 = vmatpush3.bf16.msra.mxu1 %v6946_v2 }
 0x4f4   :  { %v4727_v50 = vpop.xlane.xlu0 %4726 }
 0x4f5   :  { %v4735_v44 = vmax.f32 %v4727_v50, 1e-30 }
 0x4f7   :  { %6963 = vrsqrt.f32 %v4735_v44 }
 0x4f8   :  { %v4734_v28 = vpop.xlane.xlu0 %4733 }
 0x4f9   :  { %v4736_v29 = vmax.f32 %v4734_v28, 1e-30 }
 0x4fb   :  { %6965 = vrsqrt.f32 %v4736_v29 }
 0x504   :  { %v6964_v30 = vpop.eup %6963 }
 0x505   :  { %v4740_v32 = vmul.f32 %v6964_v30, %v7268_v1  ;;  %v4742_v36 = vmul.f32 %v6964_v30, %v7288_v17  ;;  %v4739_v39 = vmul.f32 %v6964_v30, %v7271_v16  ;;  %v4741_v43 = vmul.f32 %v6964_v30, %v7273_v7  ;;  %v6949_v16 = vld [vmem:[#allocation9 + $0x170] sm:$0xff]  }
 0x506   :  { %v4744_v34 = vmul.f32 %v6964_v30, %v7310_v48  ;;  %v6954_v48 = vld [vmem:[#allocation9 + $0x120] sm:$0xff]   ;;  %v4743_v9 = vmul.f32 %v6964_v30, %v7305_v33  ;;  %v5265_v33 = vstv %s7343_s0 }
 0x508   :  { %v6966_v31 = vpop.eup %6965 }
 0x509   :  { %v4746_v45 = vmul.f32 %v6966_v31, %v7280_v14  ;;  %v4748_v46 = vmul.f32 %v6966_v31, %v7301_v25  ;;  %v4745_v47 = vmul.f32 %v6966_v31, %v7284_v0  ;;  %v4747_v56 = vmul.f32 %v6966_v31, %v7290_v35  ;;  %v6950_v14 = vld [vmem:[#allocation9 + $0x130] sm:$0xff]   ;;  %v6951_v0 = vld [vmem:[#allocation9 + $0x168] sm:$0xff]   ;;  %v6953_v25 = vld [vmem:[#allocation9 + $0x160] sm:$0xff]  }
 0x50a   :  { %v4750_v49 = vmul.f32 %v6966_v31, %v7319_v63  ;;  %v6952_v35 = vld [vmem:[#allocation9 + $0x128] sm:$0xff]   ;;  %v6957_v63 = vld [vmem:[#allocation9 + $0x150] sm:$0xff]   ;;  %v4749_v55 = vmul.f32 %v6966_v31, %v7315_v53 }
 0x50b   :  { %v4752_v54 = vpack.c.bf16 %v4746_v45, %v4740_v32  ;;  %v4754_v1 = vpack.c.bf16 %v4748_v46, %v4742_v36  ;;  %v4751_v51 = vpack.c.bf16 %v4745_v47, %v4739_v39  ;;  %v4753_v17 = vpack.c.bf16 %v4747_v56, %v4741_v43 }
 0x50c   :  { %v4756_v7 = vpack.c.bf16 %v4750_v49, %v4744_v34  ;;  %v4755_v11 = vpack.c.bf16 %v4749_v55, %v4743_v9 }
 0x50d   :  { %5173 = vmatprep.mubr.bf16.mxu0 %v4752_v54  ;;  %5214 = vmatprep.mubr.bf16.mxu1 %v4754_v1 }
 0x50e   :  { %5174 = vmatmul.mubr.bf16.vlgmr.msra.gmra.mxu0 %v4751_v51  ;;  %5215 = vmatmul.mubr.bf16.vlgmr.msra.gmra.mxu1 %v4753_v17 }
 0x50f   :  { %6030 = vmatpush3.bf16.msra.mxu0 %v6948_v57  ;;  %5255 = vmatprep.mubr.bf16.mxu0 %v4756_v7 }
 0x510   :  { %6031 = vmatprep.subr.bf16.mxu0 %v6949_v16 }
 0x513   :  { %6032 = vmatpush3.bf16.msra.mxu0 %v6950_v14 }
 0x514   :  { %6033 = vmatprep.subr.bf16.mxu0 %v6951_v0 }
 0x517   :  { %6034 = vmatpush3.bf16.msra.mxu0 %v6952_v35 }
 0x518   :  { %6035 = vmatprep.subr.bf16.mxu0 %v6953_v25 }
 0x51b   :  { %6036 = vmatpush3.bf16.msra.mxu0 %v6954_v48 }
 0x51c   :  { %6037 = vmatprep.subr.bf16.mxu0 %v6955_v52 }
 0x51f   :  { %6038 = vmatpush3.bf16.msra.mxu0 %v6956_v58 }
 0x520   :  { %6039 = vmatprep.subr.bf16.mxu0 %v6957_v63 }
 0x523   :  { %6040 = vmatpush3.bf16.msra.mxu0 %v6958_v3 }
 0x524   :  { %6041 = vmatprep.subr.bf16.mxu0 %v6959_v42 }
 0x527   :  { %6042 = vmatpush3.bf16.msra.mxu0 %v6960_v6 }
 0x528   :  { %6043 = vmatprep.subr.bf16.mxu0 %v6961_v37 }
 0x52b   :  { %6044 = vmatpush3.bf16.msra.mxu0 %v6962_v8 }
 0x52e   :  { %5256 = vmatmul.mubr.bf16.vlgmr.msra.gmra.mxu0 %v4755_v11 }
 0x5ce   :  { %v6001_v12 = vpop.f32.mrf.mxu0  ;;  %v6023_v40 = vpop.f32.mrf.mxu1 }
 0x5d0   :  { %v6002_v62 = vpop.f32.mrf.mxu0  ;;  %v6024_v13 = vpop.f32.mrf.mxu1 }
 0x5d1   :  { %v6003_v60 = vadd.f32 %v6002_v62, %v6001_v12  ;;  %v6025_v59 = vadd.f32 %v6024_v13, %v6023_v40 }
 0x5d2   :  { %v6004_v38 = vpop.f32.mrf.mxu0  ;;  %v6026_v15 = vpop.f32.mrf.mxu1 }
 0x5d3   :  { %v5217_v20 = vadd.f32 %v6025_v59, %v6003_v60 }
 0x5d4   :  { %v6005_v41 = vpop.f32.mrf.mxu0  ;;  %v6027_v18 = vpop.f32.mrf.mxu1 }
 0x5d5   :  { %v6006_v21 = vadd.f32 %v6005_v41, %v6004_v38  ;;  %v6028_v53 = vadd.f32 %v6027_v18, %v6026_v15 }
 0x5d7   :  { %v5220_v5 = vadd.f32 %v6028_v53, %v6006_v21 }
 0x5ee   :  { %v6045_v19 = vpop.f32.mrf.mxu0 }
 0x5f0   :  { %v6046_v27 = vpop.f32.mrf.mxu0 }
 0x5f1   :  { %v6047_v4 = vadd.f32 %v6046_v27, %v6045_v19 }
 0x5f2   :  { %v6048_v22 = vpop.f32.mrf.mxu0 }
 0x5f3   :  { %v5258_v23 = vadd.f32 %v6047_v4, %v5217_v20 }
 0x5f4   :  { %v6049_v24 = vpop.f32.mrf.mxu0 }
 0x5f5   :  { %v5266_v10 = vmul.f32 %v5265_v33, %v5258_v23  ;;  %v6050_v61 = vadd.f32 %v6049_v24, %v6048_v22 }
 0x5f7   :  { %5268 = vst [vmem:[#allocation13] sm:$0xff] %v5266_v10  ;;  %v5261_v2 = vadd.f32 %v6050_v61, %v5220_v5 }
 0x5f9   :  { %v5267_v26 = vmul.f32 %v5265_v33, %v5261_v2 }
 0x5fb   :  { %5269 = vst [vmem:[#allocation13 + $0x8] sm:$0xff] %v5267_v26 }
 0x5fc   :  { %7084 = shalt.err (!%p7081_p1)
}
 0x5fd   :  { %s7114_s0 = smov 128   ;;  %s7115_s28 = smov 8  }
 0x5fe   :  { %5281 = dma.vmem_to_hbm [thread:$0]  %s5276_s26, 256, %s7349_s6, [#allocation6], %s7114_s0, %s7114_s0, %s7115_s28  }
 0x5ff   :  { %7099 = dma.done.wait [#allocation6], 256  }
 0x600   :  { %7100 = vsyncadd [#allocation6], 4294967040 }
 0x601   :  { %5285 = vsyncpa [#allocation5], 1 }
 0x602   :  { %5286 = vsyncpa [#allocation8], 1 }
 0x603   :  { %5287 = vsyncpa [#allocation11], 1 }
 0x604   :  { %5288 = vsyncpa [#allocation6], 1 }

</bundles_post_ra>
